<compile_context>
chip_gen: v5e
topology: v5e:2x2
jax: 0.10.0
libtpu: 0.0.40
codegen_flags: <defaults>
</compile_context>

<pallas_src>
import functools

import jax
import jax.numpy as jnp
from jax import lax
from jax.experimental import pallas as pl
from jax.experimental.pallas import tpu as pltpu


K = 3            # STN3d k
N_POINTS = 16    # small num_points for the example (module default is 2500)
BATCH = 2

TM_TARGET = 2048           # target matmul rows per conv grid step
OUT_PAD = 128              # lane-dense padding of the k*k = 9 output columns
VMEM_LIMIT = 48 * 1024 * 1024   # explicit scoped-VMEM budget (safe on v5e..v7x)


def _round_up(a, m):
    return (a + m - 1) // m * m


def _ceil_div(a, b):
    return -(-a // b)


# ---------------------------------------------------------------------------
# Fused kernel: conv1/conv2/conv3 (+folded BN, ReLU), per-batch max pooling,
# and (on the last point tile) the fc1/fc2/fc3 head with the identity folded
# into the fc3 bias.
#   x_ref block    : (TM, 3) rows (W batch elements x TN points)
#   out_ref block  : (1, W, OUT_PAD), written once per batch group
#   pooled_ref     : (W8, 1024) f32 scratch running max (W8 = max(W, 8))
# ---------------------------------------------------------------------------
def conv_pool_fc_kernel(x_ref,
                        w1_ref, b1_ref, w2_ref, b2_ref, w3_ref, b3_ref,
                        wf1_ref, bf1_ref, wf2_ref, bf2_ref, wf3_ref, bf3_ref,
                        out_ref, pooled_ref, *, W, TN, W8):
    t = pl.program_id(1)
    x = x_ref[...]                                                   # (TM, 3)

    # conv1 (1x3 kernel): contraction depth is only 3 -> keep it on the VPU as
    # three broadcast FMAs instead of a nearly-empty MXU pass.
    h = (x[:, 0:1] * w1_ref[0:1, :]
         + x[:, 1:2] * w1_ref[1:2, :]
         + x[:, 2:3] * w1_ref[2:3, :]
         + b1_ref[...])
    h = jnp.maximum(h, 0.0)                                          # (TM, 64)

    # conv2 (1x1) + bn2 + relu : bf16 operands, f32 accumulation
    h = jnp.dot(h.astype(jnp.bfloat16), w2_ref[...],
                preferred_element_type=jnp.float32) + b2_ref[...]
    h = jnp.maximum(h, 0.0)                                          # (TM, 128)

    # conv3 (1x1) + bn3 + relu
    h = jnp.dot(h.astype(jnp.bfloat16), w3_ref[...],
                preferred_element_type=jnp.float32) + b3_ref[...]
    h = jnp.maximum(h, 0.0)                                          # (TM, 1024)

    # MaxPool over the point axis, per batch element in this tile.
    tile_max = jnp.max(h.reshape(W, TN, 1024), axis=1)               # (W, 1024)

    # Running max lives in VMEM scratch; the output block is only written on
    # the last point tile (single lane-dense store per batch group).
    @pl.when(t == 0)
    def _():
        if W8 > W:  # zero the M-padding rows once so the FC matmuls see zeros
            pooled_ref[...] = jnp.zeros_like(pooled_ref)
        pooled_ref[0:W, :] = tile_max

    @pl.when(t != 0)
    def _():
        pooled_ref[0:W, :] = jnp.maximum(pooled_ref[0:W, :], tile_max)

    # Fused FC head epilogue (fc1+bn4+relu, fc2+bn5+relu, fc3 + identity).
    @pl.when(t == pl.num_programs(1) - 1)
    def _():
        g = pooled_ref[...]                                          # (W8, 1024)
        f = jnp.dot(g.astype(jnp.bfloat16), wf1_ref[...],
                    preferred_element_type=jnp.float32) + bf1_ref[...]
        f = jnp.maximum(f, 0.0)                                      # (W8, 512)
        f = jnp.dot(f.astype(jnp.bfloat16), wf2_ref[...],
                    preferred_element_type=jnp.float32) + bf2_ref[...]
        f = jnp.maximum(f, 0.0)                                      # (W8, 256)
        # fc3: bf16 operands, identity already folded into bf3; columns >= 9
        # are zero padding for a 128-lane unmasked store.
        o = jnp.dot(f.astype(jnp.bfloat16), wf3_ref[...],
                    preferred_element_type=jnp.float32) + bf3_ref[...]
        out_ref[0] = o[0:W, :]                                       # (W, OUT_PAD)


@jax.jit
def stn3d_forward(x_nchw, params):
    """x_nchw: (B, 1, N, 3) float32 -> (B, k, k) float32."""
    B, _, N, _ = x_nchw.shape
    x = x_nchw[:, 0, :, :]                              # (B, N, 3) channels-last

    # ---- row tiling: collapse batch & point axes into matmul rows -----------
    N_pad8 = _round_up(N, 8)
    if N_pad8 > TM_TARGET:
        # Large N: tile the point axis.  Pick the tile COUNT first so the
        # point-axis padding stays minimal (instead of rounding N up to a
        # multiple of TM_TARGET).
        tpb = _ceil_div(N_pad8, TM_TARGET)              # point tiles per batch
        TN = _round_up(_ceil_div(N_pad8, tpb), 8)
        W = 1
    else:
        # Small N: pack whole batch elements into one tile.
        tpb = 1
        TN = N_pad8
        W = max(1, min(B, TM_TARGET // TN))
    # Guarantee >= 2 batch groups whenever B >= 2 so both v7x TensorCores work.
    if B >= 2:
        W = min(W, _ceil_div(B, 2))
    N_pad = TN * tpb
    B_pad = _round_up(B, W)                             # pad B instead of shrinking W
    nbg = B_pad // W                                    # batch groups (parallel axis)
    TM = W * TN                                         # matmul rows per grid step
    W8 = max(W, 8)                                      # M-padding for the FC head

    # pad the point axis by edge replication (does not change the max-pool),
    # then pad the batch axis with dummy (zero) elements that are discarded.
    if N_pad > N:
        x = jnp.concatenate(
            [x, jnp.broadcast_to(x[:, -1:, :], (B, N_pad - N, K))], axis=1)
    if B_pad > B:
        x = jnp.concatenate(
            [x, jnp.zeros((B_pad - B, N_pad, K), x.dtype)], axis=0)
    x_flat = x.reshape(B_pad * N_pad, K)

    p = params
    # fold the 3x3 identity into the fc3 bias and pad fc3 to 128 output lanes
    eye_flat = jnp.eye(K, dtype=jnp.float32).reshape(1, K * K)
    wf3_p = jnp.zeros((256, OUT_PAD), jnp.float32).at[:, :K * K].set(
        p['wf3']).astype(jnp.bfloat16)
    bf3_p = jnp.zeros((1, OUT_PAD), jnp.float32).at[:, :K * K].set(
        p['bf3'] + eye_flat)

    kernel = functools.partial(conv_pool_fc_kernel, W=W, TN=TN, W8=W8)
    zero_map = lambda bi, t: (0, 0)
    # NOTE: all weight BlockSpecs have constant index maps (fetched once,
    # resident in VMEM).  Default double-buffering of these ~1.7 MiB of bf16
    # weights is accepted; the explicit vmem_limit_bytes leaves ample headroom
    # on all generations (v7x has 64 MiB physical).
    out = pl.pallas_call(
        kernel,
        grid=(nbg, tpb),
        in_specs=[
            pl.BlockSpec((TM, K), lambda bi, t: (bi * tpb + t, 0)),   # x rows
            pl.BlockSpec((K, 64), zero_map),                          # w1 (f32)
            pl.BlockSpec((1, 64), zero_map),                          # b1
            pl.BlockSpec((64, 128), zero_map),                        # w2 (bf16)
            pl.BlockSpec((1, 128), zero_map),                         # b2
            pl.BlockSpec((128, 1024), zero_map),                      # w3 (bf16)
            pl.BlockSpec((1, 1024), zero_map),                        # b3
            pl.BlockSpec((1024, 512), zero_map),                      # wf1 (bf16)
            pl.BlockSpec((1, 512), zero_map),                         # bf1
            pl.BlockSpec((512, 256), zero_map),                       # wf2 (bf16)
            pl.BlockSpec((1, 256), zero_map),                         # bf2
            pl.BlockSpec((256, OUT_PAD), zero_map),                   # wf3 (bf16)
            pl.BlockSpec((1, OUT_PAD), zero_map),                     # bf3+I
        ],
        out_specs=pl.BlockSpec((1, W, OUT_PAD), lambda bi, t: (bi, 0, 0)),
        out_shape=jax.ShapeDtypeStruct((nbg, W, OUT_PAD), jnp.float32),
        scratch_shapes=[pltpu.VMEM((W8, 1024), jnp.float32)],
        compiler_params=pltpu.CompilerParams(
            dimension_semantics=("parallel", "arbitrary"),
            vmem_limit_bytes=VMEM_LIMIT),
    )(x_flat, p['w1'], p['b1'], p['w2'], p['b2'], p['w3'], p['b3'],
      p['wf1'], p['bf1'], p['wf2'], p['bf2'], wf3_p, bf3_p)

    out = out.reshape(B_pad, OUT_PAD)[:B, :K * K]       # drop batch padding + lanes
    return out.reshape(B, K, K)


# ---------------------------------------------------------------------------
# Deterministic parameter construction (synthetic; eval-mode BN folded in)
# ---------------------------------------------------------------------------
def _fold_bn(w, b, key, c, eps=1e-5):
    kg, kb, km, kv = jax.random.split(key, 4)
    gamma = 1.0 + 0.1 * jax.random.normal(kg, (c,), jnp.float32)
    beta = 0.1 * jax.random.normal(kb, (c,), jnp.float32)
    mean = 0.1 * jax.random.normal(km, (c,), jnp.float32)
    var = 1.0 + 0.1 * jax.random.uniform(kv, (c,), jnp.float32)
    scale = gamma * lax.rsqrt(var + eps)
    w_eff = w * scale[None, :]
    b_eff = (b - mean[None, :]) * scale[None, :] + beta[None, :]
    return w_eff, b_eff


def init_params(key):
    ks = jax.random.split(key, 11)

    def dense(k, fan_in, fan_out, wscale=0.1, bscale=0.05):
        kw, kb = jax.random.split(k)
        w = wscale * jax.random.normal(kw, (fan_in, fan_out), jnp.float32)
        b = bscale * jax.random.normal(kb, (1, fan_out), jnp.float32)
        return w, b

    w1, b1 = dense(ks[0], K, 64)          # conv1: Conv2d(1, 64, (1,3))
    w2, b2 = dense(ks[1], 64, 128)        # conv2: 1x1
    w3, b3 = dense(ks[2], 128, 1024)      # conv3: 1x1
    wf1, bf1 = dense(ks[3], 1024, 512)    # fc1
    wf2, bf2 = dense(ks[4], 512, 256)     # fc2
    # NOTE: the PyTorch module zero-initialises fc3; we use small non-zero
    # synthetic values so the numerical check exercises the full datapath
    # (forward semantics are identical for any parameter values).
    wf3, bf3 = dense(ks[5], 256, K * K, wscale=0.05, bscale=0.02)

    # fold eval-mode BN (bn1..bn5) into the preceding matmuls (in f32)
    w1, b1 = _fold_bn(w1, b1, ks[6], 64)
    w2, b2 = _fold_bn(w2, b2, ks[7], 128)
    w3, b3 = _fold_bn(w3, b3, ks[8], 1024)
    wf1, bf1 = _fold_bn(wf1, bf1, ks[9], 512)
    wf2, bf2 = _fold_bn(wf2, bf2, ks[10], 256)

    # large weights -> bf16 (weight-bandwidth bound kernel; MXU-native dtype)
    bf16 = lambda a: a.astype(jnp.bfloat16)
    return dict(w1=w1, b1=b1,
                w2=bf16(w2), b2=b2,
                w3=bf16(w3), b3=b3,
                wf1=bf16(wf1), bf1=bf1,
                wf2=bf16(wf2), bf2=bf2,
                wf3=wf3, bf3=bf3)


def reference_forward(x_nchw, p):
    """Plain-JAX reference mirroring the kernel's mixed precision (bf16
    weights and bf16 activation feeds with f32 accumulation)."""
    x = x_nchw[:, 0, :, :]                                           # (B, N, 3)
    w1 = p['w1']
    h = (x[..., 0:1] * w1[0, :] + x[..., 1:2] * w1[1, :]
         + x[..., 2:3] * w1[2, :] + p['b1'])
    h = jnp.maximum(h, 0.0)
    h = jnp.maximum(jnp.einsum('bnc,cd->bnd', h.astype(jnp.bfloat16), p['w2'],
                               preferred_element_type=jnp.float32) + p['b2'], 0.0)
    h = jnp.maximum(jnp.einsum('bnc,cd->bnd', h.astype(jnp.bfloat16), p['w3'],
                               preferred_element_type=jnp.float32) + p['b3'], 0.0)
    g = jnp.max(h, axis=1)                                           # (B, 1024)
    f = jnp.maximum(jnp.dot(g.astype(jnp.bfloat16), p['wf1'],
                            preferred_element_type=jnp.float32) + p['bf1'], 0.0)
    f = jnp.maximum(jnp.dot(f.astype(jnp.bfloat16), p['wf2'],
                            preferred_element_type=jnp.float32) + p['bf2'], 0.0)
    f = jnp.dot(f.astype(jnp.bfloat16), p['wf3'].astype(jnp.bfloat16),
                preferred_element_type=jnp.float32) + p['bf3']
    f = f + jnp.eye(K, dtype=jnp.float32).reshape(1, K * K)
    return f.reshape(-1, K, K)


if __name__ == "__main__":
    key = jax.random.PRNGKey(0)
    kx, kp = jax.random.split(key)

    # PyTorch-convention NCHW input: (batch, channels=1, num_points, 3)
    x = jax.random.normal(kx, (BATCH, 1, N_POINTS, K), jnp.float32)
    params = init_params(kp)

    out = jax.block_until_ready(stn3d_forward(x, params))
    ref = reference_forward(x, params)

    assert out.shape == (BATCH, K, K), out.shape
    assert jnp.allclose(out, ref, atol=2e-2, rtol=2e-2), (
        "mismatch vs reference, max abs err = %f"
        % float(jnp.max(jnp.abs(out - ref))))

    print("KERNEL_OK")
</pallas_src>

<mosaic_0001>
module attributes {stable_mosaic.version = 11 : i64} {
  func.func @conv_pool_fc_kernel(%arg0: i32, %arg1: i32, %arg2: memref<16x3xf32, #tpu.memory_space<vmem>>, %arg3: memref<3x64xf32, #tpu.memory_space<vmem>>, %arg4: memref<1x64xf32, #tpu.memory_space<vmem>>, %arg5: memref<64x128xbf16, #tpu.memory_space<vmem>>, %arg6: memref<1x128xf32, #tpu.memory_space<vmem>>, %arg7: memref<128x1024xbf16, #tpu.memory_space<vmem>>, %arg8: memref<1x1024xf32, #tpu.memory_space<vmem>>, %arg9: memref<1024x512xbf16, #tpu.memory_space<vmem>>, %arg10: memref<1x512xf32, #tpu.memory_space<vmem>>, %arg11: memref<512x256xbf16, #tpu.memory_space<vmem>>, %arg12: memref<1x256xf32, #tpu.memory_space<vmem>>, %arg13: memref<256x128xbf16, #tpu.memory_space<vmem>>, %arg14: memref<1x128xf32, #tpu.memory_space<vmem>>, %arg15: memref<1x1x128xf32, #tpu.memory_space<vmem>>, %arg16: memref<8x1024xf32, #tpu.memory_space<vmem>>) attributes {dimension_semantics = [#tpu.dimension_semantics<parallel>, #tpu.dimension_semantics<arbitrary>], iteration_bounds = array<i64: 2, 1>, scalar_prefetch = 0 : i64, scratch_operands = 1 : i64, tpu.core_type = #tpu.core_type<tc>, window_params = [{transform_indices = @transform_0, window_bounds = array<i64: 16, 3>}, {pipeline_mode = #tpu.pipeline_mode<synchronous>, transform_indices = @transform_1, window_bounds = array<i64: 3, 64>}, {pipeline_mode = #tpu.pipeline_mode<synchronous>, transform_indices = @transform_2, window_bounds = array<i64: 1, 64>}, {pipeline_mode = #tpu.pipeline_mode<synchronous>, transform_indices = @transform_3, window_bounds = array<i64: 64, 128>}, {pipeline_mode = #tpu.pipeline_mode<synchronous>, transform_indices = @transform_4, window_bounds = array<i64: 1, 128>}, {pipeline_mode = #tpu.pipeline_mode<synchronous>, transform_indices = @transform_5, window_bounds = array<i64: 128, 1024>}, {pipeline_mode = #tpu.pipeline_mode<synchronous>, transform_indices = @transform_6, window_bounds = array<i64: 1, 1024>}, {pipeline_mode = #tpu.pipeline_mode<synchronous>, transform_indices = @transform_7, window_bounds = array<i64: 1024, 512>}, {pipeline_mode = #tpu.pipeline_mode<synchronous>, transform_indices = @transform_8, window_bounds = array<i64: 1, 512>}, {pipeline_mode = #tpu.pipeline_mode<synchronous>, transform_indices = @transform_9, window_bounds = array<i64: 512, 256>}, {pipeline_mode = #tpu.pipeline_mode<synchronous>, transform_indices = @transform_10, window_bounds = array<i64: 1, 256>}, {pipeline_mode = #tpu.pipeline_mode<synchronous>, transform_indices = @transform_11, window_bounds = array<i64: 256, 128>}, {pipeline_mode = #tpu.pipeline_mode<synchronous>, transform_indices = @transform_12, window_bounds = array<i64: 1, 128>}, {transform_indices = @transform_13, window_bounds = array<i64: 1, 1, 128>}]} {
    %c0 = arith.constant 0 : index
    %c0_0 = arith.constant 0 : index
    %0 = vector.load %arg2[%c0, %c0_0] : memref<16x3xf32, #tpu.memory_space<vmem>>, vector<16x3xf32>
    %1 = vector.extract_strided_slice %0 {offsets = [0, 0], sizes = [16, 1], strides = [1, 1]} : vector<16x3xf32> to vector<16x1xf32>
    %c0_1 = arith.constant 0 : index
    %c0_2 = arith.constant 0 : index
    %2 = vector.load %arg3[%c0_1, %c0_2] : memref<3x64xf32, #tpu.memory_space<vmem>>, vector<1x64xf32>
    %3 = vector.broadcast %1 : vector<16x1xf32> to vector<16x64xf32>
    %4 = vector.broadcast %2 : vector<1x64xf32> to vector<16x64xf32>
    %5 = arith.mulf %3, %4 : vector<16x64xf32>
    %6 = vector.extract_strided_slice %0 {offsets = [0, 1], sizes = [16, 1], strides = [1, 1]} : vector<16x3xf32> to vector<16x1xf32>
    %c1 = arith.constant 1 : index
    %c0_3 = arith.constant 0 : index
    %7 = vector.load %arg3[%c1, %c0_3] : memref<3x64xf32, #tpu.memory_space<vmem>>, vector<1x64xf32>
    %8 = vector.broadcast %6 : vector<16x1xf32> to vector<16x64xf32>
    %9 = vector.broadcast %7 : vector<1x64xf32> to vector<16x64xf32>
    %10 = arith.mulf %8, %9 : vector<16x64xf32>
    %11 = arith.addf %5, %10 : vector<16x64xf32>
    %12 = vector.extract_strided_slice %0 {offsets = [0, 2], sizes = [16, 1], strides = [1, 1]} : vector<16x3xf32> to vector<16x1xf32>
    %c2 = arith.constant 2 : index
    %c0_4 = arith.constant 0 : index
    %13 = vector.load %arg3[%c2, %c0_4] : memref<3x64xf32, #tpu.memory_space<vmem>>, vector<1x64xf32>
    %14 = vector.broadcast %12 : vector<16x1xf32> to vector<16x64xf32>
    %15 = vector.broadcast %13 : vector<1x64xf32> to vector<16x64xf32>
    %16 = arith.mulf %14, %15 : vector<16x64xf32>
    %17 = arith.addf %11, %16 : vector<16x64xf32>
    %c0_5 = arith.constant 0 : index
    %c0_6 = arith.constant 0 : index
    %18 = vector.load %arg4[%c0_5, %c0_6] : memref<1x64xf32, #tpu.memory_space<vmem>>, vector<1x64xf32>
    %19 = vector.broadcast %18 : vector<1x64xf32> to vector<16x64xf32>
    %20 = arith.addf %17, %19 : vector<16x64xf32>
    %cst = arith.constant 0.000000e+00 : f32
    %21 = vector.broadcast %cst : f32 to vector<16x64xf32>
    %22 = arith.maximumf %20, %21 : vector<16x64xf32>
    %23 = arith.truncf %22 : vector<16x64xf32> to vector<16x64xbf16>
    %c0_7 = arith.constant 0 : index
    %c0_8 = arith.constant 0 : index
    %24 = vector.load %arg5[%c0_7, %c0_8] : memref<64x128xbf16, #tpu.memory_space<vmem>>, vector<64x128xbf16>
    %cst_9 = arith.constant dense<0.000000e+00> : vector<16x128xf32>
    %25 = tpu.matmul %23, %24, %cst_9 {dimension_numbers = #tpu.dot_dimension_numbers<[1], [0], [0], [1], [0, 0, 1, 1], [], []>} : vector<16x64xbf16>, vector<64x128xbf16>, vector<16x128xf32> -> vector<16x128xf32>
    %c0_10 = arith.constant 0 : index
    %c0_11 = arith.constant 0 : index
    %26 = vector.load %arg6[%c0_10, %c0_11] : memref<1x128xf32, #tpu.memory_space<vmem>>, vector<1x128xf32>
    %27 = vector.broadcast %26 : vector<1x128xf32> to vector<16x128xf32>
    %28 = arith.addf %25, %27 : vector<16x128xf32>
    %cst_12 = arith.constant 0.000000e+00 : f32
    %29 = vector.broadcast %cst_12 : f32 to vector<16x128xf32>
    %30 = arith.maximumf %28, %29 : vector<16x128xf32>
    %31 = arith.truncf %30 : vector<16x128xf32> to vector<16x128xbf16>
    %c0_13 = arith.constant 0 : index
    %c0_14 = arith.constant 0 : index
    %32 = vector.load %arg7[%c0_13, %c0_14] : memref<128x1024xbf16, #tpu.memory_space<vmem>>, vector<128x1024xbf16>
    %cst_15 = arith.constant dense<0.000000e+00> : vector<16x1024xf32>
    %33 = tpu.matmul %31, %32, %cst_15 {dimension_numbers = #tpu.dot_dimension_numbers<[1], [0], [0], [1], [0, 0, 1, 1], [], []>} : vector<16x128xbf16>, vector<128x1024xbf16>, vector<16x1024xf32> -> vector<16x1024xf32>
    %c0_16 = arith.constant 0 : index
    %c0_17 = arith.constant 0 : index
    %34 = vector.load %arg8[%c0_16, %c0_17] : memref<1x1024xf32, #tpu.memory_space<vmem>>, vector<1x1024xf32>
    %35 = vector.broadcast %34 : vector<1x1024xf32> to vector<16x1024xf32>
    %36 = arith.addf %33, %35 : vector<16x1024xf32>
    %cst_18 = arith.constant 0.000000e+00 : f32
    %37 = vector.broadcast %cst_18 : f32 to vector<16x1024xf32>
    %38 = arith.maximumf %36, %37 : vector<16x1024xf32>
    %39 = vector.shape_cast %38 : vector<16x1024xf32> to vector<1x16x1024xf32>
    %cst_19 = arith.constant dense<0xFF800000> : vector<1x1024xf32>
    %40 = vector.multi_reduction <maximumf>, %39, %cst_19 [1] : vector<1x16x1024xf32> to vector<1x1024xf32>
    %c0_i32 = arith.constant 0 : i32
    %41 = arith.cmpi eq, %arg1, %c0_i32 : i32
    %42 = arith.extui %41 : i1 to i32
    %c0_i32_20 = arith.constant 0 : i32
    %43 = arith.cmpi ne, %42, %c0_i32_20 : i32
    scf.if %43 {
      %cst_25 = arith.constant 0.000000e+00 : f32
      %50 = vector.broadcast %cst_25 : f32 to vector<8x1024xf32>
      %c0_26 = arith.constant 0 : index
      %c0_27 = arith.constant 0 : index
      %51 = vector.load %arg16[%c0_26, %c0_27] : memref<8x1024xf32, #tpu.memory_space<vmem>>, vector<8x1024xf32>
      tpu.vector_store %arg16[%c0_26, %c0_27], %50 {strides = array<i32>} : memref<8x1024xf32, #tpu.memory_space<vmem>>, vector<8x1024xf32>,
      %c0_28 = arith.constant 0 : index
      %c0_29 = arith.constant 0 : index
      %52 = vector.load %arg16[%c0_28, %c0_29] : memref<8x1024xf32, #tpu.memory_space<vmem>>, vector<1x1024xf32>
      tpu.vector_store %arg16[%c0_28, %c0_29], %40 {strides = array<i32>} : memref<8x1024xf32, #tpu.memory_space<vmem>>, vector<1x1024xf32>,
    } else {
    }
    %c0_i32_21 = arith.constant 0 : i32
    %44 = arith.cmpi ne, %arg1, %c0_i32_21 : i32
    %45 = arith.extui %44 : i1 to i32
    %c0_i32_22 = arith.constant 0 : i32
    %46 = arith.cmpi ne, %45, %c0_i32_22 : i32
    scf.if %46 {
      %c0_25 = arith.constant 0 : index
      %c0_26 = arith.constant 0 : index
      %50 = vector.load %arg16[%c0_25, %c0_26] : memref<8x1024xf32, #tpu.memory_space<vmem>>, vector<1x1024xf32>
      %51 = arith.maximumf %50, %40 : vector<1x1024xf32>
      %c0_27 = arith.constant 0 : index
      %c0_28 = arith.constant 0 : index
      %52 = vector.load %arg16[%c0_27, %c0_28] : memref<8x1024xf32, #tpu.memory_space<vmem>>, vector<1x1024xf32>
      tpu.vector_store %arg16[%c0_27, %c0_28], %51 {strides = array<i32>} : memref<8x1024xf32, #tpu.memory_space<vmem>>, vector<1x1024xf32>,
    } else {
    }
    %c0_i32_23 = arith.constant 0 : i32
    %47 = arith.cmpi eq, %arg1, %c0_i32_23 : i32
    %48 = arith.extui %47 : i1 to i32
    %c0_i32_24 = arith.constant 0 : i32
    %49 = arith.cmpi ne, %48, %c0_i32_24 : i32
    scf.if %49 {
      %c0_25 = arith.constant 0 : index
      %c0_26 = arith.constant 0 : index
      %50 = vector.load %arg16[%c0_25, %c0_26] : memref<8x1024xf32, #tpu.memory_space<vmem>>, vector<8x1024xf32>
      %51 = arith.truncf %50 : vector<8x1024xf32> to vector<8x1024xbf16>
      %c0_27 = arith.constant 0 : index
      %c0_28 = arith.constant 0 : index
      %52 = vector.load %arg9[%c0_27, %c0_28] : memref<1024x512xbf16, #tpu.memory_space<vmem>>, vector<1024x512xbf16>
      %cst_29 = arith.constant dense<0.000000e+00> : vector<8x512xf32>
      %53 = tpu.matmul %51, %52, %cst_29 {dimension_numbers = #tpu.dot_dimension_numbers<[1], [0], [0], [1], [0, 0, 1, 1], [], []>} : vector<8x1024xbf16>, vector<1024x512xbf16>, vector<8x512xf32> -> vector<8x512xf32>
      %c0_30 = arith.constant 0 : index
      %c0_31 = arith.constant 0 : index
      %54 = vector.load %arg10[%c0_30, %c0_31] : memref<1x512xf32, #tpu.memory_space<vmem>>, vector<1x512xf32>
      %55 = vector.broadcast %54 : vector<1x512xf32> to vector<8x512xf32>
      %56 = arith.addf %53, %55 : vector<8x512xf32>
      %cst_32 = arith.constant 0.000000e+00 : f32
      %57 = vector.broadcast %cst_32 : f32 to vector<8x512xf32>
      %58 = arith.maximumf %56, %57 : vector<8x512xf32>
      %59 = arith.truncf %58 : vector<8x512xf32> to vector<8x512xbf16>
      %c0_33 = arith.constant 0 : index
      %c0_34 = arith.constant 0 : index
      %60 = vector.load %arg11[%c0_33, %c0_34] : memref<512x256xbf16, #tpu.memory_space<vmem>>, vector<512x256xbf16>
      %cst_35 = arith.constant dense<0.000000e+00> : vector<8x256xf32>
      %61 = tpu.matmul %59, %60, %cst_35 {dimension_numbers = #tpu.dot_dimension_numbers<[1], [0], [0], [1], [0, 0, 1, 1], [], []>} : vector<8x512xbf16>, vector<512x256xbf16>, vector<8x256xf32> -> vector<8x256xf32>
      %c0_36 = arith.constant 0 : index
      %c0_37 = arith.constant 0 : index
      %62 = vector.load %arg12[%c0_36, %c0_37] : memref<1x256xf32, #tpu.memory_space<vmem>>, vector<1x256xf32>
      %63 = vector.broadcast %62 : vector<1x256xf32> to vector<8x256xf32>
      %64 = arith.addf %61, %63 : vector<8x256xf32>
      %cst_38 = arith.constant 0.000000e+00 : f32
      %65 = vector.broadcast %cst_38 : f32 to vector<8x256xf32>
      %66 = arith.maximumf %64, %65 : vector<8x256xf32>
      %67 = arith.truncf %66 : vector<8x256xf32> to vector<8x256xbf16>
      %c0_39 = arith.constant 0 : index
      %c0_40 = arith.constant 0 : index
      %68 = vector.load %arg13[%c0_39, %c0_40] : memref<256x128xbf16, #tpu.memory_space<vmem>>, vector<256x128xbf16>
      %cst_41 = arith.constant dense<0.000000e+00> : vector<8x128xf32>
      %69 = tpu.matmul %67, %68, %cst_41 {dimension_numbers = #tpu.dot_dimension_numbers<[1], [0], [0], [1], [0, 0, 1, 1], [], []>} : vector<8x256xbf16>, vector<256x128xbf16>, vector<8x128xf32> -> vector<8x128xf32>
      %c0_42 = arith.constant 0 : index
      %c0_43 = arith.constant 0 : index
      %70 = vector.load %arg14[%c0_42, %c0_43] : memref<1x128xf32, #tpu.memory_space<vmem>>, vector<1x128xf32>
      %71 = vector.broadcast %70 : vector<1x128xf32> to vector<8x128xf32>
      %72 = arith.addf %69, %71 : vector<8x128xf32>
      %73 = vector.extract_strided_slice %72 {offsets = [0, 0], sizes = [1, 128], strides = [1, 1]} : vector<8x128xf32> to vector<1x128xf32>
      %c0_44 = arith.constant 0 : index
      %c0_45 = arith.constant 0 : index
      %c0_46 = arith.constant 0 : index
      %74 = vector.load %arg15[%c0_44, %c0_45, %c0_46] : memref<1x1x128xf32, #tpu.memory_space<vmem>>, vector<1x1x128xf32>
      %75 = vector.shape_cast %74 : vector<1x1x128xf32> to vector<1x128xf32>
      %76 = vector.shape_cast %73 : vector<1x128xf32> to vector<1x1x128xf32>
      tpu.vector_store %arg15[%c0_44, %c0_45, %c0_46], %76 {strides = array<i32>} : memref<1x1x128xf32, #tpu.memory_space<vmem>>, vector<1x1x128xf32>,
    } else {
    }
    return
  }
  func.func @transform_0(%arg0: i32, %arg1: i32) -> (i32, i32) {
    %c1_i32 = arith.constant 1 : i32
    %0 = arith.muli %arg0, %c1_i32 : i32
    %1 = arith.addi %0, %arg1 : i32
    %c0_i32 = arith.constant 0 : i32
    %c0_i32_0 = arith.constant 0 : i32
    return %1, %c0_i32 : i32, i32
  }
  func.func @transform_1(%arg0: i32, %arg1: i32) -> (i32, i32) {
    %c0_i32 = arith.constant 0 : i32
    %c0_i32_0 = arith.constant 0 : i32
    %c0_i32_1 = arith.constant 0 : i32
    return %c0_i32, %c0_i32_0 : i32, i32
  }
  func.func @transform_2(%arg0: i32, %arg1: i32) -> (i32, i32) {
    %c0_i32 = arith.constant 0 : i32
    %c0_i32_0 = arith.constant 0 : i32
    %c0_i32_1 = arith.constant 0 : i32
    return %c0_i32, %c0_i32_0 : i32, i32
  }
  func.func @transform_3(%arg0: i32, %arg1: i32) -> (i32, i32) {
    %c0_i32 = arith.constant 0 : i32
    %c0_i32_0 = arith.constant 0 : i32
    %c0_i32_1 = arith.constant 0 : i32
    return %c0_i32, %c0_i32_0 : i32, i32
  }
  func.func @transform_4(%arg0: i32, %arg1: i32) -> (i32, i32) {
    %c0_i32 = arith.constant 0 : i32
    %c0_i32_0 = arith.constant 0 : i32
    %c0_i32_1 = arith.constant 0 : i32
    return %c0_i32, %c0_i32_0 : i32, i32
  }
  func.func @transform_5(%arg0: i32, %arg1: i32) -> (i32, i32) {
    %c0_i32 = arith.constant 0 : i32
    %c0_i32_0 = arith.constant 0 : i32
    %c0_i32_1 = arith.constant 0 : i32
    return %c0_i32, %c0_i32_0 : i32, i32
  }
  func.func @transform_6(%arg0: i32, %arg1: i32) -> (i32, i32) {
    %c0_i32 = arith.constant 0 : i32
    %c0_i32_0 = arith.constant 0 : i32
    %c0_i32_1 = arith.constant 0 : i32
    return %c0_i32, %c0_i32_0 : i32, i32
  }
  func.func @transform_7(%arg0: i32, %arg1: i32) -> (i32, i32) {
    %c0_i32 = arith.constant 0 : i32
    %c0_i32_0 = arith.constant 0 : i32
    %c0_i32_1 = arith.constant 0 : i32
    return %c0_i32, %c0_i32_0 : i32, i32
  }
  func.func @transform_8(%arg0: i32, %arg1: i32) -> (i32, i32) {
    %c0_i32 = arith.constant 0 : i32
    %c0_i32_0 = arith.constant 0 : i32
    %c0_i32_1 = arith.constant 0 : i32
    return %c0_i32, %c0_i32_0 : i32, i32
  }
  func.func @transform_9(%arg0: i32, %arg1: i32) -> (i32, i32) {
    %c0_i32 = arith.constant 0 : i32
    %c0_i32_0 = arith.constant 0 : i32
    %c0_i32_1 = arith.constant 0 : i32
    return %c0_i32, %c0_i32_0 : i32, i32
  }
  func.func @transform_10(%arg0: i32, %arg1: i32) -> (i32, i32) {
    %c0_i32 = arith.constant 0 : i32
    %c0_i32_0 = arith.constant 0 : i32
    %c0_i32_1 = arith.constant 0 : i32
    return %c0_i32, %c0_i32_0 : i32, i32
  }
  func.func @transform_11(%arg0: i32, %arg1: i32) -> (i32, i32) {
    %c0_i32 = arith.constant 0 : i32
    %c0_i32_0 = arith.constant 0 : i32
    %c0_i32_1 = arith.constant 0 : i32
    return %c0_i32, %c0_i32_0 : i32, i32
  }
  func.func @transform_12(%arg0: i32, %arg1: i32) -> (i32, i32) {
    %c0_i32 = arith.constant 0 : i32
    %c0_i32_0 = arith.constant 0 : i32
    %c0_i32_1 = arith.constant 0 : i32
    return %c0_i32, %c0_i32_0 : i32, i32
  }
  func.func @transform_13(%arg0: i32, %arg1: i32) -> (i32, i32, i32) {
    %c0_i32 = arith.constant 0 : i32
    %c0_i32_0 = arith.constant 0 : i32
    %c0_i32_1 = arith.constant 0 : i32
    return %arg0, %c0_i32, %c0_i32_0 : i32, i32, i32
  }
}

</mosaic_0001>

<bundles_post_ra>
// kernel: stn3d_forward.1
= control target key start
LH: loop header
LB: loop body
LE: loop exit
PB: predicated region body
PF: predicated region fallthrough
CT: control target
= control target key end

     0   :  { %s6626_s0 = inlined_call_operand.vmem [shape: f32[32,3], index: 0, kind: input, shape index: {}]   ;;  %s6627_s1 = inlined_call_operand.vmem [shape: f32[3,64], index: 1, kind: input, shape index: {}]   ;;  %s6628_s2 = inlined_call_operand.vmem [shape: f32[1,64], index: 2, kind: input, shape index: {}]   ;;  %s6629_s3 = inlined_call_operand.vmem [shape: bf16[64,128], index: 3, kind: input, shape index: {}]   ;;  %s6630_s4 = inlined_call_operand.vmem [shape: f32[1,128], index: 4, kind: input, shape index: {}]   ;;  %s6631_s5 = inlined_call_operand.hbm [shape: bf16[128,1024], index: 5, kind: input, shape index: {}]   ;;  %s6632_s6 = inlined_call_operand.vmem [shape: f32[1,1024], index: 6, kind: input, shape index: {}]   ;;  %s6633_s7 = inlined_call_operand.hbm [shape: bf16[1024,512], index: 7, kind: input, shape index: {}]   ;;  %s6634_s8 = inlined_call_operand.vmem [shape: f32[1,512], index: 8, kind: input, shape index: {}]   ;;  %s6635_s9 = inlined_call_operand.hbm [shape: bf16[512,256], index: 9, kind: input, shape index: {}]   ;;  %s6636_s10 = inlined_call_operand.vmem [shape: f32[1,256], index: 10, kind: input, shape index: {}]   ;;  %s6637_s11 = inlined_call_operand.vmem [shape: bf16[256,128], index: 11, kind: input, shape index: {}]   ;;  %s6638_s12 = inlined_call_operand.vmem [shape: f32[1,128], index: 12, kind: input, shape index: {}]   ;;  %s6639_s13 = inlined_call_operand.vmem [shape: f32[2,1,128], index: 13, kind: output, shape index: {}]  }
   0x1   :  { %6642 = sst [smem:[#allocation12_spill]] %s6633_s7 }
   0x2   :  { %6643 = sst [smem:[#allocation13_spill]] %s6639_s13 }
   0x3   :  { %18 = vsyncpa [#allocation4], 0 }
   0x4   :  { %19 = vsyncpa [#allocation6], 0  ;;  %s6339_s25 = smov 0   ;;  %s6341_s26 = smov 0  }
   0x5   :  { %s6343_s27 = smov 0  }
   0x6 LB: > { %6644 = sst [smem:[#allocation10_spill]] %s6250_s26  ;;  %s4022_s14 = sadd.s32 4294967295, %s6254_s27   ;;  %s6254_s27 = sphi %s6343_s27, %s25_s27   ;;  %s6250_s26 = sphi %s6341_s26, %s6653_s26   ;;  %s6246_s25 = sphi %s6339_s25, %s6652_s25  }
   0x7   : > { %6645 = sst [smem:[#allocation11_spill]] %s6254_s27  ;;  %p4024_p0 = scmp.ge.s32.totalorder %s6254_s27, 1 }
   0x8   : > { %s6646_s7 = sld [smem:[#allocation12_spill]]  ;;  %p348_p1 = scmp.lt.s32.totalorder %s6254_s27, 3 }
   0x9   : > { %p6360_p2 = scmp.eq.s32.totalorder %s4022_s14, 0  ;;  %s6256_s17 = smov [#allocation5]  }
   0xa   : > { %p6364_p3 = pnand %p4024_p0, %p348_p1  ;;  %s390_s18 = sshll.u32 %s6256_s17, 4  ;;  %s391_s18 = int_to_ptr.vmem [resolvable:$true] %s390_s18 }
   0xb   : > { %s37_s20 = sadd.s32 1, %s6250_s26  ;;  %s6257_s21 = smov 256  }
   0xc   : > { %p6070_p4 = pneg %p6364_p3  ;;  %p39_p6 = scmp.ge.s32.totalorder %s37_s20, 2 }
   0xd   : > { %s6258_s22 = smov 16   ;;  %s371_s28 = sshll.u32 %s6631_s5, 4  ;;  %s372_s28 = int_to_ptr.hbm [resolvable:$true] %s371_s28 }
   0xe   : > { %s388_s30 = sshll.u32 %s6646_s7, 4  ;;  %p6372_p5 = pnand %p6360_p2, %p6070_p4  ;;  %s389_s30 = int_to_ptr.hbm [resolvable:$true] %s388_s30 }
   0xf   : > { %s6655_s20 = smov (%p39_p6, %s37_s20), 0  ;;  %s6259_s29 = smov [#allocation3]  }
  0x10   : > { %6076 = dma.hbm_to_vmem [thread:$0]  (!%p6372_p5), %s389_s30, 32768, %s391_s18, [#allocation6], %s6257_s21, %s6257_s21, %s6258_s22  }
  0x11   : > { %s373_s14 = sshll.u32 %s6259_s29, 4  ;;  %s405_s26 = sshll.u32 %s6635_s9, 4  ;;  %s374_s14 = int_to_ptr.vmem [resolvable:$true] %s373_s14  ;;  %s406_s26 = int_to_ptr.hbm [resolvable:$true] %s405_s26 }
  0x12   : > { %s6260_s27 = smov 512   ;;  %s6261_s13 = smov 32  }
  0x13   : > { %6073 = dma.hbm_to_vmem [thread:$0]  (!%p6372_p5), %s372_s28, 8192, %s374_s14, [#allocation4], %s6260_s27, %s6260_s27, %s6261_s13  }
  0x14   : > { %s6262_s30 = smov [#allocation7]   ;;  %s6263_s21 = smov 128  }
  0x15   : > { %s407_s18 = sshll.u32 %s6262_s30, 4  ;;  %s6264_s22 = smov 8   ;;  %s408_s18 = int_to_ptr.vmem [resolvable:$true] %s407_s18 }
  0x16   : > { %6079 = dma.hbm_to_vmem [thread:$0]  (!%p6372_p5), %s406_s26, 8192, %s408_s18, [#allocation6], %s6263_s21, %s6263_s21, %s6264_s22  }
  0x17   : > { %443 = sbr.rel (%p6364_p3) target bundleno = 1126 (0x466), region = 72 }
  0x1c   : > { %6237 = dma.done.wait (%p6360_p2), [#allocation4], 8192  }
  0x1d   : > { %6239 = vsyncadd (%p6360_p2), [#allocation4], 4294959104 }
  0x1e   : > { %6241 = dma.done.wait (%p6360_p2), [#allocation6], 40960  }
  0x1f   : > { %6243 = vsyncadd (%p6360_p2), [#allocation6], 4294926336  ;;  %s4033_s7 = sshll.u32 %s6246_s25, 1  ;;  %v6265_v0 = vmov 1   ;;  %v6266_v1 = vmov 0   ;;  %v6267_v2 = vmov 2  }
  0x20   : > { %6124 = vset.pattern.permute.xlu1 %v6265_v0  ;;  %6123 = vset.pattern.permute.xlu0 %v6266_v1  ;;  %p499_p7 = scmp.lt.s32.totalorder %s4033_s7, 3  ;;  %v5657_v5 = vld [vmem:[%s6629_s3 + $0x18] sm:$0xff]  ;;  %v5656_v6 = vld [vmem:[%s6629_s3 + $0x10] sm:$0xff]  ;;  %v5655_v7 = vld [vmem:[%s6629_s3 + $0x8] sm:$0xff]  ;;  %vm598_vm0 = vcmask 523264   ;;  %vm1232_vm1 = vcmask 1040384  }
  0x21   : > { %6125 = vset.pattern.permute.xlu2 %v6267_v2  ;;  %606 = vmatpush.bf16.msra.mxu0 %v5657_v5  ;;  %v5654_v8 = vld [vmem:[%s6629_s3] sm:$0xff]  ;;  %v4286_v14 = vld [vmem:[#allocation3 + $0x1c8] sm:$0xf]  ;;  %v5715_v18 = vld [vmem:[#allocation3 + $0x1cc] sm:$0xf]  ;;  %vm1234_vm2 = vcmask 1042434  }
  0x22   : > { %s6657_s7 = smov (!%p499_p7, %s4033_s7), 3  ;;  %v4278_v9 = vld [vmem:[#allocation3 + $0x1c0] sm:$0xf]  ;;  %v5714_v11 = vld [vmem:[#allocation3 + $0x1c4] sm:$0xf]  ;;  %vm1236_vm3 = vcmask 1041408  }
  0x23   : > { %s4034_s13 = sshll.u32 %s6657_s7, 3  ;;  %v5718_v10 = vld [vmem:[#allocation3 + $0x1dc] sm:$0xf0]  ;;  %v4280_v13 = vld [vmem:[#allocation3 + $0x1e0] sm:$0xf0]  ;;  %vm1238_vm4 = vcmask 1044484  }
  0x24   : > { %s502_s16 = scalar_lea.vmem %s6626_s0, %s4034_s13  ;;  %v4279_v12 = vor.u32 %v5718_v10, %v4278_v9  ;;  %v5719_v15 = vld [vmem:[#allocation3 + $0x1e4] sm:$0xf0]  ;;  %v4283_v16 = vor.u32 %v5714_v11, %v4280_v13  ;;  %v4288_v19 = vld [vmem:[#allocation3 + $0x1e8] sm:$0xf0]  ;;  %v4246_v20 = vld [vmem:[#allocation3 + $0x180] sm:$0xf] }
  0x25   : > { %v509_v3 = vld [vmem:[%s502_s16] sm:$0xff]  ;;  %v510_v4 = vld [vmem:[%s502_s16 + $0x8] sm:$0xff]  ;;  %607 = vmatpush.bf16.msra.mxu0 %v5656_v6  ;;  %v4287_v17 = vor.u32 %v5719_v15, %v4286_v14  ;;  %v4291_v21 = vor.u32 %v5715_v18, %v4288_v19  ;;  %vm1240_vm5 = vcmask 1046534   ;;  %vm1242_vm6 = vcmask 1045508   ;;  %p505_p8 = scmp.lt.s32.totalorder %s6246_s25, 1  ;;  %s6650_s22 = sld [smem:[#allocation13_spill]] }
  0x26   : > { %527 = vperm.xlu1 %6124, %v509_v3   ;;  %514 = vperm.xlu0 %6123, %v509_v3   ;;  %v5710_v22 = vld [vmem:[#allocation3 + $0x19c] sm:$0xf0]  ;;  %v5706_v23 = vld [vmem:[#allocation3 + $0x184] sm:$0xf]  ;;  %v4254_v27 = vld [vmem:[#allocation3 + $0x188] sm:$0xf] }
  0x27   : > { %541 = vperm.xlu2 %6125, %v509_v3   ;;  %1021 = vmatpush.bf16.msra.mxu1 %v4279_v12  ;;  %v4248_v24 = vld [vmem:[#allocation3 + $0x1a0] sm:$0xf0]  ;;  %v4247_v25 = vor.u32 %v5710_v22, %v4246_v20  ;;  %v5711_v28 = vld [vmem:[#allocation3 + $0x1a4] sm:$0xf0]  ;;  %v5707_v29 = vld [vmem:[#allocation3 + $0x18c] sm:$0xf] }
  0x28   : > { %1035 = vmatpush.bf16.msra.mxu2 %v4283_v16  ;;  %1049 = vmatpush.bf16.msra.mxu3 %v4287_v17  ;;  %v4251_v26 = vor.u32 %v5706_v23, %v4248_v24  ;;  %v4255_v30 = vor.u32 %v5711_v28, %v4254_v27  ;;  %v4256_v31 = vld [vmem:[#allocation3 + $0x1a8] sm:$0xf0]  ;;  %v4214_v32 = vld [vmem:[#allocation3 + $0x140] sm:$0xf]  ;;  %v5698_v37 = vld [vmem:[#allocation3 + $0x144] sm:$0xf] }
  0x29   : > { %608 = vmatpush.bf16.msra.mxu0 %v5655_v7  ;;  %v5702_v33 = vld [vmem:[#allocation3 + $0x15c] sm:$0xf0]  ;;  %v4259_v36 = vor.u32 %v5707_v29, %v4256_v31  ;;  %v4216_v38 = vld [vmem:[#allocation3 + $0x160] sm:$0xf0]  ;;  %v4222_v39 = vld [vmem:[#allocation3 + $0x148] sm:$0xf] }
  0x2a   : > { %v6420_v34 = vld [vmem:[%s6627_s1 + $0x1] ss:$0 sm:$0xff]  ;;  %v6425_v35 = vld [vmem:[%s6627_s1] ss:$0 sm:$0xff]  ;;  %v4215_v40 = vor.u32 %v5702_v33, %v4214_v32  ;;  %v5703_v41 = vld [vmem:[#allocation3 + $0x164] sm:$0xf0]  ;;  %v4219_v45 = vor.u32 %v5698_v37, %v4216_v38 }
  0x2b   : > { %1022 = vmatpush.bf16.msra.mxu1 %v4247_v25  ;;  %v5699_v42 = vld [vmem:[#allocation3 + $0x14c] sm:$0xf]  ;;  %v4223_v46 = vor.u32 %v5703_v41, %v4222_v39  ;;  %v4182_v47 = vld [vmem:[#allocation3 + $0x100] sm:$0xf]  ;;  %v5690_v49 = vld [vmem:[#allocation3 + $0x104] sm:$0xf] }
  0x2c   : > { %v4224_v43 = vld [vmem:[#allocation3 + $0x168] sm:$0xf0]  ;;  %1036 = vmatpush.bf16.msra.mxu2 %v4251_v26  ;;  %1050 = vmatpush.bf16.msra.mxu3 %v4255_v30  ;;  %v5694_v48 = vld [vmem:[#allocation3 + $0x11c] sm:$0xf0]  ;;  %v4184_v51 = vld [vmem:[#allocation3 + $0x120] sm:$0xf0] }
  0x2d   : > { %609 = vmatpush.bf16.msra.mxu0 %v5654_v8  ;;  %v4227_v50 = vor.u32 %v5699_v42, %v4224_v43  ;;  %v4190_v52 = vld [vmem:[#allocation3 + $0x108] sm:$0xf]  ;;  %v5691_v54 = vld [vmem:[#allocation3 + $0x10c] sm:$0xf]  ;;  %v6127_v56 = vld [vmem:[%s6627_s1 + $0x2] ss:$0 sm:$0xff]  ;;  %v4183_v59 = vor.u32 %v5694_v48, %v4182_v47  ;;  %v4187_v60 = vor.u32 %v5690_v49, %v4184_v51 }
  0x2e   : > { %531 = vperm.xlu1 %6124, %v510_v4   ;;  %519 = vperm.xlu0 %6123, %v510_v4   ;;  %v5695_v53 = vld [vmem:[#allocation3 + $0x124] sm:$0xf0]  ;;  %v4192_v55 = vld [vmem:[#allocation3 + $0x128] sm:$0xf0]  ;;  %v4150_v0 = vld [vmem:[#allocation3 + $0xc0] sm:$0xf] }
  0x2f   : > { %545 = vperm.xlu2 %6125, %v510_v4   ;;  %1023 = vmatpush.bf16.msra.mxu1 %v4215_v40  ;;  %v4191_v63 = vor.u32 %v5695_v53, %v4190_v52  ;;  %v5686_v1 = vld [vmem:[#allocation3 + $0xdc] sm:$0xf0]  ;;  %v4195_v3 = vor.u32 %v5691_v54, %v4192_v55  ;;  %v4152_v4 = vld [vmem:[#allocation3 + $0xe0] sm:$0xf0]  ;;  %v4158_v5 = vld [vmem:[#allocation3 + $0xc8] sm:$0xf] }
  0x30   : > { %1037 = vmatpush.bf16.msra.mxu2 %v4219_v45  ;;  %1051 = vmatpush.bf16.msra.mxu3 %v4223_v46  ;;  %v5687_v6 = vld [vmem:[#allocation3 + $0xe4] sm:$0xf0]  ;;  %v5683_v7 = vld [vmem:[#allocation3 + $0xcc] sm:$0xf]  ;;  %v4151_v11 = vor.u32 %v5686_v1, %v4150_v0  ;;  %v4118_v12 = vld [vmem:[#allocation3 + $0x80] sm:$0xf] }
  0x31   : > { %1063 = vmatpush.bf16.msrb.mxu0 %v4291_v21  ;;  %v4160_v8 = vld [vmem:[#allocation3 + $0xe8] sm:$0xf0]  ;;  %v4159_v14 = vor.u32 %v5687_v6, %v4158_v5  ;;  %v5678_v15 = vld [vmem:[#allocation3 + $0x9c] sm:$0xf0]  ;;  %v5674_v16 = vld [vmem:[#allocation3 + $0x84] sm:$0xf] }
  0x32   : > { %v4120_v17 = vld [vmem:[#allocation3 + $0xa0] sm:$0xf0]  ;;  %v4163_v18 = vor.u32 %v5683_v7, %v4160_v8  ;;  %v4126_v19 = vld [vmem:[#allocation3 + $0x88] sm:$0xf]  ;;  %v5675_v22 = vld [vmem:[#allocation3 + $0x8c] sm:$0xf]  ;;  %v4119_v28 = vor.u32 %v5678_v15, %v4118_v12 }
  0x33   : > { %1024 = vmatpush.bf16.msra.mxu1 %v4183_v59  ;;  %v5679_v20 = vld [vmem:[#allocation3 + $0xa4] sm:$0xf0]  ;;  %v4128_v23 = vld [vmem:[#allocation3 + $0xa8] sm:$0xf0]  ;;  %v6130_v27 = vld [vmem:[%s6628_s2] ss:$0 sm:$0xff]  ;;  %v4123_v29 = vor.u32 %v5674_v16, %v4120_v17 }
  0x34   : > { %1038 = vmatpush.bf16.msra.mxu2 %v4187_v60  ;;  %1052 = vmatpush.bf16.msra.mxu3 %v4191_v63  ;;  %v4127_v32 = vor.u32 %v5679_v20, %v4126_v19  ;;  %v4086_v33 = vld [vmem:[#allocation3 + $0x40] sm:$0xf]  ;;  %v5666_v37 = vld [vmem:[#allocation3 + $0x44] sm:$0xf]  ;;  %v4131_v38 = vor.u32 %v5675_v22, %v4128_v23  ;;  %v4094_v40 = vld [vmem:[#allocation3 + $0x48] sm:$0xf] }
  0x35   : > { %1064 = vmatpush.bf16.msrb.mxu0 %v4259_v36  ;;  %v5670_v36 = vld [vmem:[#allocation3 + $0x5c] sm:$0xf0]  ;;  %v4088_v39 = vld [vmem:[#allocation3 + $0x60] sm:$0xf0]  ;;  %v5671_v41 = vld [vmem:[#allocation3 + $0x64] sm:$0xf0] }
  0x36   : > { %6126 = vset.pattern.permute.xlu0 %v6267_v2  ;;  %v5682_v2 = vld [vmem:[#allocation3 + $0xc4] sm:$0xf]  ;;  %v4096_v45 = vld [vmem:[#allocation3 + $0x68] sm:$0xf0]  ;;  %v4095_v48 = vor.u32 %v5671_v41, %v4094_v40  ;;  %v4054_v49 = vld [vmem:[#allocation3] sm:$0xf] }
  0x37   : > { %v4155_v13 = vor.u32 %v5682_v2, %v4152_v4  ;;  %1025 = vmatpush.bf16.msra.mxu1 %v4151_v11  ;;  %v5658_v52 = vld [vmem:[#allocation3 + $0x4] sm:$0xf]  ;;  %v4062_v54 = vld [vmem:[#allocation3 + $0x8] sm:$0xf]  ;;  %v4294_v2 = vld [vmem:[#allocation3 + $0x1d0] sm:$0xf] }
  0x38   : > { %1053 = vmatpush.bf16.msra.mxu3 %v4159_v14  ;;  %v4056_v53 = vld [vmem:[#allocation3 + $0x20] sm:$0xf0]  ;;  %v5716_v4 = vld [vmem:[#allocation3 + $0x1d4] sm:$0xf]  ;;  %v4302_v7 = vld [vmem:[#allocation3 + $0x1d8] sm:$0xf] }
  0x39   : > { %1065 = vmatpush.bf16.msrb.mxu0 %v4227_v50  ;;  %1039 = vmatpush.bf16.msra.mxu2 %v4155_v13  ;;  %v5662_v50 = vld [vmem:[#allocation3 + $0x1c] sm:$0xf0]  ;;  %v4296_v6 = vld [vmem:[#allocation3 + $0x1f0] sm:$0xf0]  ;;  %v5721_v8 = vld [vmem:[#allocation3 + $0x1f4] sm:$0xf0] }
  0x3a   : > { %v4055_v59 = vor.u32 %v5662_v50, %v4054_v49  ;;  %v5717_v11 = vld [vmem:[#allocation3 + $0x1dc] sm:$0xf]  ;;  %v4262_v14 = vld [vmem:[#allocation3 + $0x190] sm:$0xf]  ;;  %v5708_v16 = vld [vmem:[#allocation3 + $0x194] sm:$0xf] }
  0x3b   : > { %1026 = vmatpush.bf16.msra.mxu1 %v4119_v28  ;;  %v4304_v12 = vld [vmem:[#allocation3 + $0x1f8] sm:$0xf0]  ;;  %v5712_v15 = vld [vmem:[#allocation3 + $0x1ac] sm:$0xf0]  ;;  %v4270_v19 = vld [vmem:[#allocation3 + $0x198] sm:$0xf] }
  0x3c   : > { %1054 = vmatpush.bf16.msra.mxu3 %v4127_v32  ;;  %v4307_v13 = vor.u32 %v5717_v11, %v4304_v12  ;;  %v4263_v17 = vor.u32 %v5712_v15, %v4262_v14  ;;  %v5713_v20 = vld [vmem:[#allocation3 + $0x1b4] sm:$0xf0]  ;;  %v5709_v23 = vld [vmem:[#allocation3 + $0x19c] sm:$0xf]  ;;  %v5700_v28 = vld [vmem:[#allocation3 + $0x154] sm:$0xf] }
  0x3d   : > { %1066 = vmatpush.bf16.msrb.mxu0 %v4195_v3  ;;  %1040 = vmatpush.bf16.msra.mxu2 %v4123_v29  ;;  %v5720_v3 = vld [vmem:[#allocation3 + $0x1ec] sm:$0xf0]  ;;  %v4271_v22 = vor.u32 %v5713_v20, %v4270_v19  ;;  %v5705_v32 = vld [vmem:[#allocation3 + $0x174] sm:$0xf0]  ;;  %v5668_v12 = vld [vmem:[#allocation3 + $0x54] sm:$0xf] }
  0x3e   : > { %v4295_v5 = vor.u32 %v5720_v3, %v4294_v2  ;;  %v4198_v40 = vld [vmem:[#allocation3 + $0x110] sm:$0xf]  ;;  %v4110_v14 = vld [vmem:[#allocation3 + $0x58] sm:$0xf]  ;;  %vm1244_vm7 = vcmask 1043456   ;;  %s6659_s25 = smov (!%p505_p8, %s6246_s25), 1 }
  0x3f   : > { %v5696_v41 = vld [vmem:[#allocation3 + $0x12c] sm:$0xf0]  ;;  %s507_s7 = scalar_lea.vmem %s6650_s22, %s6659_s25 }
  0x40   : > { %1055 = vmatpush.bf16.msra.mxu3 %v4095_v48  ;;  %v4208_v48 = vld [vmem:[#allocation3 + $0x138] sm:$0xf0]  ;;  %v4166_v50 = vld [vmem:[#allocation3 + $0xd0] sm:$0xf] }
  0x41   : > { %1067 = vmatpush.bf16.msrb.mxu0 %v4163_v18  ;;  %v4264_v18 = vld [vmem:[#allocation3 + $0x1b0] sm:$0xf0] }
  0x45   : > { %1068 = vmatpush.bf16.msrb.mxu0 %v4131_v38  ;;  %v4240_v38 = vld [vmem:[#allocation3 + $0x178] sm:$0xf0] }
  0x81   : > { %v542_v44 = vpop.permute.xlu2 %541 }
  0x82   : > { %v549_v9 = vmul.f32 %v6127_v56, %v542_v44  ;;  %v5667_v44 = vld [vmem:[#allocation3 + $0x4c] sm:$0xf] }
  0x83   : > { %v4099_v51 = vor.u32 %v5667_v44, %v4096_v45  ;;  %v4200_v44 = vld [vmem:[#allocation3 + $0x130] sm:$0xf0]  ;;  %v4206_v45 = vld [vmem:[#allocation3 + $0x118] sm:$0xf] }
  0x85   : > { %1069 = vmatpush.bf16.msrb.mxu0 %v4099_v51  ;;  %v5688_v51 = vld [vmem:[#allocation3 + $0xec] sm:$0xf0] }
  0x89   : > { %v546_v21 = vpop.permute.xlu2 %545 }
  0x8a   : > { %v550_v42 = vmul.f32 %v6127_v56, %v546_v21  ;;  %v5663_v56 = vld [vmem:[#allocation3 + $0x24] sm:$0xf0]  ;;  %v4267_v21 = vor.u32 %v5708_v16, %v4264_v18  ;;  %v5673_v16 = vld [vmem:[#allocation3 + $0x74] sm:$0xf0]  ;;  %v4112_v18 = vld [vmem:[#allocation3 + $0x78] sm:$0xf0] }
  0x8b   : > { %v4063_v63 = vor.u32 %v5663_v56, %v4062_v54  ;;  %v4168_v54 = vld [vmem:[#allocation3 + $0xf0] sm:$0xf0]  ;;  %v5689_v56 = vld [vmem:[#allocation3 + $0xf4] sm:$0xf0]  ;;  %v4111_v20 = vor.u32 %v5673_v16, %v4110_v14  ;;  %v4374_v14 = vld [vmem:[#allocation5 + $0x80] sm:$0xf] }
  0x8d   : > { %1056 = vmatpush.bf16.msra.mxu3 %v4063_v63  ;;  %v5680_v63 = vld [vmem:[#allocation3 + $0xac] sm:$0xf0] }
  0x98   : > { %v528_v57 = vpop.permute.xlu1 %527  ;;  %v515_v58 = vpop.permute.xlu0 %514 }
  0x99   : > { %v535_v61 = vmul.f32 %v6420_v34, %v528_v57  ;;  %v523_v62 = vmul.f32 %v6425_v35, %v515_v58  ;;  %v5659_v57 = vld [vmem:[#allocation3 + $0xc] sm:$0xf] }
  0x9a   : > { %v4064_v58 = vld [vmem:[#allocation3 + $0x28] sm:$0xf0] }
  0x9b   : > { %v537_v10 = vadd.f32 %v535_v61, %v523_v62  ;;  %v4059_v62 = vor.u32 %v5658_v52, %v4056_v53  ;;  %v4067_v0 = vor.u32 %v5659_v57, %v4064_v58  ;;  %v5684_v52 = vld [vmem:[#allocation3 + $0xd4] sm:$0xf]  ;;  %v4167_v53 = vor.u32 %v5688_v51, %v4166_v50  ;;  %v4806_v50 = vld [vmem:[#allocation5 + $0x3e0] sm:$0xf] }
  0x9c   : > { %v4171_v57 = vor.u32 %v5684_v52, %v4168_v54  ;;  %v5848_v52 = vld [vmem:[#allocation5 + $0x3ec] sm:$0xf0]  ;;  %v4406_v54 = vld [vmem:[#allocation5 + $0xc0] sm:$0xf] }
  0x9d   : > { %v551_v24 = vadd.f32 %v549_v9, %v537_v10  ;;  %1070 = vmatpush.bf16.msrb.mxu0 %v4067_v0  ;;  %v4299_v9 = vor.u32 %v5716_v4, %v4296_v6  ;;  %v4303_v10 = vor.u32 %v5721_v8, %v4302_v7  ;;  %v5676_v0 = vld [vmem:[#allocation3 + $0x94] sm:$0xf]  ;;  %v4142_v4 = vld [vmem:[#allocation3 + $0x98] sm:$0xf]  ;;  %v5677_v6 = vld [vmem:[#allocation3 + $0x9c] sm:$0xf] }
  0x9e   : > { %v4144_v8 = vld [vmem:[#allocation3 + $0xb8] sm:$0xf0] }
  0x9f   : > { %v557_v46 = vadd.f32 %v6130_v27, %v551_v24  ;;  %1105 = vmatpush.bf16.msrb.mxu3 %v4303_v10  ;;  %v4272_v24 = vld [vmem:[#allocation3 + $0x1b8] sm:$0xf0]  ;;  %v5672_v10 = vld [vmem:[#allocation3 + $0x6c] sm:$0xf0]  ;;  %v4147_v11 = vor.u32 %v5677_v6, %v4144_v8 }
  0xa0   : > { %v532_v25 = vpop.permute.xlu1 %531  ;;  %v520_v26 = vpop.permute.xlu0 %519  ;;  %v5776_v6 = vld [vmem:[#allocation5 + $0x1ac] sm:$0xf0] }
  0xa1   : > { %v536_v30 = vmul.f32 %v6420_v34, %v532_v25  ;;  %v524_v31 = vmul.f32 %v6425_v35, %v520_v26  ;;  %v4087_v34 = vor.u32 %v5670_v36, %v4086_v33  ;;  %v4091_v35 = vor.u32 %v5666_v37, %v4088_v39  ;;  %v4230_v26 = vld [vmem:[#allocation3 + $0x150] sm:$0xf]  ;;  %v5701_v37 = vld [vmem:[#allocation3 + $0x15c] sm:$0xf] }
  0xa2   : > { %v559_v60 = vmax.f32 %v557_v46, 0.0  ;;  %v4275_v25 = vor.u32 %v5709_v23, %v4272_v24  ;;  %v4243_v39 = vor.u32 %v5701_v37, %v4240_v38  ;;  %v5697_v46 = vld [vmem:[#allocation3 + $0x134] sm:$0xf0]  ;;  %v5660_v23 = vld [vmem:[#allocation3 + $0x14] sm:$0xf] }
  0xa3   : > { %v538_v43 = vadd.f32 %v536_v30, %v524_v31  ;;  %1027 = vmatpush.bf16.msra.mxu1 %v4087_v34  ;;  %1041 = vmatpush.bf16.msra.mxu2 %v4091_v35  ;;  %v4232_v30 = vld [vmem:[#allocation3 + $0x170] sm:$0xf0]  ;;  %v4238_v31 = vld [vmem:[#allocation3 + $0x158] sm:$0xf]  ;;  %v5693_v35 = vld [vmem:[#allocation3 + $0x11c] sm:$0xf] }
  0xa4   : > { %1106 = vmatpush.bf16.msrb.mxu3 %v4271_v22  ;;  %v4235_v33 = vor.u32 %v5700_v28, %v4232_v30  ;;  %v4239_v36 = vor.u32 %v5705_v32, %v4238_v31  ;;  %v4211_v49 = vor.u32 %v5693_v35, %v4208_v48  ;;  %v5664_v22 = vld [vmem:[#allocation3 + $0x2c] sm:$0xf0]  ;;  %v5661_v28 = vld [vmem:[#allocation3 + $0x1c] sm:$0xf]  ;;  %v6131_v37 = vld [vmem:[%s6630_s4] ss:$0 sm:$0xff] }
  0xa5   : > { %v552_v47 = vadd.f32 %v550_v42, %v538_v43  ;;  %v5692_v42 = vld [vmem:[#allocation3 + $0x114] sm:$0xf]  ;;  %v4199_v43 = vor.u32 %v5696_v41, %v4198_v40  ;;  %v4678_v35 = vld [vmem:[#allocation5 + $0x2e0] sm:$0xf]  ;;  %v5808_v8 = vld [vmem:[#allocation5 + $0x2ac] sm:$0xf0] }
  0xa6   : > { %v4203_v34 = vor.u32 %v5692_v42, %v4200_v44  ;;  %v4422_v44 = vld [vmem:[#allocation5 + $0xe0] sm:$0xf] }
  0xa7   : > { %v558_v55 = vadd.f32 %v6130_v27, %v552_v47  ;;  %1028 = vmatpush.bf16.msra.mxu1 %v4055_v59  ;;  %1042 = vmatpush.bf16.msra.mxu2 %v4059_v62  ;;  %v5704_v27 = vld [vmem:[#allocation3 + $0x16c] sm:$0xf0]  ;;  %v4207_v47 = vor.u32 %v5697_v46, %v4206_v45  ;;  %v5685_v59 = vld [vmem:[#allocation3 + $0xdc] sm:$0xf] }
  0xa8   : > { %v4231_v29 = vor.u32 %v5704_v27, %v4230_v26  ;;  %1107 = vmatpush.bf16.msrb.mxu3 %v4239_v36  ;;  %v4078_v26 = vld [vmem:[#allocation3 + $0x18] sm:$0xf]  ;;  %v5752_v45 = vld [vmem:[#allocation5 + $0xec] sm:$0xf0] }
  0xa9   : > { %v560_v61 = vmax.f32 %v558_v55, 0.0  ;;  %v4174_v55 = vld [vmem:[#allocation3 + $0xd8] sm:$0xf]  ;;  %v4423_v46 = vor.u32 %v5752_v45, %v4422_v44  ;;  %v5764_v44 = vld [vmem:[#allocation5 + $0x14c] sm:$0xf0] }
  0xaa   : > { %v4175_v58 = vor.u32 %v5689_v56, %v4174_v55  ;;  %v5665_v27 = vld [vmem:[#allocation3 + $0x34] sm:$0xf0]  ;;  %v5748_v55 = vld [vmem:[#allocation5 + $0xcc] sm:$0xf0]  ;;  %v4534_v56 = vld [vmem:[#allocation5 + $0x1c0] sm:$0xf] }
  0xab   : > { %v561_v1 = vpack.c.bf16 %v560_v61, %v559_v60  ;;  %1077 = vmatpush.bf16.msrb.mxu1 %v4295_v5  ;;  %1091 = vmatpush.bf16.msrb.mxu2 %v4299_v9  ;;  %v4176_v60 = vld [vmem:[#allocation3 + $0xf8] sm:$0xf0]  ;;  %v4134_v61 = vld [vmem:[#allocation3 + $0x90] sm:$0xf]  ;;  %v5681_v5 = vld [vmem:[#allocation3 + $0xb4] sm:$0xf0]  ;;  %v4079_v32 = vor.u32 %v5665_v27, %v4078_v26 }
  0xac   : > { %1108 = vmatpush.bf16.msrb.mxu3 %v4207_v47  ;;  %v4179_v62 = vor.u32 %v5685_v59, %v4176_v60  ;;  %v4135_v2 = vor.u32 %v5680_v63, %v4134_v61  ;;  %v4143_v7 = vor.u32 %v5681_v5, %v4142_v4  ;;  %v4102_v9 = vld [vmem:[#allocation3 + $0x50] sm:$0xf]  ;;  %v4662_v59 = vld [vmem:[#allocation5 + $0x2c0] sm:$0xf] }
  0xad   : > { %4051 = vmatmul.msk.bf16.vlgmr.msra.gmra.mxu0 %vm598_vm0, %v561_v1  ;;  %v4136_v1 = vld [vmem:[#allocation3 + $0xb0] sm:$0xf0]  ;;  %v4103_v15 = vor.u32 %v5672_v10, %v4102_v9  ;;  %v5784_v47 = vld [vmem:[#allocation5 + $0x1ec] sm:$0xf0]  ;;  %v4790_v63 = vld [vmem:[#allocation5 + $0x3c0] sm:$0xf] }
  0xae   : > { %1119 = vmatpush.bf16.msra.mxu0 %v4307_v13  ;;  %v4139_v3 = vor.u32 %v5676_v0, %v4136_v1  ;;  %v4104_v13 = vld [vmem:[#allocation3 + $0x70] sm:$0xf0]  ;;  %v5812_v60 = vld [vmem:[#allocation5 + $0x2cc] sm:$0xf0]  ;;  %v4518_v4 = vld [vmem:[#allocation5 + $0x1a0] sm:$0xf] }
  0xaf   : > { %1078 = vmatpush.bf16.msrb.mxu1 %v4263_v17  ;;  %1092 = vmatpush.bf16.msrb.mxu2 %v4267_v21  ;;  %v5669_v17 = vld [vmem:[#allocation3 + $0x5c] sm:$0xf]  ;;  %v4107_v19 = vor.u32 %v5668_v12, %v4104_v13  ;;  %v4070_v21 = vld [vmem:[#allocation3 + $0x10] sm:$0xf]  ;;  %v4519_v9 = vor.u32 %v5776_v6, %v4518_v4  ;;  %v4358_v26 = vld [vmem:[#allocation5 + $0x60] sm:$0xf] }
  0xb0   : > { %1109 = vmatpush.bf16.msrb.mxu3 %v4175_v58  ;;  %v4115_v24 = vor.u32 %v5669_v17, %v4112_v18  ;;  %v4071_v30 = vor.u32 %v5664_v22, %v4070_v21  ;;  %v5780_v58 = vld [vmem:[#allocation5 + $0x1cc] sm:$0xf0]  ;;  %v4502_v17 = vld [vmem:[#allocation5 + $0x180] sm:$0xf] }
  0xb1   : > { %v4535_v61 = vor.u32 %v5780_v58, %v4534_v56  ;;  %v5844_v0 = vld [vmem:[#allocation5 + $0x3cc] sm:$0xf0]  ;;  %v4758_v22 = vld [vmem:[#allocation5 + $0x380] sm:$0xf] }
  0xb2   : > { %1120 = vmatpush.bf16.msra.mxu0 %v4275_v25  ;;  %v4072_v25 = vld [vmem:[#allocation3 + $0x30] sm:$0xf0]  ;;  %v4791_v1 = vor.u32 %v5844_v0, %v4790_v63  ;;  %v5840_v12 = vld [vmem:[#allocation5 + $0x3ac] sm:$0xf0]  ;;  %v4598_v45 = vld [vmem:[#allocation5 + $0x240] sm:$0xf] }
  0xb3   : > { %1079 = vmatpush.bf16.msrb.mxu1 %v4231_v29  ;;  %1093 = vmatpush.bf16.msrb.mxu2 %v4235_v33  ;;  %v4080_v29 = vld [vmem:[#allocation3 + $0x38] sm:$0xf0]  ;;  %v4075_v31 = vor.u32 %v5660_v23, %v4072_v25  ;;  %v5772_v18 = vld [vmem:[#allocation5 + $0x18c] sm:$0xf0]  ;;  %v6443_v63 = vld [vmem:[%s6632_s6] sm:$0xff] }
  0xb4   : > { %1110 = vmatpush.bf16.msrb.mxu3 %v4143_v7  ;;  %v4083_v33 = vor.u32 %v5661_v28, %v4080_v29  ;;  %v4646_v7 = vld [vmem:[#allocation5 + $0x2a0] sm:$0xf]  ;;  %v5804_v21 = vld [vmem:[#allocation5 + $0x28c] sm:$0xf0] }
  0xb5   : > { %v4647_v10 = vor.u32 %v5808_v8, %v4646_v7  ;;  %v5836_v23 = vld [vmem:[#allocation5 + $0x38c] sm:$0xf0]  ;;  %v4486_v28 = vld [vmem:[#allocation5 + $0x160] sm:$0xf] }
  0xb6   : > { %1121 = vmatpush.bf16.msra.mxu0 %v4243_v39  ;;  %v4759_v25 = vor.u32 %v5836_v23, %v4758_v22  ;;  %v5736_v27 = vld [vmem:[#allocation5 + $0x6c] sm:$0xf0]  ;;  %v4438_v4 = vld [vmem:[#allocation5 + $0x100] sm:$0xf] }
  0xb7   : > { %1080 = vmatpush.bf16.msrb.mxu1 %v4199_v43  ;;  %1094 = vmatpush.bf16.msrb.mxu2 %v4203_v34  ;;  %v4550_v34 = vld [vmem:[#allocation5 + $0x1e0] sm:$0xf]  ;;  %v4359_v29 = vor.u32 %v5736_v27, %v4358_v26  ;;  %v5792_v56 = vld [vmem:[#allocation5 + $0x22c] sm:$0xf0] }
  0xb8   : > { %1111 = vmatpush.bf16.msrb.mxu3 %v4111_v20  ;;  %v4551_v48 = vor.u32 %v5784_v47, %v4550_v34  ;;  %v4503_v20 = vor.u32 %v5772_v18, %v4502_v17  ;;  %v4566_v6 = vld [vmem:[#allocation5 + $0x200] sm:$0xf]  ;;  %v5788_v8 = vld [vmem:[#allocation5 + $0x20c] sm:$0xf0] }
  0xb9   : > { %v5062_v17 = vld [vmem:[#allocation5 + $0x5e0] sm:$0xf]  ;;  %v5912_v18 = vld [vmem:[#allocation5 + $0x5ec] sm:$0xf0] }
  0xba   : > { %1122 = vmatpush.bf16.msra.mxu0 %v4211_v49  ;;  %v5816_v49 = vld [vmem:[#allocation5 + $0x2ec] sm:$0xf0]  ;;  %v5190_v22 = vld [vmem:[#allocation5 + $0x6e0] sm:$0xf] }
  0xbb   : > { %1081 = vmatpush.bf16.msrb.mxu1 %v4167_v53  ;;  %1095 = vmatpush.bf16.msrb.mxu2 %v4171_v57  ;;  %v4679_v51 = vor.u32 %v5816_v49, %v4678_v35  ;;  %v4807_v53 = vor.u32 %v5848_v52, %v4806_v50  ;;  %v4407_v57 = vor.u32 %v5748_v55, %v4406_v54  ;;  %v4726_v35 = vld [vmem:[#allocation5 + $0x340] sm:$0xf]  ;;  %v5760_v54 = vld [vmem:[#allocation5 + $0x12c] sm:$0xf0] }
  0xbc   : > { %1112 = vmatpush.bf16.msrb.mxu3 %v4079_v32  ;;  %v5800_v32 = vld [vmem:[#allocation5 + $0x26c] sm:$0xf0]  ;;  %v4326_v50 = vld [vmem:[#allocation5 + $0x20] sm:$0xf] }
  0xbd   : > { %v4454_v52 = vld [vmem:[#allocation5 + $0x120] sm:$0xf]  ;;  %v5944_v23 = vld [vmem:[#allocation5 + $0x6ec] sm:$0xf0] }
  0xbe   : > { %1123 = vmatpush.bf16.msra.mxu0 %v4179_v62  ;;  %v4663_v62 = vor.u32 %v5812_v60, %v4662_v59  ;;  %v4582_v55 = vld [vmem:[#allocation5 + $0x220] sm:$0xf]  ;;  %v5824_v60 = vld [vmem:[#allocation5 + $0x32c] sm:$0xf0]  ;;  %v5191_v26 = vor.u32 %v5944_v23, %v5190_v22 }
  0xbf   : > { %1082 = vmatpush.bf16.msrb.mxu1 %v4135_v2  ;;  %1096 = vmatpush.bf16.msrb.mxu2 %v4139_v3  ;;  %v4390_v2 = vld [vmem:[#allocation5 + $0xa0] sm:$0xf]  ;;  %v5744_v3 = vld [vmem:[#allocation5 + $0xac] sm:$0xf0]  ;;  %v4583_v58 = vor.u32 %v5792_v56, %v4582_v55 }
  0xc0   : > { %v4391_v5 = vor.u32 %v5744_v3, %v4390_v2  ;;  %v4710_v59 = vld [vmem:[#allocation5 + $0x320] sm:$0xf]  ;;  %v5724_v2 = vld [vmem:[#allocation5 + $0xc] sm:$0xf0] }
  0xc1   : > { %v5976_v27 = vld [vmem:[#allocation5 + $0x7ec] sm:$0xf0] }
  0xc2   : > { %1124 = vmatpush.bf16.msra.mxu0 %v4147_v11  ;;  %v4774_v11 = vld [vmem:[#allocation5 + $0x3a0] sm:$0xf]  ;;  %v5904_v56 = vld [vmem:[#allocation5 + $0x5ac] sm:$0xf0] }
  0xc3   : > { %1083 = vmatpush.bf16.msrb.mxu1 %v4103_v15  ;;  %1097 = vmatpush.bf16.msrb.mxu2 %v4107_v19  ;;  %v4775_v13 = vor.u32 %v5840_v12, %v4774_v11  ;;  %v5740_v15 = vld [vmem:[#allocation5 + $0x8c] sm:$0xf0]  ;;  %v4630_v19 = vld [vmem:[#allocation5 + $0x280] sm:$0xf]  ;;  %v688_v11 = vperm.slane %v6443_v63, 3  ;;  %v4567_v12 = vor.u32 %v5788_v8, %v4566_v6 }
  0xc4   : > { %v4375_v16 = vor.u32 %v5740_v15, %v4374_v14  ;;  %v4934_v14 = vld [vmem:[#allocation5 + $0x4e0] sm:$0xf] }
  0xc5   : > { %v5014_v6 = vld [vmem:[#allocation5 + $0x580] sm:$0xf] }
  0xc6   : > { %1125 = vmatpush.bf16.msra.mxu0 %v4115_v24  ;;  %v4631_v24 = vor.u32 %v5804_v21, %v4630_v19  ;;  %v5063_v21 = vor.u32 %v5912_v18, %v5062_v17  ;;  %v5932_v18 = vld [vmem:[#allocation5 + $0x68c] sm:$0xf0] }
  0xc7   : > { %1084 = vmatpush.bf16.msrb.mxu1 %v4071_v30  ;;  %1098 = vmatpush.bf16.msrb.mxu2 %v4075_v31  ;;  %v5768_v30 = vld [vmem:[#allocation5 + $0x16c] sm:$0xf0]  ;;  %v4614_v31 = vld [vmem:[#allocation5 + $0x260] sm:$0xf] }
  0xca   : > { %1126 = vmatpush.bf16.msra.mxu0 %v4083_v33  ;;  %v4487_v33 = vor.u32 %v5768_v30, %v4486_v28  ;;  %v4918_v28 = vld [vmem:[#allocation5 + $0x4c0] sm:$0xf] }
 0x12a   : > { %v611_v36 = vpop.f32.mrf.mxu0 }
 0x12b   : > { %v612_v38 = vadd.f32 %v6131_v37, %v611_v36  ;;  %v4615_v36 = vor.u32 %v5800_v32, %v4614_v31 }
 0x12d   : > { %v616_v41 = vmax.f32 %v612_v38, 0.0  ;;  %v5832_v38 = vld [vmem:[#allocation5 + $0x36c] sm:$0xf0] }
 0x132   : > { %v613_v39 = vpop.f32.mrf.mxu0 }
 0x133   : > { %v614_v40 = vadd.f32 %v6131_v37, %v613_v39  ;;  %v4742_v37 = vld [vmem:[#allocation5 + $0x360] sm:$0xf] }
 0x134   : > { %v4743_v39 = vor.u32 %v5832_v38, %v4742_v37  ;;  %v5174_v37 = vld [vmem:[#allocation5 + $0x6c0] sm:$0xf]  ;;  %v686_v38 = vperm.slane %v6443_v63, 1 }
 0x135   : > { %v617_v42 = vmax.f32 %v614_v40, 0.0  ;;  %v4342_v40 = vld [vmem:[#allocation5 + $0x40] sm:$0xf] }
 0x137   : > { %v618_v43 = vpack.c.bf16 %v617_v42, %v616_v41  ;;  %v5732_v41 = vld [vmem:[#allocation5 + $0x4c] sm:$0xf0]  ;;  %v4470_v42 = vld [vmem:[#allocation5 + $0x140] sm:$0xf] }
 0x138   : > { %v4471_v34 = vor.u32 %v5764_v44, %v4470_v42  ;;  %v5940_v42 = vld [vmem:[#allocation5 + $0x6cc] sm:$0xf0]  ;;  %v687_v44 = vperm.slane %v6443_v63, 2 }
 0x139   : > { %1029 = vmatmul.bf16.vlgmr.msra.gmra.mxu1 %v618_v43  ;;  %1043 = vmatmul.bf16.vlgmr.msra.gmra.mxu2 %v618_v43 }
 0x13a   : > { %1057 = vmatmul.bf16.vlgmr.msra.gmra.mxu3 %v618_v43  ;;  %1071 = vmatmul.bf16.vlgmr.msrb.gmra.mxu0 %v618_v43 }
 0x13b   : > { %2854 = vmatpush.bf16.msra.mxu1 %v4423_v46  ;;  %2867 = vmatpush.bf16.msra.mxu2 %v4551_v48  ;;  %v5796_v46 = vld [vmem:[#allocation5 + $0x24c] sm:$0xf0] }
 0x13c   : > { %2880 = vmatpush.bf16.msra.mxu3 %v4679_v51  ;;  %2893 = vmatpush.bf16.msrb.mxu0 %v4807_v53  ;;  %v4599_v47 = vor.u32 %v5796_v46, %v4598_v45  ;;  %v5828_v48 = vld [vmem:[#allocation5 + $0x34c] sm:$0xf0]  ;;  %v5175_v46 = vor.u32 %v5940_v42, %v5174_v37 }
 0x13d   : > { %v4727_v49 = vor.u32 %v5828_v48, %v4726_v35  ;;  %v5728_v51 = vld [vmem:[#allocation5 + $0x2c] sm:$0xf0] }
 0x13e   : > { %v4327_v53 = vor.u32 %v5728_v51, %v4326_v50  ;;  %v5872_v51 = vld [vmem:[#allocation5 + $0x4ac] sm:$0xf0] }
 0x13f   : > { %2855 = vmatpush.bf16.msra.mxu1 %v4407_v57  ;;  %2868 = vmatpush.bf16.msra.mxu2 %v4535_v61  ;;  %v4455_v57 = vor.u32 %v5760_v54, %v4454_v52  ;;  %v5030_v52 = vld [vmem:[#allocation5 + $0x5a0] sm:$0xf]  ;;  %v5896_v37 = vld [vmem:[#allocation5 + $0x56c] sm:$0xf0] }
 0x140   : > { %2881 = vmatpush.bf16.msra.mxu3 %v4663_v62  ;;  %2894 = vmatpush.bf16.msrb.mxu0 %v4791_v1  ;;  %v4711_v62 = vor.u32 %v5824_v60, %v4710_v59  ;;  %v4310_v1 = vld [vmem:[#allocation5] sm:$0xf]  ;;  %v5031_v59 = vor.u32 %v5904_v56, %v5030_v52  ;;  %v5936_v60 = vld [vmem:[#allocation5 + $0x6ac] sm:$0xf0] }
 0x141   : > { %v4311_v3 = vor.u32 %v5724_v2, %v4310_v1  ;;  %v5968_v1 = vld [vmem:[#allocation5 + $0x7ac] sm:$0xf0]  ;;  %v4854_v56 = vld [vmem:[#allocation5 + $0x440] sm:$0xf] }
 0x143   : > { %2856 = vmatpush.bf16.msra.mxu1 %v4391_v5  ;;  %2869 = vmatpush.bf16.msra.mxu2 %v4519_v9  ;;  %v5756_v5 = vld [vmem:[#allocation5 + $0x10c] sm:$0xf0]  ;;  %v4694_v9 = vld [vmem:[#allocation5 + $0x300] sm:$0xf] }
 0x144   : > { %2882 = vmatpush.bf16.msra.mxu3 %v4647_v10  ;;  %2895 = vmatpush.bf16.msrb.mxu0 %v4775_v13  ;;  %v4439_v7 = vor.u32 %v5756_v5, %v4438_v4  ;;  %v685_v10 = vperm.slane %v6443_v63, 0  ;;  %v5820_v13 = vld [vmem:[#allocation5 + $0x30c] sm:$0xf0]  ;;  %v4886_v4 = vld [vmem:[#allocation5 + $0x480] sm:$0xf] }
 0x145   : > { %v4695_v15 = vor.u32 %v5820_v13, %v4694_v9  ;;  %v5868_v5 = vld [vmem:[#allocation5 + $0x48c] sm:$0xf0] }
 0x147   : > { %2857 = vmatpush.bf16.msra.mxu1 %v4375_v16  ;;  %2870 = vmatpush.bf16.msra.mxu2 %v4503_v20  ;;  %v5880_v16 = vld [vmem:[#allocation5 + $0x4ec] sm:$0xf0] }
 0x148   : > { %2883 = vmatpush.bf16.msra.mxu3 %v4631_v24  ;;  %2896 = vmatpush.bf16.msrb.mxu0 %v4759_v25  ;;  %v4935_v20 = vor.u32 %v5880_v16, %v4934_v14  ;;  %v5318_v24 = vld [vmem:[#allocation5 + $0x7e0] sm:$0xf]  ;;  %v4887_v16 = vor.u32 %v5868_v5, %v4886_v4  ;;  %v5892_v4 = vld [vmem:[#allocation5 + $0x54c] sm:$0xf0] }
 0x149   : > { %1085 = vmatmul.bf16.vlgmr.msrb.gmra.mxu1 %v618_v43  ;;  %1099 = vmatmul.bf16.vlgmr.msrb.gmra.mxu2 %v618_v43  ;;  %v5319_v31 = vor.u32 %v5976_v27, %v5318_v24  ;;  %v5270_v27 = vld [vmem:[#allocation5 + $0x780] sm:$0xf] }
 0x14a   : > { %1113 = vmatmul.bf16.vlgmr.msrb.gmra.mxu3 %v618_v43  ;;  %1127 = vmatmul.bf16.vlgmr.msra.gmra.mxu0 %v618_v43  ;;  %v4343_v43 = vor.u32 %v5732_v41, %v4342_v40  ;;  %v5110_v5 = vld [vmem:[#allocation5 + $0x640] sm:$0xf] }
 0x14b   : > { %2858 = vmatpush.bf16.msra.mxu1 %v4359_v29  ;;  %2871 = vmatpush.bf16.msra.mxu2 %v4487_v33  ;;  %v5876_v29 = vld [vmem:[#allocation5 + $0x4cc] sm:$0xf0]  ;;  %v5046_v33 = vld [vmem:[#allocation5 + $0x5c0] sm:$0xf] }
 0x14c   : > { %2884 = vmatpush.bf16.msra.mxu3 %v4615_v36  ;;  %2897 = vmatpush.bf16.msrb.mxu0 %v4743_v39  ;;  %v4919_v32 = vor.u32 %v5876_v29, %v4918_v28  ;;  %v5908_v36 = vld [vmem:[#allocation5 + $0x5cc] sm:$0xf0] }
 0x14d   : > { %v5047_v41 = vor.u32 %v5908_v36, %v5046_v33  ;;  %v5964_v28 = vld [vmem:[#allocation5 + $0x78c] sm:$0xf0]  ;;  %v6268_v33 = vmov 0.0   ;;  %v4998_v36 = vld [vmem:[#allocation5 + $0x560] sm:$0xf] }
 0x14e   : > { %1209 = vst [vmem:[#allocation2] sm:$0xff] %v6268_v33 }
 0x14f   : > { %2859 = vmatpush.bf16.msra.mxu1 %v4343_v43  ;;  %2872 = vmatpush.bf16.msra.mxu2 %v4471_v34  ;;  %v5302_v43 = vld [vmem:[#allocation5 + $0x7c0] sm:$0xf]  ;;  %v5972_v34 = vld [vmem:[#allocation5 + $0x7cc] sm:$0xf0]  ;;  %1210 = vst [vmem:[#allocation2 + $0x8] sm:$0xff] %v6268_v33 }
 0x150   : > { %2885 = vmatpush.bf16.msra.mxu3 %v4599_v47  ;;  %2898 = vmatpush.bf16.msrb.mxu0 %v4727_v49  ;;  %v4902_v47 = vld [vmem:[#allocation5 + $0x4a0] sm:$0xf]  ;;  %v689_v49 = vperm.slane %v6443_v63, 4  ;;  %v5303_v50 = vor.u32 %v5972_v34, %v5302_v43  ;;  %1211 = vst [vmem:[#allocation2 + $0x10] sm:$0xff] %v6268_v33 }
 0x151   : > { %v4903_v55 = vor.u32 %v5872_v51, %v4902_v47  ;;  %v5126_v34 = vld [vmem:[#allocation5 + $0x660] sm:$0xf]  ;;  %v690_v47 = vperm.slane %v6443_v63, 5  ;;  %1212 = vst [vmem:[#allocation2 + $0x18] sm:$0xff] %v6268_v33 }
 0x152   : > { %v5254_v51 = vld [vmem:[#allocation5 + $0x760] sm:$0xf]  ;;  %1213 = vst [vmem:[#allocation2 + $0x20] sm:$0xff] %v6268_v33 }
 0x153   : > { %2860 = vmatpush.bf16.msra.mxu1 %v4327_v53  ;;  %2873 = vmatpush.bf16.msra.mxu2 %v4455_v57  ;;  %v5158_v57 = vld [vmem:[#allocation5 + $0x6a0] sm:$0xf]  ;;  %1214 = vst [vmem:[#allocation2 + $0x28] sm:$0xff] %v6268_v33 }
 0x154   : > { %2886 = vmatpush.bf16.msra.mxu3 %v4583_v58  ;;  %2899 = vmatpush.bf16.msrb.mxu0 %v4711_v62  ;;  %v5286_v62 = vld [vmem:[#allocation5 + $0x7a0] sm:$0xf]  ;;  %v5159_v2 = vor.u32 %v5936_v60, %v5158_v57  ;;  %1215 = vst [vmem:[#allocation2 + $0x30] sm:$0xff] %v6268_v33 }
 0x155   : > { %1216 = vst [vmem:[#allocation2 + $0x38] sm:$0xff] %v6268_v33 }
 0x157   : > { %2861 = vmatpush.bf16.msra.mxu1 %v4311_v3  ;;  %2874 = vmatpush.bf16.msra.mxu2 %v4439_v7  ;;  %v5287_v3 = vor.u32 %v5968_v1, %v5286_v62  ;;  %v5860_v62 = vld [vmem:[#allocation5 + $0x44c] sm:$0xf0]  ;;  %v4982_v1 = vld [vmem:[#allocation5 + $0x540] sm:$0xf] }
 0x158   : > { %2887 = vmatpush.bf16.msra.mxu3 %v4567_v12  ;;  %2900 = vmatpush.bf16.msrb.mxu0 %v4695_v15  ;;  %v5142_v12 = vld [vmem:[#allocation5 + $0x680] sm:$0xf]  ;;  %v692_v15 = vperm.slane %v6443_v63, 7 }
 0x15b   : > { %2906 = vmatpush.bf16.msrb.mxu1 %v4935_v20  ;;  %2919 = vmatpush.bf16.msrb.mxu2 %v5063_v21 }
 0x15c   : > { %2932 = vmatpush.bf16.msrb.mxu3 %v5191_v26  ;;  %2945 = vmatpush.bf16.msra.mxu0 %v5319_v31  ;;  %v5143_v26 = vor.u32 %v5932_v18, %v5142_v12  ;;  %v5864_v31 = vld [vmem:[#allocation5 + $0x46c] sm:$0xf0] }
 0x15f   : > { %2907 = vmatpush.bf16.msrb.mxu1 %v4919_v32  ;;  %2920 = vmatpush.bf16.msrb.mxu2 %v5047_v41 }
 0x160   : > { %2933 = vmatpush.bf16.msrb.mxu3 %v5175_v46  ;;  %2946 = vmatpush.bf16.msra.mxu0 %v5303_v50  ;;  %v5928_v50 = vld [vmem:[#allocation5 + $0x66c] sm:$0xf0] }
 0x163   : > { %2908 = vmatpush.bf16.msrb.mxu1 %v4903_v55  ;;  %2921 = vmatpush.bf16.msrb.mxu2 %v5031_v59  ;;  %v5960_v55 = vld [vmem:[#allocation5 + $0x76c] sm:$0xf0] }
 0x164   : > { %2934 = vmatpush.bf16.msrb.mxu3 %v5159_v2  ;;  %2947 = vmatpush.bf16.msra.mxu0 %v5287_v3 }
 0x167   : > { %2909 = vmatpush.bf16.msrb.mxu1 %v4887_v16  ;;  %v5956_v16 = vld [vmem:[#allocation5 + $0x74c] sm:$0xf0] }
 0x168   : > { %2935 = vmatpush.bf16.msrb.mxu3 %v5143_v26 }
 0x1b6   : > { %v1030_v61 = vpop.f32.mrf.mxu1 }
 0x1b7   : > { %v1072_v0 = vpop.f32.mrf.mxu0  ;;  %v1031_v35 = vadd.f32 %v1030_v61, %v685_v10 }
 0x1b8   : > { %v1073_v48 = vadd.f32 %v1072_v0, %v688_v11 }
 0x1b9   : > { %v1133_v7 = vmax.f32 %v1031_v35, 0.0 }
 0x1ba   : > { %v1136_v8 = vmax.f32 %v1073_v48, 0.0  ;;  %v4999_v48 = vor.u32 %v5896_v37, %v4998_v36  ;;  %v5920_v36 = vld [vmem:[#allocation5 + $0x62c] sm:$0xf0]  ;;  %v5222_v37 = vld [vmem:[#allocation5 + $0x720] sm:$0xf] }
 0x1bc   : > { %v1044_v19 = vpop.f32.mrf.mxu2 }
 0x1bd   : > { %v1058_v25 = vpop.f32.mrf.mxu3  ;;  %v1045_v58 = vadd.f32 %v1044_v19, %v686_v38 }
 0x1be   : > { %v1032_v30 = vpop.f32.mrf.mxu1  ;;  %v1059_v61 = vadd.f32 %v1058_v25, %v687_v44 }
 0x1bf   : > { %v1033_v39 = vadd.f32 %v1032_v30, %v685_v10  ;;  %v1074_v40 = vpop.f32.mrf.mxu0  ;;  %v1134_v19 = vmax.f32 %v1045_v58, 0.0  ;;  %v4870_v30 = vld [vmem:[#allocation5 + $0x460] sm:$0xf] }
 0x1c0   : > { %v1075_v45 = vadd.f32 %v1074_v40, %v688_v11  ;;  %v5900_v11 = vld [vmem:[#allocation5 + $0x58c] sm:$0xf0]  ;;  %v1135_v24 = vmax.f32 %v1059_v61, 0.0  ;;  %v4871_v46 = vor.u32 %v5864_v31, %v4870_v30 }
 0x1c1   : > { %v1141_v53 = vmax.f32 %v1033_v39, 0.0  ;;  %v5015_v17 = vor.u32 %v5900_v11, %v5014_v6 }
 0x1c2   : > { %v1144_v54 = vmax.f32 %v1075_v45, 0.0  ;;  %v5271_v45 = vor.u32 %v5964_v28, %v5270_v27  ;;  %2910 = vmatpush.bf16.msrb.mxu1 %v4871_v46  ;;  %v5888_v27 = vld [vmem:[#allocation5 + $0x52c] sm:$0xf0]  ;;  %v5094_v28 = vld [vmem:[#allocation5 + $0x620] sm:$0xf] }
 0x1c3   : > { %v1149_v20 = vmax.f32 %v1133_v7, %v1141_v53  ;;  %2922 = vmatpush.bf16.msrb.mxu2 %v5015_v17  ;;  %v691_v53 = vperm.slane %v6443_v63, 6  ;;  %v4838_v17 = vld [vmem:[#allocation5 + $0x420] sm:$0xf]  ;;  %v5095_v46 = vor.u32 %v5920_v36, %v5094_v28 }
 0x1c4   : > { %v1046_v0 = vpop.f32.mrf.mxu2  ;;  %v1170_v21 = vmax.f32 %v1136_v8, %v1144_v54  ;;  %2948 = vmatpush.bf16.msra.mxu0 %v5271_v45  ;;  %v5127_v8 = vor.u32 %v5928_v50, %v5126_v34 }
 0x1c5   : > { %v1047_v9 = vadd.f32 %v1046_v0, %v686_v38  ;;  %v1060_v10 = vpop.f32.mrf.mxu3  ;;  %v1150_v38 = vrot.slane %v1149_v20, 4 }
 0x1c6   : > { %v1061_v13 = vadd.f32 %v1060_v10, %v687_v44  ;;  %v1086_v14 = vpop.f32.mrf.mxu1  ;;  %v1171_v39 = vrot.slane %v1170_v21, 4  ;;  %v5238_v10 = vld [vmem:[#allocation5 + $0x740] sm:$0xf]  ;;  %2936 = vmatpush.bf16.msrb.mxu3 %v5127_v8 }
 0x1c7   : > { %v1142_v22 = vmax.f32 %v1047_v9, 0.0  ;;  %v1128_v23 = vpop.f32.mrf.mxu0  ;;  %v1087_v41 = vadd.f32 %v1086_v14, %v689_v49  ;;  %2923 = vmatpush.bf16.msrb.mxu2 %v4999_v48  ;;  %v6461_v61 = vmax.f32 %v1149_v20, %v1150_v38  ;;  %v5924_v9 = vld [vmem:[#allocation5 + $0x64c] sm:$0xf0]  ;;  %v4855_v14 = vor.u32 %v5860_v62, %v4854_v56  ;;  %v4950_v48 = vld [vmem:[#allocation5 + $0x500] sm:$0xf] }
 0x1c8   : > { %v1143_v25 = vmax.f32 %v1061_v13, 0.0  ;;  %v1129_v43 = vadd.f32 %v1128_v23, %v692_v15  ;;  %v6457_v57 = vmax.f32 %v1170_v21, %v1171_v39  ;;  %v5856_v20 = vld [vmem:[#allocation5 + $0x42c] sm:$0xf0]  ;;  %v4966_v21 = vld [vmem:[#allocation5 + $0x520] sm:$0xf] }
 0x1c9   : > { %v1156_v29 = vmax.f32 %v1134_v19, %v1142_v22  ;;  %v1137_v58 = vmax.f32 %v1087_v41, 0.0  ;;  %v5111_v19 = vor.u32 %v5924_v9, %v5110_v5  ;;  %2911 = vmatpush.bf16.msrb.mxu1 %v4855_v14  ;;  %v4839_v26 = vor.u32 %v5856_v20, %v4838_v17 }
 0x1ca   : > { %v1163_v32 = vmax.f32 %v1135_v24, %v1143_v25  ;;  %v1140_v2 = vmax.f32 %v1129_v43, 0.0  ;;  %v1173_v18 = vrot.slane %v6457_v57, 2  ;;  %v5239_v25 = vor.u32 %v5956_v16, %v5238_v10  ;;  %v4822_v43 = vld [vmem:[#allocation5 + $0x400] sm:$0xf] }
 0x1cb   : > { %v1157_v40 = vrot.slane %v1156_v29, 4  ;;  %v4967_v33 = vor.u32 %v5888_v27, %v4966_v21  ;;  %2937 = vmatpush.bf16.msrb.mxu3 %v5111_v19  ;;  %v1152_v62 = vrot.slane %v6461_v61, 2 }
 0x1cc   : > { %v1164_v42 = vrot.slane %v1163_v32, 4  ;;  %v1100_v44 = vpop.f32.mrf.mxu2 }
 0x1cd   : > { %v1114_v35 = vpop.f32.mrf.mxu3  ;;  %v1158_v52 = vmax.f32 %v1156_v29, %v1157_v40  ;;  %v1101_v6 = vadd.f32 %v1100_v44, %v690_v47  ;;  %2912 = vmatpush.bf16.msrb.mxu1 %v4839_v26 }
 0x1ce   : > { %v1088_v54 = vpop.f32.mrf.mxu1  ;;  %v1165_v0 = vmax.f32 %v1163_v32, %v1164_v42  ;;  %v1115_v12 = vadd.f32 %v1114_v35, %v691_v53  ;;  %v5952_v42 = vld [vmem:[#allocation5 + $0x72c] sm:$0xf0] }
 0x1cf   : > { %v1089_v59 = vadd.f32 %v1088_v54, %v689_v49  ;;  %v1130_v60 = vpop.f32.mrf.mxu0  ;;  %v5255_v49 = vor.u32 %v5960_v55, %v5254_v51  ;;  %v1159_v11 = vrot.slane %v1158_v52, 2  ;;  %v1138_v29 = vmax.f32 %v1101_v6, 0.0  ;;  %v5852_v35 = vld [vmem:[#allocation5 + $0x40c] sm:$0xf0]  ;;  %2938 = vmatpush.bf16.msrb.mxu3 %v5095_v46  ;;  %v4424_v46 = vld [vmem:[#allocation5 + $0xf0] sm:$0xf0] }
 0x1d0   : > { %v1131_v3 = vadd.f32 %v1130_v60, %v692_v15  ;;  %v4983_v15 = vor.u32 %v5892_v4, %v4982_v1  ;;  %v1166_v22 = vrot.slane %v1165_v0, 2  ;;  %v1139_v39 = vmax.f32 %v1115_v12, 0.0  ;;  %v5884_v55 = vld [vmem:[#allocation5 + $0x50c] sm:$0xf0]  ;;  %v5206_v60 = vld [vmem:[#allocation5 + $0x700] sm:$0xf] }
 0x1d1   : > { %v1145_v7 = vmax.f32 %v1089_v59, 0.0  ;;  %2949 = vmatpush.bf16.msra.mxu0 %v5255_v49  ;;  %v1160_v38 = vmax.f32 %v1158_v52, %v1159_v11  ;;  %v5223_v34 = vor.u32 %v5952_v42, %v5222_v37  ;;  %v4823_v54 = vor.u32 %v5852_v35, %v4822_v43  ;;  %v5078_v52 = vld [vmem:[#allocation5 + $0x600] sm:$0xf]  ;;  %v5916_v59 = vld [vmem:[#allocation5 + $0x60c] sm:$0xf0] }
 0x1d2   : > { %v1148_v13 = vmax.f32 %v1131_v3, 0.0  ;;  %2924 = vmatpush.bf16.msrb.mxu2 %v4983_v15  ;;  %v1174_v1 = vmax.f32 %v6457_v57, %v1173_v18  ;;  %v5948_v4 = vld [vmem:[#allocation5 + $0x70c] sm:$0xf0]  ;;  %v5079_v6 = vor.u32 %v5916_v59, %v5078_v52  ;;  %v1153_v12 = vmax.f32 %v6461_v61, %v1152_v62  ;;  %v4552_v35 = vld [vmem:[#allocation5 + $0x1f0] sm:$0xf0] }
 0x1d3   : > { %v1177_v63 = vmax.f32 %v1137_v58, %v1145_v7  ;;  %v5207_v7 = vor.u32 %v5948_v4, %v5206_v60  ;;  %v1161_v8 = vrot.slane %v1160_v38, 1  ;;  %2913 = vmatpush.bf16.msrb.mxu1 %v4823_v54 }
 0x1d4   : > { %v1198_v23 = vmax.f32 %v1140_v2, %v1148_v13  ;;  %v1102_v24 = vpop.f32.mrf.mxu2  ;;  %v1175_v13 = vrot.slane %v1174_v1, 1  ;;  %2939 = vmatpush.bf16.msrb.mxu3 %v5079_v6  ;;  %v1154_v20 = vrot.slane %v1153_v12, 1  ;;  %v4536_v6 = vld [vmem:[#allocation5 + $0x1d0] sm:$0xf0] }
 0x1d5   : > { %v1178_v30 = vrot.slane %v1177_v63, 4  ;;  %v1103_v31 = vadd.f32 %v1102_v24, %v690_v47  ;;  %v1116_v32 = vpop.f32.mrf.mxu3  ;;  %2950 = vmatpush.bf16.msra.mxu0 %v5239_v25  ;;  %v1167_v47 = vmax.f32 %v1165_v0, %v1166_v22  ;;  %v1162_v17 = vmax.f32 %v1160_v38, %v1161_v8  ;;  %v4664_v8 = vld [vmem:[#allocation5 + $0x2d0] sm:$0xf0] }
 0x1d6   : > { %v1199_v40 = vrot.slane %v1198_v23, 4  ;;  %v1117_v41 = vadd.f32 %v1116_v32, %v691_v53  ;;  %2925 = vmatpush.bf16.msrb.mxu2 %v4967_v33  ;;  %v4951_v53 = vor.u32 %v5884_v55, %v4950_v48  ;;  %v1176_v21 = vmax.f32 %v1174_v1, %v1175_v13  ;;  %v5814_v48 = vld [vmem:[#allocation5 + $0x2e4] sm:$0xf]  ;;  %v4392_v13 = vld [vmem:[#allocation5 + $0xb0] sm:$0xf0] }
 0x1d7   : > { %v1179_v44 = vmax.f32 %v1177_v63, %v1178_v30  ;;  %v1146_v45 = vmax.f32 %v1103_v31, 0.0  ;;  %v1168_v49 = vrot.slane %v1167_v47, 1  ;;  %v1225_v25 = vrot.slane %v1162_v17, 7  ;;  %v5746_v1 = vld [vmem:[#allocation5 + $0xc4] sm:$0xf] }
 0x1d8   : > { %v1200_v50 = vmax.f32 %v1198_v23, %v1199_v40  ;;  %v1147_v51 = vmax.f32 %v1117_v41, 0.0  ;;  %v1227_v30 = vrot.slane %v1176_v21, 5  ;;  %v4520_v17 = vld [vmem:[#allocation5 + $0x1b0] sm:$0xf0] }
 0x1d9   : > { %v1180_v56 = vrot.slane %v1179_v44, 2  ;;  %v1184_v58 = vmax.f32 %v1138_v29, %v1146_v45  ;;  %2951 = vmatpush.bf16.msra.mxu0 %v5223_v34  ;;  %v1169_v18 = vmax.f32 %v1167_v47, %v1168_v49  ;;  %v1155_v29 = vmax.f32 %v1153_v12, %v1154_v20  ;;  %v5750_v45 = vld [vmem:[#allocation5 + $0xe4] sm:$0xf]  ;;  %v4680_v47 = vld [vmem:[#allocation5 + $0x2f0] sm:$0xf0] }
 0x1da   : > { %v1201_v2 = vrot.slane %v1200_v50, 2  ;;  %v1191_v3 = vmax.f32 %v1139_v39, %v1147_v51  ;;  %2926 = vmatpush.bf16.msrb.mxu2 %v4951_v53  ;;  %v5782_v34 = vld [vmem:[#allocation5 + $0x1e4] sm:$0xf]  ;;  %v4808_v51 = vld [vmem:[#allocation5 + $0x3f0] sm:$0xf0]  ;;  %v4683_v4 = vor.u32 %v5814_v48, %v4680_v47 }
 0x1db   : > { %v1181_v0 = vmax.f32 %v1179_v44, %v1180_v56  ;;  %v1185_v5 = vrot.slane %v1184_v58, 4  ;;  %v1226_v26 = vrot.slane %v1169_v18, 6  ;;  %v1233_v36 = vsel %vm1232_vm1, %v1155_v29, %v1225_v25  ;;  %v5842_v49 = vld [vmem:[#allocation5 + $0x3c4] sm:$0xf] }
 0x1dc   : > { %v1202_v9 = vmax.f32 %v1200_v50, %v1201_v2  ;;  %v1192_v10 = vrot.slane %v1191_v3, 4  ;;  %v5846_v50 = vld [vmem:[#allocation5 + $0x3e4] sm:$0xf]  ;;  %v4427_v56 = vor.u32 %v5750_v45, %v4424_v46  ;;  %v4555_v62 = vor.u32 %v5782_v34, %v4552_v35  ;;  %v4408_v2 = vld [vmem:[#allocation5 + $0xd0] sm:$0xf0] }
 0x1dd   : > { %v1186_v11 = vmax.f32 %v1184_v58, %v1185_v5  ;;  %v1182_v14 = vrot.slane %v1181_v0, 1  ;;  %2952 = vmatpush.bf16.msra.mxu0 %v5207_v7  ;;  %v1235_v37 = vsel %vm1234_vm2, %v1226_v26, %v1227_v30  ;;  %v5778_v5 = vld [vmem:[#allocation5 + $0x1c4] sm:$0xf]  ;;  %v4760_v30 = vld [vmem:[#allocation5 + $0x390] sm:$0xf0] }
 0x1de   : > { %v1193_v57 = vmax.f32 %v1191_v3, %v1192_v10  ;;  %v1203_v63 = vrot.slane %v1202_v9, 1  ;;  %v1237_v42 = vsel %vm1236_vm3, %v1233_v36, %v1235_v37  ;;  %v5810_v7 = vld [vmem:[#allocation5 + $0x2c4] sm:$0xf]  ;;  %v4411_v10 = vor.u32 %v5746_v1, %v4408_v2  ;;  %v4744_v35 = vld [vmem:[#allocation5 + $0x370] sm:$0xf0] }
 0x1df   : > { %v1187_v16 = vrot.slane %v1186_v11, 2  ;;  %v1183_v23 = vmax.f32 %v1181_v0, %v1182_v14  ;;  %v4811_v0 = vor.u32 %v5846_v50, %v4808_v51  ;;  %v5742_v12 = vld [vmem:[#allocation5 + $0xa4] sm:$0xf]  ;;  %v4472_v2 = vld [vmem:[#allocation5 + $0x150] sm:$0xf0] }
 0x1e0   : > { %v1194_v15 = vrot.slane %v1193_v57, 2  ;;  %v1204_v27 = vmax.f32 %v1202_v9, %v1203_v63  ;;  %v4792_v9 = vld [vmem:[#allocation5 + $0x3d0] sm:$0xf0]  ;;  %v5806_v18 = vld [vmem:[#allocation5 + $0x2a4] sm:$0xf]  ;;  %v4395_v20 = vor.u32 %v5742_v12, %v4392_v13 }
 0x1e1   : > { %v1188_v19 = vmax.f32 %v1186_v11, %v1187_v16  ;;  %v1228_v32 = vrot.slane %v1183_v23, 4  ;;  %v4539_v11 = vor.u32 %v5778_v5, %v4536_v6  ;;  %v4795_v14 = vor.u32 %v5842_v49, %v4792_v9  ;;  %v5774_v16 = vld [vmem:[#allocation5 + $0x1a4] sm:$0xf]  ;;  %v4648_v63 = vld [vmem:[#allocation5 + $0x2b0] sm:$0xf0] }
 0x1e2   : > { %v1195_v22 = vmax.f32 %v1193_v57, %v1194_v15  ;;  %v1231_v38 = vrot.slane %v1204_v27, 1  ;;  %v4667_v57 = vor.u32 %v5810_v7, %v4664_v8  ;;  %v5838_v15 = vld [vmem:[#allocation5 + $0x3a4] sm:$0xf]  ;;  %v4523_v21 = vor.u32 %v5774_v16, %v4520_v17  ;;  %v4376_v23 = vld [vmem:[#allocation5 + $0x90] sm:$0xf0] }
 0x1e3   : > { %v1189_v24 = vrot.slane %v1188_v19, 1  ;;  %v5770_v26 = vld [vmem:[#allocation5 + $0x184] sm:$0xf]  ;;  %v4504_v27 = vld [vmem:[#allocation5 + $0x190] sm:$0xf0] }
 0x1e4   : > { %v1196_v61 = vrot.slane %v1195_v22, 1  ;;  %v5834_v29 = vld [vmem:[#allocation5 + $0x384] sm:$0xf]  ;;  %v4507_v37 = vor.u32 %v5770_v26, %v4504_v27  ;;  %v4728_v6 = vld [vmem:[#allocation5 + $0x350] sm:$0xf0] }
 0x1e5   : > { %v1190_v28 = vmax.f32 %v1188_v19, %v1189_v24  ;;  %v4776_v19 = vld [vmem:[#allocation5 + $0x3b0] sm:$0xf0]  ;;  %v4651_v24 = vor.u32 %v5806_v18, %v4648_v63  ;;  %v5830_v45 = vld [vmem:[#allocation5 + $0x364] sm:$0xf] }
 0x1e6   : > { %v1197_v31 = vmax.f32 %v1195_v22, %v1196_v61  ;;  %v5738_v22 = vld [vmem:[#allocation5 + $0x84] sm:$0xf]  ;;  %v4779_v25 = vor.u32 %v5838_v15, %v4776_v19  ;;  %v4328_v9 = vld [vmem:[#allocation5 + $0x30] sm:$0xf0] }
 0x1e7   : > { %v1229_v33 = vrot.slane %v1190_v28, 3  ;;  %v5802_v61 = vld [vmem:[#allocation5 + $0x284] sm:$0xf]  ;;  %v4632_v28 = vld [vmem:[#allocation5 + $0x290] sm:$0xf0]  ;;  %v4379_v36 = vor.u32 %v5738_v22, %v4376_v23 }
 0x1e8   : > { %v1230_v39 = vrot.slane %v1197_v31, 2  ;;  %v5734_v31 = vld [vmem:[#allocation5 + $0x64] sm:$0xf]  ;;  %v4456_v13 = vld [vmem:[#allocation5 + $0x130] sm:$0xf0] }
 0x1e9   : > { %v1239_v40 = vsel %vm1238_vm4, %v1228_v32, %v1229_v33  ;;  %v4360_v32 = vld [vmem:[#allocation5 + $0x70] sm:$0xf0]  ;;  %v5766_v33 = vld [vmem:[#allocation5 + $0x164] sm:$0xf] }
 0x1ea   : > { %v1241_v41 = vsel %vm1240_vm5, %v1230_v39, %v1231_v38  ;;  %v4488_v38 = vld [vmem:[#allocation5 + $0x170] sm:$0xf0]  ;;  %v5798_v39 = vld [vmem:[#allocation5 + $0x264] sm:$0xf]  ;;  %v4363_v48 = vor.u32 %v5734_v31, %v4360_v32 }
 0x1eb   : > { %v1243_v43 = vsel %vm1242_vm6, %v1239_v40, %v1241_v41  ;;  %v4616_v40 = vld [vmem:[#allocation5 + $0x270] sm:$0xf0]  ;;  %v4635_v41 = vor.u32 %v5802_v61, %v4632_v28  ;;  %v4491_v47 = vor.u32 %v5766_v33, %v4488_v38  ;;  %v5762_v1 = vld [vmem:[#allocation5 + $0x144] sm:$0xf] }
 0x1ec   : > { %v1245_v44 = vsel %vm1244_vm7, %v1237_v42, %v1243_v43  ;;  %v4763_v42 = vor.u32 %v5834_v29, %v4760_v30  ;;  %v5826_v5 = vld [vmem:[#allocation5 + $0x344] sm:$0xf]  ;;  %v4475_v8 = vor.u32 %v5762_v1, %v4472_v2  ;;  %v4712_v17 = vld [vmem:[#allocation5 + $0x330] sm:$0xf0] }
 0x1ed   : > { %1247 = vst [vmem:[#allocation2] ss:$8 sm:$0xf] %v1245_v44  ;;  %v5726_v49 = vld [vmem:[#allocation5 + $0x24] sm:$0xf] }
 0x1ee   : > { %1248 = vst [vmem:[#allocation2] ss:$8 sm:$0xf0] %v1245_v44  ;;  %v5758_v12 = vld [vmem:[#allocation5 + $0x124] sm:$0xf]  ;;  %v4331_v63 = vor.u32 %v5726_v49, %v4328_v9 }
 0x1ef   : > { %v5822_v16 = vld [vmem:[#allocation5 + $0x324] sm:$0xf]  ;;  %v4459_v15 = vor.u32 %v5758_v12, %v4456_v13  ;;  %v4312_v19 = vld [vmem:[#allocation5 + $0x10] sm:$0xf0] }
 0x1f0   : > { %v5722_v18 = vld [vmem:[#allocation5 + $0x4] sm:$0xf]  ;;  %v4715_v23 = vor.u32 %v5822_v16, %v4712_v17  ;;  %v4696_v27 = vld [vmem:[#allocation5 + $0x310] sm:$0xf0] }
 0x1f1   : > { %v5818_v26 = vld [vmem:[#allocation5 + $0x304] sm:$0xf]  ;;  %v4936_v28 = vld [vmem:[#allocation5 + $0x4f0] sm:$0xf0]  ;;  %v4315_v32 = vor.u32 %v5722_v18, %v4312_v19 }
 0x1f2   : > { %v5878_v61 = vld [vmem:[#allocation5 + $0x4e4] sm:$0xf]  ;;  %v5064_v30 = vld [vmem:[#allocation5 + $0x5f0] sm:$0xf0] }
 0x1f3   : > { %v5910_v29 = vld [vmem:[#allocation5 + $0x5e4] sm:$0xf]  ;;  %v5320_v38 = vld [vmem:[#allocation5 + $0x7f0] sm:$0xf0] }
 0x1f4   : > { %v1292_v54 = vld [vmem:[#allocation2] sm:$0xff]  ;;  %v1293_v55 = vld [vmem:[#allocation2 + $0x8] sm:$0xff]  ;;  %v1294_v52 = vld [vmem:[#allocation2 + $0x10] sm:$0xff] }
 0x1f5   : > { %v6470_v58 = vpack.c.bf16 %v1292_v54, %v1292_v54  ;;  %v6472_v53 = vpack.c.bf16 %v1293_v55, %v1293_v55  ;;  %v6474_v59 = vpack.c.bf16 %v1294_v52, %v1294_v52  ;;  %v1295_v60 = vld [vmem:[#allocation2 + $0x18] sm:$0xff]  ;;  %v1296_v43 = vld [vmem:[#allocation2 + $0x20] sm:$0xff]  ;;  %v1297_v44 = vld [vmem:[#allocation2 + $0x28] sm:$0xff]  ;;  %v4619_v54 = vor.u32 %v5798_v39, %v4616_v40 }
 0x1f6   : > { %v6476_v3 = vpack.c.bf16 %v1295_v60, %v1295_v60  ;;  %v1298_v46 = vld [vmem:[#allocation2 + $0x30] sm:$0xff]  ;;  %v1299_v34 = vld [vmem:[#allocation2 + $0x38] sm:$0xff]  ;;  %v6482_v50 = vpack.c.bf16 %v1296_v43, %v1296_v43  ;;  %v6484_v51 = vpack.c.bf16 %v1297_v44, %v1297_v44  ;;  %v5730_v55 = vld [vmem:[#allocation5 + $0x44] sm:$0xf]  ;;  %v4699_v40 = vor.u32 %v5818_v26, %v4696_v27 }
 0x1f7   : > { %2862 = vmatmul.bf16.vlgmr.msra.gmra.mxu1 %v6470_v58  ;;  %2875 = vmatmul.bf16.vlgmr.msra.gmra.mxu2 %v6472_v53  ;;  %v4344_v52 = vld [vmem:[#allocation5 + $0x50] sm:$0xf0]  ;;  %v6488_v60 = vpack.c.bf16 %v1299_v34, %v1299_v34  ;;  %v5942_v31 = vld [vmem:[#allocation5 + $0x6e4] sm:$0xf] }
 0x1f8   : > { %2888 = vmatmul.bf16.vlgmr.msra.gmra.mxu3 %v6474_v59  ;;  %2901 = vmatmul.bf16.vlgmr.msrb.gmra.mxu0 %v6476_v3  ;;  %v4347_v7 = vor.u32 %v5730_v55, %v4344_v52  ;;  %v5874_v43 = vld [vmem:[#allocation5 + $0x4c4] sm:$0xf]  ;;  %v4920_v44 = vld [vmem:[#allocation5 + $0x4d0] sm:$0xf0] }
 0x1f9   : > { %2958 = vmatpush.bf16.msra.mxu1 %v4427_v56  ;;  %2971 = vmatpush.bf16.msra.mxu2 %v4555_v62  ;;  %v6486_v56 = vpack.c.bf16 %v1298_v46, %v1298_v46  ;;  %v4747_v62 = vor.u32 %v5830_v45, %v4744_v35  ;;  %v5906_v34 = vld [vmem:[#allocation5 + $0x5c4] sm:$0xf]  ;;  %v5048_v35 = vld [vmem:[#allocation5 + $0x5d0] sm:$0xf0]  ;;  %v4923_v52 = vor.u32 %v5874_v43, %v4920_v44 }
 0x1fa   : > { %2984 = vmatpush.bf16.msra.mxu3 %v4683_v4  ;;  %2997 = vmatpush.bf16.msrb.mxu0 %v4811_v0  ;;  %v5794_v4 = vld [vmem:[#allocation5 + $0x244] sm:$0xf]  ;;  %v4600_v0 = vld [vmem:[#allocation5 + $0x250] sm:$0xf0] }
 0x1fb   : > { %v5304_v55 = vld [vmem:[#allocation5 + $0x7d0] sm:$0xf0]  ;;  %v5870_v1 = vld [vmem:[#allocation5 + $0x4a4] sm:$0xf] }
 0x1fc   : > { %v4904_v2 = vld [vmem:[#allocation5 + $0x4b0] sm:$0xf0]  ;;  %v5966_v49 = vld [vmem:[#allocation5 + $0x7a4] sm:$0xf] }
 0x1fd   : > { %2959 = vmatpush.bf16.msra.mxu1 %v4411_v10  ;;  %2972 = vmatpush.bf16.msra.mxu2 %v4539_v11  ;;  %v4603_v10 = vor.u32 %v5794_v4, %v4600_v0  ;;  %v4731_v11 = vor.u32 %v5826_v5, %v4728_v6  ;;  %v5902_v5 = vld [vmem:[#allocation5 + $0x5a4] sm:$0xf]  ;;  %v5032_v6 = vld [vmem:[#allocation5 + $0x5b0] sm:$0xf0] }
 0x1fe   : > { %2985 = vmatpush.bf16.msra.mxu3 %v4667_v57  ;;  %2998 = vmatpush.bf16.msrb.mxu0 %v4795_v14  ;;  %v5790_v57 = vld [vmem:[#allocation5 + $0x224] sm:$0xf]  ;;  %v4584_v14 = vld [vmem:[#allocation5 + $0x230] sm:$0xf0] }
 0x1ff   : > { %v4587_v22 = vor.u32 %v5790_v57, %v4584_v14  ;;  %v5288_v9 = vld [vmem:[#allocation5 + $0x7b0] sm:$0xf0]  ;;  %v5866_v12 = vld [vmem:[#allocation5 + $0x484] sm:$0xf] }
 0x200   : > { %v4888_v13 = vld [vmem:[#allocation5 + $0x490] sm:$0xf0]  ;;  %v5291_v14 = vor.u32 %v5966_v49, %v5288_v9  ;;  %v5898_v16 = vld [vmem:[#allocation5 + $0x584] sm:$0xf] }
 0x201   : > { %2960 = vmatpush.bf16.msra.mxu1 %v4395_v20  ;;  %2973 = vmatpush.bf16.msra.mxu2 %v4523_v21  ;;  %v5754_v20 = vld [vmem:[#allocation5 + $0x104] sm:$0xf]  ;;  %v4440_v21 = vld [vmem:[#allocation5 + $0x110] sm:$0xf0] }
 0x202   : > { %2986 = vmatpush.bf16.msra.mxu3 %v4651_v24  ;;  %2999 = vmatpush.bf16.msrb.mxu0 %v4779_v25  ;;  %v5786_v24 = vld [vmem:[#allocation5 + $0x204] sm:$0xf]  ;;  %v4568_v25 = vld [vmem:[#allocation5 + $0x210] sm:$0xf0]  ;;  %v4443_v33 = vor.u32 %v5754_v20, %v4440_v21  ;;  %v4891_v20 = vor.u32 %v5866_v12, %v4888_v13 }
 0x203   : > { %v4571_v39 = vor.u32 %v5786_v24, %v4568_v25  ;;  %v5016_v17 = vld [vmem:[#allocation5 + $0x590] sm:$0xf0]  ;;  %v5930_v18 = vld [vmem:[#allocation5 + $0x684] sm:$0xf] }
 0x204   : > { %v5272_v19 = vld [vmem:[#allocation5 + $0x790] sm:$0xf0]  ;;  %v5019_v21 = vor.u32 %v5898_v16, %v5016_v17  ;;  %v5894_v26 = vld [vmem:[#allocation5 + $0x564] sm:$0xf]  ;;  %v4558_v16 = vld [vmem:[#allocation5 + $0x1e8] sm:$0xf] }
 0x205   : > { %2961 = vmatpush.bf16.msra.mxu1 %v4379_v36  ;;  %2974 = vmatpush.bf16.msra.mxu2 %v4507_v37  ;;  %v5192_v36 = vld [vmem:[#allocation5 + $0x6f0] sm:$0xf0]  ;;  %v5974_v37 = vld [vmem:[#allocation5 + $0x7e4] sm:$0xf]  ;;  %v5785_v17 = vld [vmem:[#allocation5 + $0x1f4] sm:$0xf0] }
 0x206   : > { %2987 = vmatpush.bf16.msra.mxu3 %v4635_v41  ;;  %3000 = vmatpush.bf16.msrb.mxu0 %v4763_v42  ;;  %v4939_v41 = vor.u32 %v5878_v61, %v4936_v28  ;;  %v5067_v42 = vor.u32 %v5910_v29, %v5064_v30  ;;  %v5195_v45 = vor.u32 %v5942_v31, %v5192_v36  ;;  %v5000_v27 = vld [vmem:[#allocation5 + $0x570] sm:$0xf0]  ;;  %v5926_v61 = vld [vmem:[#allocation5 + $0x664] sm:$0xf] }
 0x207   : > { %2914 = vmatmul.bf16.vlgmr.msrb.gmra.mxu1 %v6482_v50  ;;  %2927 = vmatmul.bf16.vlgmr.msrb.gmra.mxu2 %v6484_v51  ;;  %v5323_v46 = vor.u32 %v5974_v37, %v5320_v38  ;;  %v5128_v28 = vld [vmem:[#allocation5 + $0x670] sm:$0xf0]  ;;  %v5958_v29 = vld [vmem:[#allocation5 + $0x764] sm:$0xf] }
 0x208   : > { %2940 = vmatmul.bf16.vlgmr.msrb.gmra.mxu3 %v6486_v56  ;;  %2953 = vmatmul.bf16.vlgmr.msra.gmra.mxu0 %v6488_v60  ;;  %v5256_v30 = vld [vmem:[#allocation5 + $0x770] sm:$0xf0]  ;;  %v5131_v37 = vor.u32 %v5926_v61, %v5128_v28  ;;  %v5954_v43 = vld [vmem:[#allocation5 + $0x744] sm:$0xf] }
 0x209   : > { %2962 = vmatpush.bf16.msra.mxu1 %v4363_v48  ;;  %2975 = vmatpush.bf16.msra.mxu2 %v4491_v47  ;;  %v5938_v48 = vld [vmem:[#allocation5 + $0x6c4] sm:$0xf]  ;;  %v5176_v47 = vld [vmem:[#allocation5 + $0x6d0] sm:$0xf0]  ;;  %v5259_v38 = vor.u32 %v5958_v29, %v5256_v30  ;;  %v4542_v29 = vld [vmem:[#allocation5 + $0x1c8] sm:$0xf] }
 0x20a   : > { %2988 = vmatpush.bf16.msra.mxu3 %v4619_v54  ;;  %3001 = vmatpush.bf16.msrb.mxu0 %v4747_v62  ;;  %v5970_v54 = vld [vmem:[#allocation5 + $0x7c4] sm:$0xf]  ;;  %v5051_v62 = vor.u32 %v5906_v34, %v5048_v35  ;;  %v5179_v4 = vor.u32 %v5938_v48, %v5176_v47  ;;  %v4856_v36 = vld [vmem:[#allocation5 + $0x450] sm:$0xf0]  ;;  %v5781_v30 = vld [vmem:[#allocation5 + $0x1d4] sm:$0xf0] }
 0x20b   : > { %v5307_v0 = vor.u32 %v5970_v54, %v5304_v55  ;;  %v5240_v44 = vld [vmem:[#allocation5 + $0x750] sm:$0xf0]  ;;  %v5854_v34 = vld [vmem:[#allocation5 + $0x424] sm:$0xf] }
 0x20c   : > { %v4840_v35 = vld [vmem:[#allocation5 + $0x430] sm:$0xf0]  ;;  %v5243_v47 = vor.u32 %v5954_v43, %v5240_v44  ;;  %v5886_v54 = vld [vmem:[#allocation5 + $0x524] sm:$0xf]  ;;  %v4526_v43 = vld [vmem:[#allocation5 + $0x1a8] sm:$0xf] }
 0x20d   : > { %2963 = vmatpush.bf16.msra.mxu1 %v4347_v7  ;;  %2976 = vmatpush.bf16.msra.mxu2 %v4475_v8  ;;  %v5934_v7 = vld [vmem:[#allocation5 + $0x6a4] sm:$0xf]  ;;  %v5160_v8 = vld [vmem:[#allocation5 + $0x6b0] sm:$0xf0]  ;;  %v5777_v44 = vld [vmem:[#allocation5 + $0x1b4] sm:$0xf0] }
 0x20e   : > { %2989 = vmatpush.bf16.msra.mxu3 %v4603_v10  ;;  %3002 = vmatpush.bf16.msrb.mxu0 %v4731_v11  ;;  %v4907_v10 = vor.u32 %v5870_v1, %v4904_v2  ;;  %v5035_v11 = vor.u32 %v5902_v5, %v5032_v6  ;;  %v5163_v57 = vor.u32 %v5934_v7, %v5160_v8  ;;  %v4968_v55 = vld [vmem:[#allocation5 + $0x530] sm:$0xf0]  ;;  %v5950_v1 = vld [vmem:[#allocation5 + $0x724] sm:$0xf] }
 0x20f   : > { %v5224_v2 = vld [vmem:[#allocation5 + $0x730] sm:$0xf0]  ;;  %v4971_v5 = vor.u32 %v5886_v54, %v4968_v55  ;;  %v5882_v7 = vld [vmem:[#allocation5 + $0x504] sm:$0xf]  ;;  %v4382_v54 = vld [vmem:[#allocation5 + $0x88] sm:$0xf] }
 0x210   : > { %v4824_v6 = vld [vmem:[#allocation5 + $0x410] sm:$0xf0]  ;;  %v5227_v9 = vor.u32 %v5950_v1, %v5224_v2  ;;  %v5946_v12 = vld [vmem:[#allocation5 + $0x704] sm:$0xf]  ;;  %v5741_v55 = vld [vmem:[#allocation5 + $0x94] sm:$0xf0] }
 0x211   : > { %2964 = vmatpush.bf16.msra.mxu1 %v4331_v63  ;;  %2977 = vmatpush.bf16.msra.mxu2 %v4459_v15  ;;  %v5144_v63 = vld [vmem:[#allocation5 + $0x690] sm:$0xf0]  ;;  %v5962_v15 = vld [vmem:[#allocation5 + $0x784] sm:$0xf]  ;;  %v4510_v1 = vld [vmem:[#allocation5 + $0x188] sm:$0xf] }
 0x212   : > { %2990 = vmatpush.bf16.msra.mxu3 %v4587_v22  ;;  %3003 = vmatpush.bf16.msrb.mxu0 %v4715_v23  ;;  %v5862_v22 = vld [vmem:[#allocation5 + $0x464] sm:$0xf]  ;;  %v4872_v23 = vld [vmem:[#allocation5 + $0x470] sm:$0xf0]  ;;  %v5147_v24 = vor.u32 %v5930_v18, %v5144_v63  ;;  %v5275_v25 = vor.u32 %v5962_v15, %v5272_v19  ;;  %v4686_v18 = vld [vmem:[#allocation5 + $0x2e8] sm:$0xf] }
 0x213   : > { %v4875_v31 = vor.u32 %v5862_v22, %v4872_v23  ;;  %v4952_v8 = vld [vmem:[#allocation5 + $0x510] sm:$0xf0]  ;;  %v5817_v19 = vld [vmem:[#allocation5 + $0x2f4] sm:$0xf0] }
 0x214   : > { %v5208_v13 = vld [vmem:[#allocation5 + $0x710] sm:$0xf0]  ;;  %v4955_v15 = vor.u32 %v5882_v7, %v4952_v8  ;;  %v4687_v61 = vor.u32 %v5817_v19, %v4686_v18  ;;  %v5773_v2 = vld [vmem:[#allocation5 + $0x194] sm:$0xf0]  ;;  %v4383_v7 = vor.u32 %v5741_v55, %v4382_v54  ;;  %v4702_v54 = vld [vmem:[#allocation5 + $0x308] sm:$0xf] }
 0x215   : > { %2965 = vmatpush.bf16.msra.mxu1 %v4315_v32  ;;  %2978 = vmatpush.bf16.msra.mxu2 %v4443_v33  ;;  %v5003_v32 = vor.u32 %v5894_v26, %v5000_v27  ;;  %v5858_v33 = vld [vmem:[#allocation5 + $0x444] sm:$0xf]  ;;  %v5211_v23 = vor.u32 %v5946_v12, %v5208_v13  ;;  %v4414_v26 = vld [vmem:[#allocation5 + $0xc8] sm:$0xf]  ;;  %v5749_v27 = vld [vmem:[#allocation5 + $0xd4] sm:$0xf0]  ;;  %v4511_v8 = vor.u32 %v5773_v2, %v4510_v1 }
 0x216   : > { %2991 = vmatpush.bf16.msra.mxu3 %v4571_v39  ;;  %3004 = vmatpush.bf16.msrb.mxu0 %v4699_v40  ;;  %v5890_v39 = vld [vmem:[#allocation5 + $0x544] sm:$0xf]  ;;  %v4984_v40 = vld [vmem:[#allocation5 + $0x550] sm:$0xf0]  ;;  %v4494_v12 = vld [vmem:[#allocation5 + $0x168] sm:$0xf] }
 0x217   : > { %v5769_v13 = vld [vmem:[#allocation5 + $0x174] sm:$0xf0]  ;;  %v5070_v1 = vld [vmem:[#allocation5 + $0x5e8] sm:$0xf] }
 0x218   : > { %2966 = vmatmul.bf16.vlgmr.msra.gmra.mxu1 %v6470_v58  ;;  %2979 = vmatmul.bf16.vlgmr.msra.gmra.mxu2 %v6472_v53  ;;  %v5733_v19 = vld [vmem:[#allocation5 + $0x54] sm:$0xf0] }
 0x219   : > { %3010 = vmatpush.bf16.msrb.mxu1 %v4939_v41  ;;  %3023 = vmatpush.bf16.msrb.mxu2 %v5067_v42  ;;  %v5922_v41 = vld [vmem:[#allocation5 + $0x644] sm:$0xf]  ;;  %v5112_v42 = vld [vmem:[#allocation5 + $0x650] sm:$0xf0]  ;;  %v5821_v55 = vld [vmem:[#allocation5 + $0x314] sm:$0xf0] }
 0x21a   : > { %3036 = vmatpush.bf16.msrb.mxu3 %v5195_v45  ;;  %3049 = vmatpush.bf16.msra.mxu0 %v5323_v46  ;;  %v4859_v45 = vor.u32 %v5858_v33, %v4856_v36  ;;  %v4987_v46 = vor.u32 %v5890_v39, %v4984_v40  ;;  %v5115_v48 = vor.u32 %v5922_v41, %v5112_v42  ;;  %v4798_v33 = vld [vmem:[#allocation5 + $0x3c8] sm:$0xf]  ;;  %v5845_v36 = vld [vmem:[#allocation5 + $0x3d4] sm:$0xf0] }
 0x21b   : > { %2992 = vmatmul.bf16.vlgmr.msra.gmra.mxu3 %v6474_v59  ;;  %3005 = vmatmul.bf16.vlgmr.msrb.gmra.mxu0 %v6476_v3  ;;  %v4398_v39 = vld [vmem:[#allocation5 + $0xa8] sm:$0xf]  ;;  %v5745_v40 = vld [vmem:[#allocation5 + $0xb4] sm:$0xf0]  ;;  %v4799_v42 = vor.u32 %v5845_v36, %v4798_v33 }
 0x21c   : > { %v4462_v33 = vld [vmem:[#allocation5 + $0x128] sm:$0xf]  ;;  %v5761_v36 = vld [vmem:[#allocation5 + $0x134] sm:$0xf0] }
 0x21d   : > { %3011 = vmatpush.bf16.msrb.mxu1 %v4923_v52  ;;  %3024 = vmatpush.bf16.msrb.mxu2 %v5051_v62  ;;  %v5918_v52 = vld [vmem:[#allocation5 + $0x624] sm:$0xf]  ;;  %v5096_v62 = vld [vmem:[#allocation5 + $0x630] sm:$0xf0]  ;;  %v5913_v2 = vld [vmem:[#allocation5 + $0x5f4] sm:$0xf0] }
 0x21e   : > { %3037 = vmatpush.bf16.msrb.mxu3 %v5179_v4  ;;  %3050 = vmatpush.bf16.msra.mxu0 %v5307_v0  ;;  %v5850_v4 = vld [vmem:[#allocation5 + $0x404] sm:$0xf]  ;;  %v4843_v0 = vor.u32 %v5854_v34, %v4840_v35  ;;  %v5099_v49 = vor.u32 %v5918_v52, %v5096_v62  ;;  %v4782_v34 = vld [vmem:[#allocation5 + $0x3a8] sm:$0xf]  ;;  %v5841_v35 = vld [vmem:[#allocation5 + $0x3b4] sm:$0xf0] }
 0x21f   : > { %v4827_v63 = vor.u32 %v5850_v4, %v4824_v6  ;;  %v4783_v62 = vor.u32 %v5841_v35, %v4782_v34  ;;  %v4638_v4 = vld [vmem:[#allocation5 + $0x288] sm:$0xf]  ;;  %v5837_v6 = vld [vmem:[#allocation5 + $0x394] sm:$0xf0] }
 0x221   : > { %3012 = vmatpush.bf16.msrb.mxu1 %v4907_v10  ;;  %3025 = vmatpush.bf16.msrb.mxu2 %v5035_v11  ;;  %v5914_v10 = vld [vmem:[#allocation5 + $0x604] sm:$0xf]  ;;  %v5080_v11 = vld [vmem:[#allocation5 + $0x610] sm:$0xf0] }
 0x222   : > { %3038 = vmatpush.bf16.msrb.mxu3 %v5163_v57  ;;  %3051 = vmatpush.bf16.msra.mxu0 %v5291_v14  ;;  %v4430_v57 = vld [vmem:[#allocation5 + $0xe8] sm:$0xf]  ;;  %v5753_v14 = vld [vmem:[#allocation5 + $0xf4] sm:$0xf0]  ;;  %v5083_v22 = vor.u32 %v5914_v10, %v5080_v11 }
 0x225   : > { %3013 = vmatpush.bf16.msrb.mxu1 %v4891_v20  ;;  %3026 = vmatpush.bf16.msrb.mxu2 %v5019_v21  ;;  %v4814_v20 = vld [vmem:[#allocation5 + $0x3e8] sm:$0xf]  ;;  %v5849_v21 = vld [vmem:[#allocation5 + $0x3f4] sm:$0xf0] }
 0x226   : > { %3039 = vmatpush.bf16.msrb.mxu3 %v5147_v24  ;;  %3052 = vmatpush.bf16.msra.mxu0 %v5275_v25  ;;  %v4431_v24 = vor.u32 %v5753_v14, %v4430_v57  ;;  %v4559_v25 = vor.u32 %v5785_v17, %v4558_v16  ;;  %v4815_v28 = vor.u32 %v5849_v21, %v4814_v20  ;;  %v4622_v57 = vld [vmem:[#allocation5 + $0x268] sm:$0xf]  ;;  %v5801_v14 = vld [vmem:[#allocation5 + $0x274] sm:$0xf0] }
 0x227   : > { %v4750_v16 = vld [vmem:[#allocation5 + $0x368] sm:$0xf]  ;;  %v5833_v17 = vld [vmem:[#allocation5 + $0x374] sm:$0xf0]  ;;  %v4623_v20 = vor.u32 %v5801_v14, %v4622_v57 }
 0x228   : > { %v4751_v21 = vor.u32 %v5833_v17, %v4750_v16  ;;  %v5054_v16 = vld [vmem:[#allocation5 + $0x5c8] sm:$0xf]  ;;  %v5909_v17 = vld [vmem:[#allocation5 + $0x5d4] sm:$0xf0] }
 0x229   : > { %3014 = vmatpush.bf16.msrb.mxu1 %v4875_v31  ;;  %3027 = vmatpush.bf16.msrb.mxu2 %v5003_v32  ;;  %v4670_v31 = vld [vmem:[#allocation5 + $0x2c8] sm:$0xf]  ;;  %v5813_v32 = vld [vmem:[#allocation5 + $0x2d4] sm:$0xf0] }
 0x22a   : > { %3040 = vmatpush.bf16.msrb.mxu3 %v5131_v37  ;;  %3053 = vmatpush.bf16.msra.mxu0 %v5259_v38  ;;  %v4415_v37 = vor.u32 %v5749_v27, %v4414_v26  ;;  %v4543_v38 = vor.u32 %v5781_v30, %v4542_v29  ;;  %v4671_v41 = vor.u32 %v5813_v32, %v4670_v31  ;;  %v4734_v26 = vld [vmem:[#allocation5 + $0x348] sm:$0xf]  ;;  %v5829_v27 = vld [vmem:[#allocation5 + $0x354] sm:$0xf0] }
 0x22b   : > { %v4334_v29 = vld [vmem:[#allocation5 + $0x28] sm:$0xf]  ;;  %v5729_v30 = vld [vmem:[#allocation5 + $0x34] sm:$0xf0]  ;;  %v4735_v32 = vor.u32 %v5829_v27, %v4734_v26 }
 0x22c   : > { %v5038_v26 = vld [vmem:[#allocation5 + $0x5a8] sm:$0xf]  ;;  %v5905_v27 = vld [vmem:[#allocation5 + $0x5b4] sm:$0xf0] }
 0x22d   : > { %3015 = vmatpush.bf16.msrb.mxu1 %v4859_v45  ;;  %3028 = vmatpush.bf16.msrb.mxu2 %v4987_v46  ;;  %v4654_v45 = vld [vmem:[#allocation5 + $0x2a8] sm:$0xf]  ;;  %v5809_v46 = vld [vmem:[#allocation5 + $0x2b4] sm:$0xf0] }
 0x22e   : > { %3041 = vmatpush.bf16.msrb.mxu3 %v5115_v48  ;;  %3054 = vmatpush.bf16.msra.mxu0 %v5243_v47  ;;  %v4399_v48 = vor.u32 %v5745_v40, %v4398_v39  ;;  %v4527_v47 = vor.u32 %v5777_v44, %v4526_v43  ;;  %v4655_v52 = vor.u32 %v5809_v46, %v4654_v45  ;;  %v4718_v39 = vld [vmem:[#allocation5 + $0x328] sm:$0xf]  ;;  %v5825_v40 = vld [vmem:[#allocation5 + $0x334] sm:$0xf0] }
 0x22f   : > { %v4463_v43 = vor.u32 %v5761_v36, %v4462_v33  ;;  %v5725_v44 = vld [vmem:[#allocation5 + $0x14] sm:$0xf0]  ;;  %v4446_v45 = vld [vmem:[#allocation5 + $0x108] sm:$0xf]  ;;  %v4719_v35 = vor.u32 %v5825_v40, %v4718_v39 }
 0x230   : > { %v5757_v46 = vld [vmem:[#allocation5 + $0x114] sm:$0xf0]  ;;  %v4894_v33 = vld [vmem:[#allocation5 + $0x488] sm:$0xf] }
 0x231   : > { %3016 = vmatpush.bf16.msrb.mxu1 %v4843_v0  ;;  %3029 = vmatpush.bf16.msrb.mxu2 %v4971_v5  ;;  %v5805_v0 = vld [vmem:[#allocation5 + $0x294] sm:$0xf0]  ;;  %v4766_v5 = vld [vmem:[#allocation5 + $0x388] sm:$0xf] }
 0x232   : > { %3042 = vmatpush.bf16.msrb.mxu3 %v5099_v49  ;;  %3055 = vmatpush.bf16.msra.mxu0 %v5227_v9  ;;  %v4366_v49 = vld [vmem:[#allocation5 + $0x68] sm:$0xf]  ;;  %v5737_v9 = vld [vmem:[#allocation5 + $0x74] sm:$0xf0]  ;;  %v4639_v10 = vor.u32 %v5805_v0, %v4638_v4  ;;  %v4767_v11 = vor.u32 %v5837_v6, %v4766_v5  ;;  %v4447_v5 = vor.u32 %v5757_v46, %v4446_v45 }
 0x233   : > { %v4367_v18 = vor.u32 %v5737_v9, %v4366_v49  ;;  %v5198_v4 = vld [vmem:[#allocation5 + $0x6e8] sm:$0xf]  ;;  %v5945_v6 = vld [vmem:[#allocation5 + $0x6f4] sm:$0xf0]  ;;  %v4703_v9 = vor.u32 %v5821_v55, %v4702_v54 }
 0x234   : > { %v5199_v57 = vor.u32 %v5945_v6, %v5198_v4  ;;  %v5869_v36 = vld [vmem:[#allocation5 + $0x494] sm:$0xf0]  ;;  %v5022_v39 = vld [vmem:[#allocation5 + $0x588] sm:$0xf] }
 0x235   : > { %3017 = vmatpush.bf16.msrb.mxu1 %v4827_v63  ;;  %3030 = vmatpush.bf16.msrb.mxu2 %v4955_v15  ;;  %v4495_v63 = vor.u32 %v5769_v13, %v4494_v12  ;;  %v4350_v15 = vld [vmem:[#allocation5 + $0x48] sm:$0xf]  ;;  %v5877_v13 = vld [vmem:[#allocation5 + $0x4d4] sm:$0xf0]  ;;  %v4895_v45 = vor.u32 %v5869_v36, %v4894_v33 }
 0x236   : > { %3043 = vmatpush.bf16.msrb.mxu3 %v5083_v22  ;;  %3056 = vmatpush.bf16.msra.mxu0 %v5211_v23  ;;  %v4478_v22 = vld [vmem:[#allocation5 + $0x148] sm:$0xf]  ;;  %v5765_v23 = vld [vmem:[#allocation5 + $0x154] sm:$0xf0] }
 0x237   : > { %v4926_v12 = vld [vmem:[#allocation5 + $0x4c8] sm:$0xf]  ;;  %v5901_v40 = vld [vmem:[#allocation5 + $0x594] sm:$0xf0] }
 0x238   : > { %3018 = vmatmul.bf16.vlgmr.msrb.gmra.mxu1 %v6482_v50  ;;  %3031 = vmatmul.bf16.vlgmr.msrb.gmra.mxu2 %v6484_v51  ;;  %v5023_v46 = vor.u32 %v5901_v40, %v5022_v39  ;;  %v5006_v54 = vld [vmem:[#allocation5 + $0x568] sm:$0xf]  ;;  %v5897_v55 = vld [vmem:[#allocation5 + $0x574] sm:$0xf0]  ;;  %v5783_v39 = vld [vmem:[#allocation5 + $0x1ec] sm:$0xf] }
 0x239   : > { %3062 = vmatpush.bf16.msra.mxu1 %v4431_v24  ;;  %3075 = vmatpush.bf16.msra.mxu2 %v4559_v25  ;;  %v4606_v24 = vld [vmem:[#allocation5 + $0x248] sm:$0xf]  ;;  %v5797_v25 = vld [vmem:[#allocation5 + $0x254] sm:$0xf0]  ;;  %v4560_v40 = vld [vmem:[#allocation5 + $0x1f8] sm:$0xf0] }
 0x23a   : > { %3088 = vmatpush.bf16.msra.mxu3 %v4687_v61  ;;  %3101 = vmatpush.bf16.msrb.mxu0 %v4815_v28  ;;  %v4351_v61 = vor.u32 %v5733_v19, %v4350_v15  ;;  %v4479_v28 = vor.u32 %v5765_v23, %v4478_v22  ;;  %v4607_v31 = vor.u32 %v5797_v25, %v4606_v24  ;;  %v5310_v15 = vld [vmem:[#allocation5 + $0x7c8] sm:$0xf]  ;;  %v5973_v19 = vld [vmem:[#allocation5 + $0x7d4] sm:$0xf0] }
 0x23b   : > { %3044 = vmatmul.bf16.vlgmr.msrb.gmra.mxu3 %v6486_v56  ;;  %3057 = vmatmul.bf16.vlgmr.msra.gmra.mxu0 %v6488_v60  ;;  %v4910_v22 = vld [vmem:[#allocation5 + $0x4a8] sm:$0xf]  ;;  %v5873_v23 = vld [vmem:[#allocation5 + $0x4b4] sm:$0xf0]  ;;  %v5311_v25 = vor.u32 %v5973_v19, %v5310_v15 }
 0x23c   : > { %v5861_v6 = vld [vmem:[#allocation5 + $0x454] sm:$0xf0]  ;;  %v4974_v15 = vld [vmem:[#allocation5 + $0x528] sm:$0xf] }
 0x23d   : > { %3063 = vmatpush.bf16.msra.mxu1 %v4415_v37  ;;  %3076 = vmatpush.bf16.msra.mxu2 %v4543_v38  ;;  %v4590_v37 = vld [vmem:[#allocation5 + $0x228] sm:$0xf]  ;;  %v5793_v38 = vld [vmem:[#allocation5 + $0x234] sm:$0xf0] }
 0x23e   : > { %3089 = vmatpush.bf16.msra.mxu3 %v4671_v41  ;;  %3102 = vmatpush.bf16.msrb.mxu0 %v4799_v42  ;;  %v4318_v41 = vld [vmem:[#allocation5 + $0x8] sm:$0xf]  ;;  %v4335_v42 = vor.u32 %v5729_v30, %v4334_v29  ;;  %v4591_v34 = vor.u32 %v5793_v38, %v4590_v37  ;;  %v5969_v30 = vld [vmem:[#allocation5 + $0x7b4] sm:$0xf0] }
 0x23f   : > { %v4319_v0 = vor.u32 %v5725_v44, %v4318_v41  ;;  %v5294_v29 = vld [vmem:[#allocation5 + $0x7a8] sm:$0xf]  ;;  %v5965_v44 = vld [vmem:[#allocation5 + $0x794] sm:$0xf0] }
 0x240   : > { %v5295_v38 = vor.u32 %v5969_v30, %v5294_v29  ;;  %v5150_v41 = vld [vmem:[#allocation5 + $0x688] sm:$0xf]  ;;  %v5889_v19 = vld [vmem:[#allocation5 + $0x534] sm:$0xf0] }
 0x241   : > { %3064 = vmatpush.bf16.msra.mxu1 %v4399_v48  ;;  %3077 = vmatpush.bf16.msra.mxu2 %v4527_v47  ;;  %v4574_v48 = vld [vmem:[#allocation5 + $0x208] sm:$0xf]  ;;  %v5789_v47 = vld [vmem:[#allocation5 + $0x214] sm:$0xf0] }
 0x242   : > { %3090 = vmatpush.bf16.msra.mxu3 %v4655_v52  ;;  %3103 = vmatpush.bf16.msrb.mxu0 %v4783_v62  ;;  %v4942_v52 = vld [vmem:[#allocation5 + $0x4e8] sm:$0xf]  ;;  %v5881_v62 = vld [vmem:[#allocation5 + $0x4f4] sm:$0xf0]  ;;  %v4575_v49 = vor.u32 %v5789_v47, %v4574_v48 }
 0x243   : > { %v5214_v33 = vld [vmem:[#allocation5 + $0x708] sm:$0xf]  ;;  %v5949_v36 = vld [vmem:[#allocation5 + $0x714] sm:$0xf0] }
 0x245   : > { %3065 = vmatpush.bf16.msra.mxu1 %v4383_v7  ;;  %3078 = vmatpush.bf16.msra.mxu2 %v4511_v8  ;;  %v5326_v7 = vld [vmem:[#allocation5 + $0x7e8] sm:$0xf]  ;;  %v5977_v8 = vld [vmem:[#allocation5 + $0x7f4] sm:$0xf0] }
 0x246   : > { %3091 = vmatpush.bf16.msra.mxu3 %v4639_v10  ;;  %3104 = vmatpush.bf16.msrb.mxu0 %v4767_v11  ;;  %v4943_v10 = vor.u32 %v5881_v62, %v4942_v52  ;;  %v5071_v11 = vor.u32 %v5913_v2, %v5070_v1  ;;  %v5327_v14 = vor.u32 %v5977_v8, %v5326_v7  ;;  %v5134_v52 = vld [vmem:[#allocation5 + $0x668] sm:$0xf]  ;;  %v5929_v62 = vld [vmem:[#allocation5 + $0x674] sm:$0xf0] }
 0x247   : > { %v5262_v1 = vld [vmem:[#allocation5 + $0x768] sm:$0xf]  ;;  %v5961_v2 = vld [vmem:[#allocation5 + $0x774] sm:$0xf0]  ;;  %v5135_v7 = vor.u32 %v5929_v62, %v5134_v52 }
 0x248   : > { %v5263_v8 = vor.u32 %v5961_v2, %v5262_v1  ;;  %v5779_v1 = vld [vmem:[#allocation5 + $0x1cc] sm:$0xf]  ;;  %v4544_v2 = vld [vmem:[#allocation5 + $0x1d8] sm:$0xf0] }
 0x249   : > { %3066 = vmatpush.bf16.msra.mxu1 %v4367_v18  ;;  %3079 = vmatpush.bf16.msra.mxu2 %v4495_v63  ;;  %v5182_v18 = vld [vmem:[#allocation5 + $0x6c8] sm:$0xf]  ;;  %v5941_v63 = vld [vmem:[#allocation5 + $0x6d4] sm:$0xf0] }
 0x24a   : > { %3092 = vmatpush.bf16.msra.mxu3 %v4623_v20  ;;  %3105 = vmatpush.bf16.msrb.mxu0 %v4751_v21  ;;  %v4927_v20 = vor.u32 %v5877_v13, %v4926_v12  ;;  %v5055_v21 = vor.u32 %v5909_v17, %v5054_v16  ;;  %v5183_v24 = vor.u32 %v5941_v63, %v5182_v18  ;;  %v5246_v12 = vld [vmem:[#allocation5 + $0x748] sm:$0xf]  ;;  %v5957_v13 = vld [vmem:[#allocation5 + $0x754] sm:$0xf0] }
 0x24b   : > { %v4846_v16 = vld [vmem:[#allocation5 + $0x428] sm:$0xf]  ;;  %v5857_v17 = vld [vmem:[#allocation5 + $0x434] sm:$0xf0]  ;;  %v5247_v63 = vor.u32 %v5957_v13, %v5246_v12  ;;  %v4528_v13 = vld [vmem:[#allocation5 + $0x1b8] sm:$0xf0] }
 0x24d   : > { %3067 = vmatpush.bf16.msra.mxu1 %v4351_v61  ;;  %3080 = vmatpush.bf16.msra.mxu2 %v4479_v28  ;;  %v5166_v61 = vld [vmem:[#allocation5 + $0x6a8] sm:$0xf]  ;;  %v5937_v28 = vld [vmem:[#allocation5 + $0x6b4] sm:$0xf0] }
 0x24e   : > { %3093 = vmatpush.bf16.msra.mxu3 %v4607_v31  ;;  %3106 = vmatpush.bf16.msrb.mxu0 %v4735_v32  ;;  %v4911_v31 = vor.u32 %v5873_v23, %v4910_v22  ;;  %v5039_v32 = vor.u32 %v5905_v27, %v5038_v26  ;;  %v5167_v37 = vor.u32 %v5937_v28, %v5166_v61  ;;  %v5230_v22 = vld [vmem:[#allocation5 + $0x728] sm:$0xf]  ;;  %v5953_v23 = vld [vmem:[#allocation5 + $0x734] sm:$0xf0] }
 0x24f   : > { %v4975_v26 = vor.u32 %v5889_v19, %v4974_v15  ;;  %v5853_v27 = vld [vmem:[#allocation5 + $0x414] sm:$0xf0]  ;;  %v4958_v61 = vld [vmem:[#allocation5 + $0x508] sm:$0xf]  ;;  %v5231_v30 = vor.u32 %v5953_v23, %v5230_v22  ;;  %v5739_v22 = vld [vmem:[#allocation5 + $0x8c] sm:$0xf] }
 0x250   : > { %v5885_v28 = vld [vmem:[#allocation5 + $0x514] sm:$0xf0]  ;;  %v4384_v23 = vld [vmem:[#allocation5 + $0x98] sm:$0xf0] }
 0x251   : > { %3068 = vmatpush.bf16.msra.mxu1 %v4335_v42  ;;  %3081 = vmatpush.bf16.msra.mxu2 %v4463_v43  ;;  %v5933_v42 = vld [vmem:[#allocation5 + $0x694] sm:$0xf0]  ;;  %v5278_v43 = vld [vmem:[#allocation5 + $0x788] sm:$0xf] }
 0x252   : > { %3094 = vmatpush.bf16.msra.mxu3 %v4591_v34  ;;  %3107 = vmatpush.bf16.msrb.mxu0 %v4719_v35  ;;  %v4878_v34 = vld [vmem:[#allocation5 + $0x468] sm:$0xf]  ;;  %v5865_v35 = vld [vmem:[#allocation5 + $0x474] sm:$0xf0]  ;;  %v5151_v48 = vor.u32 %v5933_v42, %v5150_v41  ;;  %v5279_v47 = vor.u32 %v5965_v44, %v5278_v43  ;;  %v5815_v41 = vld [vmem:[#allocation5 + $0x2ec] sm:$0xf]  ;;  %v4959_v43 = vor.u32 %v5885_v28, %v4958_v61 }
 0x253   : > { %v4879_v4 = vor.u32 %v5865_v35, %v4878_v34  ;;  %v4688_v44 = vld [vmem:[#allocation5 + $0x2f8] sm:$0xf0]  ;;  %v5215_v35 = vor.u32 %v5949_v36, %v5214_v33  ;;  %v5803_v61 = vld [vmem:[#allocation5 + $0x28c] sm:$0xf] }
 0x254   : > { %v4691_v52 = vor.u32 %v5815_v41, %v4688_v44  ;;  %v4640_v28 = vld [vmem:[#allocation5 + $0x298] sm:$0xf0]  ;;  %v5735_v36 = vld [vmem:[#allocation5 + $0x6c] sm:$0xf] }
 0x255   : > { %3069 = vmatpush.bf16.msra.mxu1 %v4319_v0  ;;  %3082 = vmatpush.bf16.msra.mxu2 %v4447_v5  ;;  %v5007_v0 = vor.u32 %v5897_v55, %v5006_v54  ;;  %v4862_v5 = vld [vmem:[#allocation5 + $0x448] sm:$0xf]  ;;  %v5747_v54 = vld [vmem:[#allocation5 + $0xcc] sm:$0xf]  ;;  %v4416_v55 = vld [vmem:[#allocation5 + $0xd8] sm:$0xf0] }
 0x256   : > { %3095 = vmatpush.bf16.msra.mxu3 %v4575_v49  ;;  %3108 = vmatpush.bf16.msrb.mxu0 %v4703_v9  ;;  %v4990_v49 = vld [vmem:[#allocation5 + $0x548] sm:$0xf]  ;;  %v5893_v9 = vld [vmem:[#allocation5 + $0x554] sm:$0xf0]  ;;  %v5767_v41 = vld [vmem:[#allocation5 + $0x16c] sm:$0xf] }
 0x258   : > { %3070 = vmatmul.bf16.vlgmr.msra.gmra.mxu1 %v6470_v58  ;;  %3083 = vmatmul.bf16.vlgmr.msra.gmra.mxu2 %v6472_v53 }
 0x259   : > { %3114 = vmatpush.bf16.msrb.mxu1 %v4943_v10  ;;  %3127 = vmatpush.bf16.msrb.mxu2 %v5071_v11  ;;  %v5118_v10 = vld [vmem:[#allocation5 + $0x648] sm:$0xf]  ;;  %v5925_v11 = vld [vmem:[#allocation5 + $0x654] sm:$0xf0] }
 0x25a   : > { %3140 = vmatpush.bf16.msrb.mxu3 %v5199_v57  ;;  %3153 = vmatpush.bf16.msra.mxu0 %v5327_v14  ;;  %v4863_v57 = vor.u32 %v5861_v6, %v4862_v5  ;;  %v4991_v14 = vor.u32 %v5893_v9, %v4990_v49  ;;  %v5119_v18 = vor.u32 %v5925_v11, %v5118_v10  ;;  %v5843_v5 = vld [vmem:[#allocation5 + $0x3cc] sm:$0xf]  ;;  %v4800_v6 = vld [vmem:[#allocation5 + $0x3d8] sm:$0xf0] }
 0x25b   : > { %3096 = vmatmul.bf16.vlgmr.msra.gmra.mxu3 %v6474_v59  ;;  %3109 = vmatmul.bf16.vlgmr.msrb.gmra.mxu0 %v6476_v3  ;;  %v5743_v49 = vld [vmem:[#allocation5 + $0xac] sm:$0xf]  ;;  %v4400_v9 = vld [vmem:[#allocation5 + $0xb8] sm:$0xf0]  ;;  %v4803_v12 = vor.u32 %v5843_v5, %v4800_v6 }
 0x25c   : > { %v5775_v10 = vld [vmem:[#allocation5 + $0x1ac] sm:$0xf]  ;;  %v4403_v15 = vor.u32 %v5743_v49, %v4400_v9  ;;  %v4480_v5 = vld [vmem:[#allocation5 + $0x158] sm:$0xf0] }
 0x25d   : > { %3115 = vmatpush.bf16.msrb.mxu1 %v4927_v20  ;;  %3128 = vmatpush.bf16.msrb.mxu2 %v5055_v21  ;;  %v5102_v20 = vld [vmem:[#allocation5 + $0x628] sm:$0xf]  ;;  %v5921_v21 = vld [vmem:[#allocation5 + $0x634] sm:$0xf0]  ;;  %v4531_v19 = vor.u32 %v5775_v10, %v4528_v13  ;;  %v5795_v6 = vld [vmem:[#allocation5 + $0x24c] sm:$0xf] }
 0x25e   : > { %3141 = vmatpush.bf16.msrb.mxu3 %v5183_v24  ;;  %3154 = vmatpush.bf16.msra.mxu0 %v5311_v25  ;;  %v4830_v24 = vld [vmem:[#allocation5 + $0x408] sm:$0xf]  ;;  %v4847_v25 = vor.u32 %v5857_v17, %v4846_v16  ;;  %v5103_v29 = vor.u32 %v5921_v21, %v5102_v20  ;;  %v4656_v16 = vld [vmem:[#allocation5 + $0x2b8] sm:$0xf0]  ;;  %v5839_v17 = vld [vmem:[#allocation5 + $0x3ac] sm:$0xf] }
 0x25f   : > { %v4831_v42 = vor.u32 %v5853_v27, %v4830_v24  ;;  %v4512_v27 = vld [vmem:[#allocation5 + $0x198] sm:$0xf0] }
 0x260   : > { %v4736_v49 = vld [vmem:[#allocation5 + $0x358] sm:$0xf0] }
 0x261   : > { %3116 = vmatpush.bf16.msrb.mxu1 %v4911_v31  ;;  %3129 = vmatpush.bf16.msrb.mxu2 %v5039_v32  ;;  %v5086_v31 = vld [vmem:[#allocation5 + $0x608] sm:$0xf]  ;;  %v5917_v32 = vld [vmem:[#allocation5 + $0x614] sm:$0xf0]  ;;  %v4336_v13 = vld [vmem:[#allocation5 + $0x38] sm:$0xf0] }
 0x262   : > { %3142 = vmatpush.bf16.msrb.mxu3 %v5167_v37  ;;  %3155 = vmatpush.bf16.msra.mxu0 %v5295_v38  ;;  %v5751_v37 = vld [vmem:[#allocation5 + $0xec] sm:$0xf]  ;;  %v4432_v38 = vld [vmem:[#allocation5 + $0xf8] sm:$0xf0]  ;;  %v5087_v34 = vor.u32 %v5917_v32, %v5086_v31  ;;  %v4387_v32 = vor.u32 %v5739_v22, %v4384_v23 }
 0x263   : > { %v5823_v22 = vld [vmem:[#allocation5 + $0x32c] sm:$0xf]  ;;  %v4720_v23 = vld [vmem:[#allocation5 + $0x338] sm:$0xf0] }
 0x265   : > { %3117 = vmatpush.bf16.msrb.mxu1 %v4895_v45  ;;  %3130 = vmatpush.bf16.msrb.mxu2 %v5023_v46  ;;  %v5847_v45 = vld [vmem:[#allocation5 + $0x3ec] sm:$0xf]  ;;  %v4816_v46 = vld [vmem:[#allocation5 + $0x3f8] sm:$0xf0] }
 0x266   : > { %3143 = vmatpush.bf16.msrb.mxu3 %v5151_v48  ;;  %3156 = vmatpush.bf16.msra.mxu0 %v5279_v47  ;;  %v4435_v48 = vor.u32 %v5751_v37, %v4432_v38  ;;  %v4563_v47 = vor.u32 %v5783_v39, %v4560_v40  ;;  %v4819_v62 = vor.u32 %v5847_v45, %v4816_v46  ;;  %v4368_v37 = vld [vmem:[#allocation5 + $0x78] sm:$0xf0] }
 0x267   : > { %v4643_v38 = vor.u32 %v5803_v61, %v4640_v28  ;;  %v4624_v46 = vld [vmem:[#allocation5 + $0x278] sm:$0xf0]  ;;  %v5755_v28 = vld [vmem:[#allocation5 + $0x10c] sm:$0xf] }
 0x268   : > { %v4320_v61 = vld [vmem:[#allocation5 + $0x18] sm:$0xf0] }
 0x269   : > { %3118 = vmatpush.bf16.msrb.mxu1 %v4879_v4  ;;  %3131 = vmatpush.bf16.msrb.mxu2 %v5007_v0  ;;  %v5811_v4 = vld [vmem:[#allocation5 + $0x2cc] sm:$0xf]  ;;  %v4672_v0 = vld [vmem:[#allocation5 + $0x2d8] sm:$0xf0] }
 0x26a   : > { %3144 = vmatpush.bf16.msrb.mxu3 %v5135_v7  ;;  %3157 = vmatpush.bf16.msra.mxu0 %v5263_v8  ;;  %v4419_v7 = vor.u32 %v5747_v54, %v4416_v55  ;;  %v4547_v8 = vor.u32 %v5779_v1, %v4544_v2  ;;  %v4675_v11 = vor.u32 %v5811_v4, %v4672_v0  ;;  %v4352_v1 = vld [vmem:[#allocation5 + $0x58] sm:$0xf0]  ;;  %v5763_v0 = vld [vmem:[#allocation5 + $0x14c] sm:$0xf] }
 0x26b   : > { %v4371_v54 = vor.u32 %v5735_v36, %v4368_v37  ;;  %v5819_v36 = vld [vmem:[#allocation5 + $0x30c] sm:$0xf]  ;;  %v4704_v37 = vld [vmem:[#allocation5 + $0x318] sm:$0xf0] }
 0x26d   : > { %3119 = vmatpush.bf16.msrb.mxu1 %v4863_v57  ;;  %3132 = vmatpush.bf16.msrb.mxu2 %v4991_v14  ;;  %v5807_v57 = vld [vmem:[#allocation5 + $0x2ac] sm:$0xf]  ;;  %v6509_v14 = vld [vmem:[%s6634_s8] sm:$0xf] }
 0x26e   : > { %3145 = vmatpush.bf16.msrb.mxu3 %v5119_v18  ;;  %3158 = vmatpush.bf16.msra.mxu0 %v5247_v63  ;;  %v4784_v18 = vld [vmem:[#allocation5 + $0x3b8] sm:$0xf0]  ;;  %v1566_v20 = vperm.slane %v6509_v14, 0  ;;  %v4659_v24 = vor.u32 %v5807_v57, %v4656_v16 }
 0x271   : > { %3120 = vmatpush.bf16.msrb.mxu1 %v4847_v25  ;;  %3133 = vmatpush.bf16.msrb.mxu2 %v4975_v26  ;;  %v4787_v25 = vor.u32 %v5839_v17, %v4784_v18  ;;  %v5771_v26 = vld [vmem:[#allocation5 + $0x18c] sm:$0xf] }
 0x272   : > { %3146 = vmatpush.bf16.msrb.mxu3 %v5103_v29  ;;  %3159 = vmatpush.bf16.msra.mxu0 %v5231_v30  ;;  %v5835_v29 = vld [vmem:[#allocation5 + $0x38c] sm:$0xf]  ;;  %v4768_v30 = vld [vmem:[#allocation5 + $0x398] sm:$0xf0]  ;;  %v4515_v33 = vor.u32 %v5771_v26, %v4512_v27 }
 0x273   : > { %v4771_v39 = vor.u32 %v5835_v29, %v4768_v30  ;;  %v5759_v18 = vld [vmem:[#allocation5 + $0x12c] sm:$0xf]  ;;  %v4448_v29 = vld [vmem:[#allocation5 + $0x118] sm:$0xf0] }
 0x274   : > { %v2863_v63 = vpop.f32.mrf.mxu1 }
 0x275   : > { %3121 = vmatpush.bf16.msrb.mxu1 %v4831_v42  ;;  %3134 = vmatpush.bf16.msrb.mxu2 %v4959_v43  ;;  %v2902_v21 = vpop.f32.mrf.mxu0  ;;  %v2864_v31 = vadd.f32 %v2863_v63, %v1566_v20  ;;  %v4496_v42 = vld [vmem:[#allocation5 + $0x178] sm:$0xf0]  ;;  %v5799_v43 = vld [vmem:[#allocation5 + $0x26c] sm:$0xf] }
 0x276   : > { %3147 = vmatpush.bf16.msrb.mxu3 %v5087_v34  ;;  %3160 = vmatpush.bf16.msra.mxu0 %v5215_v35  ;;  %v5831_v34 = vld [vmem:[#allocation5 + $0x36c] sm:$0xf]  ;;  %v4752_v35 = vld [vmem:[#allocation5 + $0x378] sm:$0xf0]  ;;  %v4499_v55 = vor.u32 %v5767_v41, %v4496_v42  ;;  %v4627_v2 = vor.u32 %v5799_v43, %v4624_v46 }
 0x277   : > { %v4755_v4 = vor.u32 %v5831_v34, %v4752_v35  ;;  %v4464_v63 = vld [vmem:[#allocation5 + $0x138] sm:$0xf0]  ;;  %v5943_v42 = vld [vmem:[#allocation5 + $0x6ec] sm:$0xf] }
 0x278   : > { %3122 = vmatmul.bf16.vlgmr.msrb.gmra.mxu1 %v6482_v50  ;;  %3135 = vmatmul.bf16.vlgmr.msrb.gmra.mxu2 %v6484_v51  ;;  %v4592_v20 = vld [vmem:[#allocation5 + $0x238] sm:$0xf0]  ;;  %v4467_v26 = vor.u32 %v5759_v18, %v4464_v63  ;;  %v5975_v34 = vld [vmem:[#allocation5 + $0x7ec] sm:$0xf] }
 0x279   : > { %3166 = vmatpush.bf16.msra.mxu1 %v4435_v48  ;;  %3179 = vmatpush.bf16.msra.mxu2 %v4563_v47  ;;  %v5072_v41 = vld [vmem:[#allocation5 + $0x5f8] sm:$0xf0]  ;;  %v5871_v18 = vld [vmem:[#allocation5 + $0x4ac] sm:$0xf] }
 0x27a   : > { %3192 = vmatpush.bf16.msra.mxu3 %v4691_v52  ;;  %3205 = vmatpush.bf16.msrb.mxu0 %v4819_v62  ;;  %v2876_v40 = vpop.f32.mrf.mxu2  ;;  %v5731_v62 = vld [vmem:[#allocation5 + $0x4c] sm:$0xf]  ;;  %v5200_v46 = vld [vmem:[#allocation5 + $0x6f8] sm:$0xf0] }
 0x27b   : > { %3148 = vmatmul.bf16.vlgmr.msrb.gmra.mxu3 %v6486_v56  ;;  %3161 = vmatmul.bf16.vlgmr.msra.gmra.mxu0 %v6488_v60  ;;  %v2877_v44 = vadd.f32 %v2876_v40, %v2864_v31  ;;  %v2889_v45 = vpop.f32.mrf.mxu3  ;;  %v4355_v10 = vor.u32 %v5731_v62, %v4352_v1  ;;  %v4723_v31 = vor.u32 %v5823_v22, %v4720_v23  ;;  %v5911_v40 = vld [vmem:[#allocation5 + $0x5ec] sm:$0xf]  ;;  %v5328_v35 = vld [vmem:[#allocation5 + $0x7f8] sm:$0xf0] }
 0x27c   : > { %v2865_v48 = vpop.f32.mrf.mxu1  ;;  %v4912_v63 = vld [vmem:[#allocation5 + $0x4b8] sm:$0xf0]  ;;  %v5935_v23 = vld [vmem:[#allocation5 + $0x6ac] sm:$0xf] }
 0x27d   : > { %3167 = vmatpush.bf16.msra.mxu1 %v4419_v7  ;;  %3180 = vmatpush.bf16.msra.mxu2 %v4547_v8  ;;  %v2890_v47 = vadd.f32 %v2889_v45, %v2877_v44  ;;  %v2904_v52 = vpop.f32.mrf.mxu0  ;;  %v4608_v7 = vld [vmem:[#allocation5 + $0x258] sm:$0xf0]  ;;  %v5827_v8 = vld [vmem:[#allocation5 + $0x34c] sm:$0xf]  ;;  %v4451_v45 = vor.u32 %v5755_v28, %v4448_v29 }
 0x27e   : > { %3193 = vmatpush.bf16.msra.mxu3 %v4675_v11  ;;  %3206 = vmatpush.bf16.msrb.mxu0 %v4803_v12  ;;  %v4483_v11 = vor.u32 %v5763_v0, %v4480_v5  ;;  %v5727_v12 = vld [vmem:[#allocation5 + $0x2c] sm:$0xf]  ;;  %v4611_v57 = vor.u32 %v5795_v6, %v4608_v7  ;;  %v4739_v16 = vor.u32 %v5827_v8, %v4736_v49  ;;  %v5056_v8 = vld [vmem:[#allocation5 + $0x5d8] sm:$0xf0] }
 0x27f   : > { %v2903_v9 = vadd.f32 %v2902_v21, %v2890_v47  ;;  %v5723_v21 = vld [vmem:[#allocation5 + $0xc] sm:$0xf]  ;;  %v4707_v47 = vor.u32 %v5819_v36, %v4704_v37  ;;  %v5075_v52 = vor.u32 %v5911_v40, %v5072_v41  ;;  %v5203_v0 = vor.u32 %v5943_v42, %v5200_v46  ;;  %v5040_v22 = vld [vmem:[#allocation5 + $0x5b8] sm:$0xf0] }
 0x280   : > { %v4323_v44 = vor.u32 %v5723_v21, %v4320_v61  ;;  %v5331_v5 = vor.u32 %v5975_v34, %v5328_v35  ;;  %v5907_v7 = vld [vmem:[#allocation5 + $0x5cc] sm:$0xf]  ;;  %v5152_v36 = vld [vmem:[#allocation5 + $0x698] sm:$0xf0] }
 0x281   : > { %3168 = vmatpush.bf16.msra.mxu1 %v4403_v15  ;;  %3181 = vmatpush.bf16.msra.mxu2 %v4531_v19  ;;  %v5791_v15 = vld [vmem:[#allocation5 + $0x22c] sm:$0xf]  ;;  %v4880_v42 = vld [vmem:[#allocation5 + $0x478] sm:$0xf0] }
 0x282   : > { %3194 = vmatpush.bf16.msra.mxu3 %v4659_v24  ;;  %3207 = vmatpush.bf16.msrb.mxu0 %v4787_v25  ;;  %v2878_v17 = vpop.f32.mrf.mxu2  ;;  %v4339_v25 = vor.u32 %v5727_v12, %v4336_v13  ;;  %v4595_v30 = vor.u32 %v5791_v15, %v4592_v20  ;;  %v5939_v49 = vld [vmem:[#allocation5 + $0x6cc] sm:$0xf]  ;;  %v5312_v13 = vld [vmem:[#allocation5 + $0x7d8] sm:$0xf0] }
 0x283   : > { %v2891_v19 = vpop.f32.mrf.mxu3  ;;  %v5971_v12 = vld [vmem:[#allocation5 + $0x7cc] sm:$0xf]  ;;  %v5059_v17 = vor.u32 %v5907_v7, %v5056_v8  ;;  %v5008_v46 = vld [vmem:[#allocation5 + $0x578] sm:$0xf0] }
 0x284   : > { %v2915_v24 = vpop.f32.mrf.mxu1  ;;  %v5315_v19 = vor.u32 %v5971_v12, %v5312_v13  ;;  %v5903_v20 = vld [vmem:[#allocation5 + $0x5ac] sm:$0xf]  ;;  %v5136_v35 = vld [vmem:[#allocation5 + $0x678] sm:$0xf0] }
 0x285   : > { %3169 = vmatpush.bf16.msra.mxu1 %v4387_v32  ;;  %3182 = vmatpush.bf16.msra.mxu2 %v4515_v33  ;;  %v2954_v27 = vpop.f32.mrf.mxu0  ;;  %v5787_v32 = vld [vmem:[#allocation5 + $0x20c] sm:$0xf]  ;;  %v4576_v33 = vld [vmem:[#allocation5 + $0x218] sm:$0xf0]  ;;  %v2916_v43 = vadd.f32 %v2915_v24, %v2903_v9  ;;  %v5043_v61 = vor.u32 %v5903_v20, %v5040_v22 }
 0x286   : > { %3195 = vmatpush.bf16.msra.mxu3 %v4643_v38  ;;  %3208 = vmatpush.bf16.msrb.mxu0 %v4771_v39  ;;  %v5879_v38 = vld [vmem:[#allocation5 + $0x4ec] sm:$0xf]  ;;  %v4944_v39 = vld [vmem:[#allocation5 + $0x4f8] sm:$0xf0]  ;;  %v4579_v48 = vor.u32 %v5787_v32, %v4576_v33 }
 0x287   : > { %v5168_v24 = vld [vmem:[#allocation5 + $0x6b8] sm:$0xf0]  ;;  %v5967_v21 = vld [vmem:[#allocation5 + $0x7ac] sm:$0xf] }
 0x288   : > { %v5867_v29 = vld [vmem:[#allocation5 + $0x48c] sm:$0xf]  ;;  %v5024_v32 = vld [vmem:[#allocation5 + $0x598] sm:$0xf0] }
 0x289   : > { %3170 = vmatpush.bf16.msra.mxu1 %v4371_v54  ;;  %3183 = vmatpush.bf16.msra.mxu2 %v4499_v55  ;;  %v4947_v55 = vor.u32 %v5879_v38, %v4944_v39  ;;  %v5931_v33 = vld [vmem:[#allocation5 + $0x68c] sm:$0xf]  ;;  %v5120_v8 = vld [vmem:[#allocation5 + $0x658] sm:$0xf0] }
 0x28a   : > { %3196 = vmatpush.bf16.msra.mxu3 %v4627_v2  ;;  %3209 = vmatpush.bf16.msrb.mxu0 %v4755_v4  ;;  %v2928_v54 = vpop.f32.mrf.mxu2  ;;  %v5875_v2 = vld [vmem:[#allocation5 + $0x4cc] sm:$0xf]  ;;  %v4928_v4 = vld [vmem:[#allocation5 + $0x4d8] sm:$0xf0] }
 0x28b   : > { %v2929_v62 = vadd.f32 %v2928_v54, %v2916_v43  ;;  %v2941_v1 = vpop.f32.mrf.mxu3  ;;  %v5963_v37 = vld [vmem:[#allocation5 + $0x78c] sm:$0xf]  ;;  %v5155_v43 = vor.u32 %v5931_v33, %v5152_v36  ;;  %v5104_v22 = vld [vmem:[#allocation5 + $0x638] sm:$0xf0] }
 0x28c   : > { %v2917_v6 = vpop.f32.mrf.mxu1  ;;  %v5863_v41 = vld [vmem:[#allocation5 + $0x46c] sm:$0xf]  ;;  %v5216_v36 = vld [vmem:[#allocation5 + $0x718] sm:$0xf0] }
 0x28d   : > { %3171 = vmatpush.bf16.msra.mxu1 %v4355_v10  ;;  %3184 = vmatpush.bf16.msra.mxu2 %v4483_v11  ;;  %v2942_v9 = vadd.f32 %v2941_v1, %v2929_v62  ;;  %v2956_v10 = vpop.f32.mrf.mxu0  ;;  %v5184_v11 = vld [vmem:[#allocation5 + $0x6d8] sm:$0xf0]  ;;  %v5927_v34 = vld [vmem:[#allocation5 + $0x66c] sm:$0xf]  ;;  %v4883_v54 = vor.u32 %v5863_v41, %v4880_v42 }
 0x28e   : > { %3197 = vmatpush.bf16.msra.mxu3 %v4611_v57  ;;  %3210 = vmatpush.bf16.msrb.mxu0 %v4739_v16  ;;  %v4931_v16 = vor.u32 %v5875_v2, %v4928_v4  ;;  %v5187_v15 = vor.u32 %v5939_v49, %v5184_v11  ;;  %v4864_v62 = vld [vmem:[#allocation5 + $0x458] sm:$0xf0]  ;;  %v5139_v1 = vor.u32 %v5927_v34, %v5136_v35  ;;  %v5923_v6 = vld [vmem:[#allocation5 + $0x64c] sm:$0xf]  ;;  %v5382_v35 = vld [vmem:[#allocation7 + $0x60] sm:$0xf] }
 0x28f   : > { %v6516_v57 = vadd.f32 %v2954_v27, %v2942_v9  ;;  %v4915_v27 = vor.u32 %v5871_v18, %v4912_v63  ;;  %v5955_v49 = vld [vmem:[#allocation5 + $0x74c] sm:$0xf]  ;;  %v5248_v9 = vld [vmem:[#allocation5 + $0x758] sm:$0xf0]  ;;  %v5123_v18 = vor.u32 %v5923_v6, %v5120_v8 }
 0x290   : > { %v5251_v63 = vor.u32 %v5955_v49, %v5248_v9  ;;  %v5919_v20 = vld [vmem:[#allocation5 + $0x62c] sm:$0xf]  ;;  %v5366_v49 = vld [vmem:[#allocation7 + $0x40] sm:$0xf]  ;;  %v5987_v9 = vld [vmem:[#allocation7 + $0x44] sm:$0xf0] }
 0x291   : > { %3172 = vmatpush.bf16.msra.mxu1 %v4339_v25  ;;  %3185 = vmatpush.bf16.msra.mxu2 %v4467_v26  ;;  %v5296_v25 = vld [vmem:[#allocation5 + $0x7b8] sm:$0xf0]  ;;  %v5947_v33 = vld [vmem:[#allocation5 + $0x70c] sm:$0xf] }
 0x292   : > { %3198 = vmatpush.bf16.msra.mxu3 %v4595_v30  ;;  %3211 = vmatpush.bf16.msrb.mxu0 %v4723_v31  ;;  %v2930_v26 = vpop.f32.mrf.mxu2  ;;  %v4896_v30 = vld [vmem:[#allocation5 + $0x498] sm:$0xf0]  ;;  %v5299_v31 = vor.u32 %v5967_v21, %v5296_v25 }
 0x293   : > { %v2943_v28 = vpop.f32.mrf.mxu3  ;;  %v4899_v39 = vor.u32 %v5867_v29, %v4896_v30  ;;  %v5851_v26 = vld [vmem:[#allocation5 + $0x40c] sm:$0xf] }
 0x294   : > { %v5107_v28 = vor.u32 %v5919_v20, %v5104_v22  ;;  %v5510_v22 = vld [vmem:[#allocation7 + $0x160] sm:$0xf] }
 0x295   : > { %3173 = vmatpush.bf16.msra.mxu1 %v4323_v44  ;;  %3186 = vmatpush.bf16.msra.mxu2 %v4451_v45  ;;  %v6522_v38 = vpop.f32.mrf.mxu1  ;;  %v5895_v45 = vld [vmem:[#allocation5 + $0x56c] sm:$0xf] }
 0x296   : > { %3199 = vmatpush.bf16.msra.mxu3 %v4579_v48  ;;  %3212 = vmatpush.bf16.msrb.mxu0 %v4707_v47  ;;  %v5959_v48 = vld [vmem:[#allocation5 + $0x76c] sm:$0xf]  ;;  %v5264_v47 = vld [vmem:[#allocation5 + $0x778] sm:$0xf0] }
 0x297   : > { %v5267_v2 = vor.u32 %v5959_v48, %v5264_v47  ;;  %v5991_v48 = vld [vmem:[#allocation7 + $0x64] sm:$0xf0]  ;;  %v5446_v47 = vld [vmem:[#allocation7 + $0xe0] sm:$0xf] }
 0x298   : > { %3174 = vmatmul.bf16.vlgmr.msra.gmra.mxu1 %v6470_v58  ;;  %3187 = vmatmul.bf16.vlgmr.msra.gmra.mxu2 %v6472_v53  ;;  %v5171_v58 = vor.u32 %v5935_v23, %v5168_v24  ;;  %v5899_v53 = vld [vmem:[#allocation5 + $0x58c] sm:$0xf]  ;;  %v5232_v24 = vld [vmem:[#allocation5 + $0x738] sm:$0xf0] }
 0x299   : > { %3218 = vmatpush.bf16.msrb.mxu1 %v4947_v55  ;;  %3231 = vmatpush.bf16.msrb.mxu2 %v5075_v52  ;;  %v5027_v40 = vor.u32 %v5899_v53, %v5024_v32  ;;  %v5011_v55 = vor.u32 %v5895_v45, %v5008_v46  ;;  %v5859_v52 = vld [vmem:[#allocation5 + $0x44c] sm:$0xf]  ;;  %v5088_v53 = vld [vmem:[#allocation5 + $0x618] sm:$0xf0]  ;;  %v1567_v45 = vperm.slane %v6509_v14, 1 }
 0x29a   : > { %3244 = vmatpush.bf16.msrb.mxu3 %v5203_v0  ;;  %3257 = vmatpush.bf16.msra.mxu0 %v5331_v5  ;;  %v5891_v0 = vld [vmem:[#allocation5 + $0x54c] sm:$0xf]  ;;  %v4992_v5 = vld [vmem:[#allocation5 + $0x558] sm:$0xf0]  ;;  %v4867_v12 = vor.u32 %v5859_v52, %v4864_v62  ;;  %v5383_v52 = vor.u32 %v5991_v48, %v5382_v35 }
 0x29b   : > { %3200 = vmatmul.bf16.vlgmr.msra.gmra.mxu3 %v6474_v59  ;;  %3213 = vmatmul.bf16.vlgmr.msrb.gmra.mxu0 %v6476_v3  ;;  %v5280_v59 = vld [vmem:[#allocation5 + $0x798] sm:$0xf0]  ;;  %v6524_v3 = vpop.f32.mrf.mxu0  ;;  %v6526_v4 = vpop.f32.mrf.mxu2  ;;  %v4995_v13 = vor.u32 %v5891_v0, %v4992_v5  ;;  %v5951_v23 = vld [vmem:[#allocation5 + $0x72c] sm:$0xf]  ;;  %v5438_v0 = vld [vmem:[#allocation7 + $0xd0] sm:$0xf] }
 0x29c   : > { %v5283_v44 = vor.u32 %v5963_v37, %v5280_v59  ;;  %v5235_v29 = vor.u32 %v5951_v23, %v5232_v24  ;;  %v5390_v37 = vld [vmem:[#allocation7 + $0x70] sm:$0xf]  ;;  %v5993_v59 = vld [vmem:[#allocation7 + $0x74] sm:$0xf0]  ;;  %v6023_v23 = vld [vmem:[#allocation7 + $0x164] sm:$0xf0] }
 0x29d   : > { %3219 = vmatpush.bf16.msrb.mxu1 %v4931_v16  ;;  %3232 = vmatpush.bf16.msrb.mxu2 %v5059_v17  ;;  %v2969_v10 = vpop.f32.mrf.mxu1  ;;  %v5855_v16 = vld [vmem:[#allocation5 + $0x42c] sm:$0xf]  ;;  %v4848_v17 = vld [vmem:[#allocation5 + $0x438] sm:$0xf0]  ;;  %v5391_v46 = vor.u32 %v5993_v59, %v5390_v37  ;;  %v6005_v5 = vld [vmem:[#allocation7 + $0xd4] sm:$0xf0] }
 0x29e   : > { %3245 = vmatpush.bf16.msrb.mxu3 %v5187_v15  ;;  %3258 = vmatpush.bf16.msra.mxu0 %v5315_v19  ;;  %v6528_v7 = vpop.f32.mrf.mxu3  ;;  %v5887_v15 = vld [vmem:[#allocation5 + $0x52c] sm:$0xf]  ;;  %v4976_v19 = vld [vmem:[#allocation5 + $0x538] sm:$0xf0]  ;;  %v4851_v21 = vor.u32 %v5855_v16, %v4848_v17  ;;  %v5439_v8 = vor.u32 %v6005_v5, %v5438_v0  ;;  %v5430_v10 = vld [vmem:[#allocation7 + $0xc0] sm:$0xf]  ;;  %v5367_v16 = vor.u32 %v5987_v9, %v5366_v49 }
 0x29f   : > { %v4979_v25 = vor.u32 %v5887_v15, %v4976_v19  ;;  %v5358_v17 = vld [vmem:[#allocation7 + $0x30] sm:$0xf]  ;;  %v6001_v15 = vld [vmem:[#allocation7 + $0xb4] sm:$0xf0]  ;;  %v5456_v0 = vld [vmem:[#allocation7 + $0xf8] sm:$0xf0] }
 0x2a0   : > { %v5486_v5 = vld [vmem:[#allocation7 + $0x130] sm:$0xf] }
 0x2a1   : > { %3220 = vmatpush.bf16.msrb.mxu1 %v4915_v27  ;;  %3233 = vmatpush.bf16.msrb.mxu2 %v5043_v61  ;;  %v4832_v27 = vld [vmem:[#allocation5 + $0x418] sm:$0xf0]  ;;  %v5883_v61 = vld [vmem:[#allocation5 + $0x50c] sm:$0xf] }
 0x2a2   : > { %3246 = vmatpush.bf16.msrb.mxu3 %v5171_v58  ;;  %3259 = vmatpush.bf16.msra.mxu0 %v5299_v31  ;;  %v4960_v58 = vld [vmem:[#allocation5 + $0x518] sm:$0xf0]  ;;  %v5915_v31 = vld [vmem:[#allocation5 + $0x60c] sm:$0xf]  ;;  %v4835_v41 = vor.u32 %v5851_v26, %v4832_v27  ;;  %v5983_v27 = vld [vmem:[#allocation7 + $0x24] sm:$0xf0] }
 0x2a3   : > { %v3008_v11 = vpop.f32.mrf.mxu0  ;;  %v2982_v30 = vpop.f32.mrf.mxu2  ;;  %v4963_v42 = vor.u32 %v5883_v61, %v4960_v58  ;;  %v5414_v61 = vld [vmem:[#allocation7 + $0xa0] sm:$0xf] }
 0x2a4   : > { %v6003_v11 = vld [vmem:[#allocation7 + $0xc4] sm:$0xf0] }
 0x2a5   : > { %3221 = vmatpush.bf16.msrb.mxu1 %v4899_v39  ;;  %3234 = vmatpush.bf16.msrb.mxu2 %v5027_v40  ;;  %v5454_v39 = vld [vmem:[#allocation7 + $0xf0] sm:$0xf]  ;;  %v6009_v40 = vld [vmem:[#allocation7 + $0xf4] sm:$0xf0] }
 0x2a6   : > { %3247 = vmatpush.bf16.msrb.mxu3 %v5155_v43  ;;  %3260 = vmatpush.bf16.msra.mxu0 %v5283_v44  ;;  %v2995_v32 = vpop.f32.mrf.mxu3  ;;  %v5091_v43 = vor.u32 %v5915_v31, %v5088_v53  ;;  %v5219_v44 = vor.u32 %v5947_v33, %v5216_v36  ;;  %v5455_v34 = vor.u32 %v6009_v40, %v5454_v39  ;;  %v5502_v31 = vld [vmem:[#allocation7 + $0x150] sm:$0xf]  ;;  %v5981_v39 = vld [vmem:[#allocation7 + $0x14] sm:$0xf0] }
 0x2a7   : > { %v5342_v36 = vld [vmem:[#allocation7 + $0x10] sm:$0xf] }
 0x2a8   : > { %v5406_v40 = vld [vmem:[#allocation7 + $0x90] sm:$0xf] }
 0x2a9   : > { %3222 = vmatpush.bf16.msrb.mxu1 %v4883_v54  ;;  %3235 = vmatpush.bf16.msrb.mxu2 %v5011_v55  ;;  %v6007_v54 = vld [vmem:[#allocation7 + $0xe4] sm:$0xf0]  ;;  %v2968_v55 = vadd.f32 %v6522_v38, %v1567_v45 }
 0x2aa   : > { %3248 = vmatpush.bf16.msrb.mxu3 %v5139_v1  ;;  %3261 = vmatpush.bf16.msra.mxu0 %v5267_v2  ;;  %v5447_v62 = vor.u32 %v6007_v54, %v5446_v47  ;;  %v5374_v1 = vld [vmem:[#allocation7 + $0x50] sm:$0xf]  ;;  %v5989_v2 = vld [vmem:[#allocation7 + $0x54] sm:$0xf0]  ;;  %v5398_v54 = vld [vmem:[#allocation7 + $0x80] sm:$0xf] }
 0x2ab   : > { %v2981_v6 = vadd.f32 %v6526_v4, %v2968_v55  ;;  %v5375_v38 = vor.u32 %v5989_v2, %v5374_v1  ;;  %v5995_v55 = vld [vmem:[#allocation7 + $0x84] sm:$0xf0]  ;;  %v5392_v1 = vld [vmem:[#allocation7 + $0x78] sm:$0xf0]  ;;  %v6008_v2 = vld [vmem:[#allocation7 + $0xf4] sm:$0xf] }
 0x2ac   : > { %v5399_v49 = vor.u32 %v5995_v55, %v5398_v54 }
 0x2ad   : > { %3223 = vmatpush.bf16.msrb.mxu1 %v4867_v12  ;;  %3236 = vmatpush.bf16.msrb.mxu2 %v4995_v13  ;;  %v5518_v12 = vld [vmem:[#allocation7 + $0x170] sm:$0xf]  ;;  %v6025_v13 = vld [vmem:[#allocation7 + $0x174] sm:$0xf0] }
 0x2ae   : > { %3249 = vmatpush.bf16.msrb.mxu3 %v5123_v18  ;;  %3262 = vmatpush.bf16.msra.mxu0 %v5251_v63  ;;  %v5519_v18 = vor.u32 %v6025_v13, %v5518_v12  ;;  %v5422_v63 = vld [vmem:[#allocation7 + $0xb0] sm:$0xf]  ;;  %v5384_v12 = vld [vmem:[#allocation7 + $0x68] sm:$0xf0]  ;;  %v6006_v13 = vld [vmem:[#allocation7 + $0xe4] sm:$0xf] }
 0x2af   : > { %v5423_v24 = vor.u32 %v6001_v15, %v5422_v63 }
 0x2b1   : > { %3224 = vmatpush.bf16.msrb.mxu1 %v4851_v21  ;;  %3237 = vmatpush.bf16.msrb.mxu2 %v4979_v25  ;;  %v5350_v21 = vld [vmem:[#allocation7 + $0x20] sm:$0xf]  ;;  %v5511_v25 = vor.u32 %v6023_v23, %v5510_v22  ;;  %v5376_v22 = vld [vmem:[#allocation7 + $0x58] sm:$0xf0]  ;;  %v6004_v23 = vld [vmem:[#allocation7 + $0xd4] sm:$0xf] }
 0x2b2   : > { %3250 = vmatpush.bf16.msrb.mxu3 %v5107_v28  ;;  %3263 = vmatpush.bf16.msra.mxu0 %v5235_v29  ;;  %v5999_v28 = vld [vmem:[#allocation7 + $0xa4] sm:$0xf0]  ;;  %v5351_v32 = vor.u32 %v5983_v27, %v5350_v21  ;;  %v5368_v27 = vld [vmem:[#allocation7 + $0x48] sm:$0xf0] }
 0x2b3   : > { %v5415_v33 = vor.u32 %v5999_v28, %v5414_v61  ;;  %v6002_v61 = vld [vmem:[#allocation7 + $0xc4] sm:$0xf]  ;;  %v5432_v28 = vld [vmem:[#allocation7 + $0xc8] sm:$0xf0] }
 0x2b5   : > { %3225 = vmatpush.bf16.msrb.mxu1 %v4835_v41  ;;  %3238 = vmatpush.bf16.msrb.mxu2 %v4963_v42  ;;  %v5997_v41 = vld [vmem:[#allocation7 + $0x94] sm:$0xf0]  ;;  %v5494_v42 = vld [vmem:[#allocation7 + $0x140] sm:$0xf] }
 0x2b6   : > { %3251 = vmatpush.bf16.msrb.mxu3 %v5091_v43  ;;  %3264 = vmatpush.bf16.msra.mxu0 %v5219_v44  ;;  %v6019_v43 = vld [vmem:[#allocation7 + $0x144] sm:$0xf0]  ;;  %v5343_v44 = vor.u32 %v5981_v39, %v5342_v36  ;;  %v5407_v45 = vor.u32 %v5997_v41, %v5406_v40  ;;  %v5984_v36 = vld [vmem:[#allocation7 + $0x34] sm:$0xf]  ;;  %v5360_v39 = vld [vmem:[#allocation7 + $0x38] sm:$0xf0] }
 0x2b7   : > { %v5495_v35 = vor.u32 %v6019_v43, %v5494_v42  ;;  %v6000_v40 = vld [vmem:[#allocation7 + $0xb4] sm:$0xf]  ;;  %v5424_v41 = vld [vmem:[#allocation7 + $0xb8] sm:$0xf0]  ;;  %v6022_v42 = vld [vmem:[#allocation7 + $0x164] sm:$0xf] }
 0x2b8   : > { %3226 = vmatmul.bf16.vlgmr.msrb.gmra.mxu1 %v6482_v50  ;;  %3239 = vmatmul.bf16.vlgmr.msrb.gmra.mxu2 %v6484_v51  ;;  %v2994_v50 = vadd.f32 %v6528_v7, %v2981_v6  ;;  %v3019_v51 = vpop.f32.mrf.mxu1  ;;  %v3058_v4 = vpop.f32.mrf.mxu0  ;;  %v6017_v6 = vld [vmem:[#allocation7 + $0x134] sm:$0xf0]  ;;  %v5512_v43 = vld [vmem:[#allocation7 + $0x168] sm:$0xf0] }
 0x2b9   : > { %3668 = vmatpush.bf16.msra.mxu1 %v5391_v46  ;;  %3681 = vmatpush.bf16.msra.mxu2 %v5455_v34  ;;  %v5334_v46 = vld [vmem:[#allocation7] sm:$0xf]  ;;  %v5979_v34 = vld [vmem:[#allocation7 + $0x4] sm:$0xf0]  ;;  %v5487_v9 = vor.u32 %v6017_v6, %v5486_v5  ;;  %v5980_v5 = vld [vmem:[#allocation7 + $0x14] sm:$0xf] }
 0x2ba   : > { %3252 = vmatmul.bf16.vlgmr.msrb.gmra.mxu3 %v6486_v56  ;;  %3265 = vmatmul.bf16.vlgmr.msra.gmra.mxu0 %v6488_v60  ;;  %v5431_v56 = vor.u32 %v6003_v11, %v5430_v10  ;;  %v5985_v60 = vld [vmem:[#allocation7 + $0x34] sm:$0xf0]  ;;  %v3007_v19 = vadd.f32 %v6524_v3, %v2994_v50  ;;  %v5459_v50 = vor.u32 %v6008_v2, %v5456_v0 }
 0x2bb   : > { %3694 = vmatpush.bf16.msra.mxu3 %v5519_v18  ;;  %v5359_v20 = vor.u32 %v5985_v60, %v5358_v17  ;;  %v3032_v26 = vpop.f32.mrf.mxu2  ;;  %v6021_v3 = vld [vmem:[#allocation7 + $0x154] sm:$0xf0]  ;;  %v5470_v60 = vld [vmem:[#allocation7 + $0x110] sm:$0xf] }
 0x2bc   : > { %v3020_v7 = vadd.f32 %v3019_v51, %v3007_v19  ;;  %v5503_v37 = vor.u32 %v6021_v3, %v5502_v31  ;;  %v5990_v51 = vld [vmem:[#allocation7 + $0x64] sm:$0xf]  ;;  %v6013_v18 = vld [vmem:[#allocation7 + $0x114] sm:$0xf0]  ;;  %v6024_v31 = vld [vmem:[#allocation7 + $0x174] sm:$0xf] }
 0x2bd   : > { %3669 = vmatpush.bf16.msra.mxu1 %v5383_v52  ;;  %3682 = vmatpush.bf16.msra.mxu2 %v5447_v62  ;;  %v5992_v52 = vld [vmem:[#allocation7 + $0x74] sm:$0xf]  ;;  %v5387_v15 = vor.u32 %v5990_v51, %v5384_v12  ;;  %v5520_v3 = vld [vmem:[#allocation7 + $0x178] sm:$0xf0]  ;;  %v5978_v12 = vld [vmem:[#allocation7 + $0x4] sm:$0xf] }
 0x2be   : > { %v3033_v29 = vadd.f32 %v3032_v26, %v3020_v7  ;;  %v3045_v30 = vpop.f32.mrf.mxu3  ;;  %v5395_v11 = vor.u32 %v5992_v52, %v5392_v1  ;;  %v5440_v7 = vld [vmem:[#allocation7 + $0xd8] sm:$0xf0]  ;;  %v5986_v26 = vld [vmem:[#allocation7 + $0x44] sm:$0xf]  ;;  %v6020_v52 = vld [vmem:[#allocation7 + $0x154] sm:$0xf] }
 0x2bf   : > { %3695 = vmatpush.bf16.msra.mxu3 %v5511_v25  ;;  %v5443_v25 = vor.u32 %v6004_v23, %v5440_v7  ;;  %v5480_v7 = vld [vmem:[#allocation7 + $0x128] sm:$0xf0] }
 0x2c0   : > { %v3021_v58 = vpop.f32.mrf.mxu1  ;;  %v3060_v53 = vpop.f32.mrf.mxu0  ;;  %v3046_v59 = vadd.f32 %v3045_v30, %v3033_v29  ;;  %v5462_v29 = vld [vmem:[#allocation7 + $0x100] sm:$0xf]  ;;  %v6011_v30 = vld [vmem:[#allocation7 + $0x104] sm:$0xf0] }
 0x2c1   : > { %3670 = vmatpush.bf16.msra.mxu1 %v5375_v38  ;;  %3683 = vmatpush.bf16.msra.mxu2 %v5439_v8  ;;  %v3270_v38 = vmax.f32 %v6516_v57, 0.0  ;;  %v5335_v8 = vor.u32 %v5979_v34, %v5334_v46  ;;  %v5463_v58 = vor.u32 %v6011_v30, %v5462_v29  ;;  %v5982_v46 = vld [vmem:[#allocation7 + $0x24] sm:$0xf]  ;;  %v5515_v34 = vor.u32 %v6022_v42, %v5512_v43  ;;  %v5464_v30 = vld [vmem:[#allocation7 + $0x108] sm:$0xf0] }
 0x2c2   : > { %v3059_v48 = vadd.f32 %v3058_v4, %v3046_v59  ;;  %v5448_v4 = vld [vmem:[#allocation7 + $0xe8] sm:$0xf0]  ;;  %v6010_v29 = vld [vmem:[#allocation7 + $0x104] sm:$0xf]  ;;  %v6037_v42 = vld [vmem:[#allocation7 + $0x1d4] sm:$0xf0] }
 0x2c3   : > { %3696 = vmatpush.bf16.msra.mxu3 %v5503_v37  ;;  %v3034_v47 = vpop.f32.mrf.mxu2  ;;  %v6540_v17 = vpack.c.bf16 %v3270_v38, %v3270_v38  ;;  %v5451_v19 = vor.u32 %v6006_v13, %v5448_v4  ;;  %v5523_v37 = vor.u32 %v6024_v31, %v5520_v3  ;;  %v5336_v4 = vld [vmem:[#allocation7 + $0x8] sm:$0xf0]  ;;  %v5582_v31 = vld [vmem:[#allocation7 + $0x1f0] sm:$0xf]  ;;  %v6041_v3 = vld [vmem:[#allocation7 + $0x1f4] sm:$0xf0] }
 0x2c4   : > { %v3271_v10 = vmax.f32 %v3059_v48, 0.0  ;;  %v5998_v48 = vld [vmem:[#allocation7 + $0xa4] sm:$0xf]  ;;  %v5416_v47 = vld [vmem:[#allocation7 + $0xa8] sm:$0xf0] }
 0x2c5   : > { %3671 = vmatpush.bf16.msra.mxu1 %v5367_v16  ;;  %3684 = vmatpush.bf16.msra.mxu2 %v5431_v56  ;;  %v5478_v16 = vld [vmem:[#allocation7 + $0x120] sm:$0xf]  ;;  %v6015_v56 = vld [vmem:[#allocation7 + $0x124] sm:$0xf0]  ;;  %v5419_v0 = vor.u32 %v5998_v48, %v5416_v47 }
 0x2c6   : > { %v3047_v62 = vpop.f32.mrf.mxu3  ;;  %v5479_v57 = vor.u32 %v6015_v56, %v5478_v16  ;;  %v6542_v63 = vpack.c.bf16 %v3271_v10, %v3271_v10  ;;  %v6018_v10 = vld [vmem:[#allocation7 + $0x144] sm:$0xf]  ;;  %v5400_v56 = vld [vmem:[#allocation7 + $0x88] sm:$0xf0]  ;;  %v5558_v48 = vld [vmem:[#allocation7 + $0x1c0] sm:$0xf] }
 0x2c7   : > { %3697 = vmatpush.bf16.msra.mxu3 %v5495_v35  ;;  %v5352_v35 = vld [vmem:[#allocation7 + $0x28] sm:$0xf0]  ;;  %v5504_v62 = vld [vmem:[#allocation7 + $0x158] sm:$0xf0]  ;;  %v5994_v16 = vld [vmem:[#allocation7 + $0x84] sm:$0xf] }
 0x2c8   : > { %v5355_v2 = vor.u32 %v5982_v46, %v5352_v35  ;;  %v5507_v6 = vor.u32 %v6020_v52, %v5504_v62  ;;  %v6035_v47 = vld [vmem:[#allocation7 + $0x1c4] sm:$0xf0]  ;;  %v6033_v62 = vld [vmem:[#allocation7 + $0x1b4] sm:$0xf0] }
 0x2c9   : > { %3672 = vmatpush.bf16.msra.mxu1 %v5359_v20  ;;  %3685 = vmatpush.bf16.msra.mxu2 %v5423_v24  ;;  %v5988_v20 = vld [vmem:[#allocation7 + $0x54] sm:$0xf]  ;;  %v5471_v24 = vor.u32 %v6013_v18, %v5470_v60 }
 0x2ca   : > { %v5379_v21 = vor.u32 %v5988_v20, %v5376_v22  ;;  %v6016_v18 = vld [vmem:[#allocation7 + $0x134] sm:$0xf]  ;;  %v5339_v20 = vor.u32 %v5978_v12, %v5336_v4  ;;  %v5403_v22 = vor.u32 %v5994_v16, %v5400_v56 }
 0x2cb   : > { %3698 = vmatpush.bf16.msra.mxu3 %v5487_v9  ;;  %v5408_v9 = vld [vmem:[#allocation7 + $0x98] sm:$0xf0]  ;;  %v6040_v12 = vld [vmem:[#allocation7 + $0x1f4] sm:$0xf] }
 0x2cd   : > { %3673 = vmatpush.bf16.msra.mxu1 %v5351_v32  ;;  %3686 = vmatpush.bf16.msra.mxu2 %v5415_v33  ;;  %v5371_v32 = vor.u32 %v5986_v26, %v5368_v27  ;;  %v5435_v33 = vor.u32 %v6002_v61, %v5432_v28  ;;  %v5472_v26 = vld [vmem:[#allocation7 + $0x118] sm:$0xf0] }
 0x2cf   : > { %3699 = vmatpush.bf16.msra.mxu3 %v5479_v57 }
 0x2d1   : > { %3674 = vmatpush.bf16.msra.mxu1 %v5343_v44  ;;  %3687 = vmatpush.bf16.msra.mxu2 %v5407_v45  ;;  %v5363_v44 = vor.u32 %v5984_v36, %v5360_v39  ;;  %v5427_v45 = vor.u32 %v6000_v40, %v5424_v41  ;;  %v6039_v39 = vld [vmem:[#allocation7 + $0x1e4] sm:$0xf0]  ;;  %v5566_v41 = vld [vmem:[#allocation7 + $0x1d0] sm:$0xf] }
 0x2d3   : > { %3700 = vmatpush.bf16.msra.mxu3 %v5471_v24 }
 0x2d5   : > { %3675 = vmatpush.bf16.msra.mxu1 %v5335_v8  ;;  %3688 = vmatpush.bf16.msra.mxu2 %v5399_v49  ;;  %v6546_v53 = vpop.f32.mrf.mxu1  ;;  %v5344_v8 = vld [vmem:[#allocation7 + $0x18] sm:$0xf0]  ;;  %v5996_v49 = vld [vmem:[#allocation7 + $0x94] sm:$0xf] }
 0x2d6   : > { %v5411_v51 = vor.u32 %v5996_v49, %v5408_v9  ;;  %v5534_v49 = vld [vmem:[#allocation7 + $0x190] sm:$0xf]  ;;  %v6029_v9 = vld [vmem:[#allocation7 + $0x194] sm:$0xf0] }
 0x2d7   : > { %3701 = vmatpush.bf16.msra.mxu3 %v5463_v58  ;;  %v5467_v58 = vor.u32 %v6010_v29, %v5464_v30  ;;  %v6030_v30 = vld [vmem:[#allocation7 + $0x1a4] sm:$0xf] }
 0x2d8   : > { %3676 = vmatmul.bf16.vlgmr.msra.gmra.mxu1 %v6540_v17  ;;  %3689 = vmatmul.bf16.vlgmr.msra.gmra.mxu2 %v6542_v63  ;;  %v6548_v59 = vpop.f32.mrf.mxu0 }
 0x2d9   : > { %3720 = vmatpush.bf16.msrb.mxu1 %v5395_v11  ;;  %3733 = vmatpush.bf16.msrb.mxu2 %v5459_v50  ;;  %v5496_v11 = vld [vmem:[#allocation7 + $0x148] sm:$0xf0]  ;;  %v5347_v50 = vor.u32 %v5980_v5, %v5344_v8  ;;  %v6031_v5 = vld [vmem:[#allocation7 + $0x1a4] sm:$0xf0] }
 0x2da   : > { %v5499_v13 = vor.u32 %v6018_v10, %v5496_v11  ;;  %v5535_v10 = vor.u32 %v6029_v9, %v5534_v49  ;;  %v5526_v11 = vld [vmem:[#allocation7 + $0x180] sm:$0xf] }
 0x2db   : > { %3746 = vmatpush.bf16.msrb.mxu3 %v5523_v37  ;;  %v3084_v54 = vpop.f32.mrf.mxu2  ;;  %v5574_v37 = vld [vmem:[#allocation7 + $0x1e0] sm:$0xf] }
 0x2dd   : > { %3721 = vmatpush.bf16.msrb.mxu1 %v5387_v15  ;;  %3734 = vmatpush.bf16.msrb.mxu2 %v5451_v19  ;;  %v3073_v1 = vpop.f32.mrf.mxu1  ;;  %v5488_v15 = vld [vmem:[#allocation7 + $0x138] sm:$0xf0]  ;;  %v6014_v19 = vld [vmem:[#allocation7 + $0x124] sm:$0xf] }
 0x2de   : > { %v3097_v55 = vpop.f32.mrf.mxu3  ;;  %v5491_v23 = vor.u32 %v6016_v18, %v5488_v15  ;;  %v5483_v24 = vor.u32 %v6014_v19, %v5480_v7  ;;  %v6036_v15 = vld [vmem:[#allocation7 + $0x1d4] sm:$0xf]  ;;  %v5568_v19 = vld [vmem:[#allocation7 + $0x1d8] sm:$0xf0] }
 0x2df   : > { %3747 = vmatpush.bf16.msrb.mxu3 %v5515_v34 }
 0x2e0   : > { %v3112_v38 = vpop.f32.mrf.mxu0 }
 0x2e1   : > { %3722 = vmatpush.bf16.msrb.mxu1 %v5379_v21  ;;  %3735 = vmatpush.bf16.msrb.mxu2 %v5443_v25  ;;  %v1568_v21 = vperm.slane %v6509_v14, 2  ;;  %v6012_v25 = vld [vmem:[#allocation7 + $0x114] sm:$0xf] }
 0x2e2   : > { %v5475_v27 = vor.u32 %v6012_v25, %v5472_v26  ;;  %v5560_v25 = vld [vmem:[#allocation7 + $0x1c8] sm:$0xf0] }
 0x2e3   : > { %3748 = vmatpush.bf16.msrb.mxu3 %v5507_v6  ;;  %v3086_v57 = vpop.f32.mrf.mxu2  ;;  %v3072_v61 = vadd.f32 %v6546_v53, %v1568_v21  ;;  %v6034_v21 = vld [vmem:[#allocation7 + $0x1c4] sm:$0xf] }
 0x2e4   : > { %v6038_v57 = vld [vmem:[#allocation7 + $0x1e4] sm:$0xf]  ;;  %v5563_v26 = vor.u32 %v6034_v21, %v5560_v25  ;;  %v6055_v21 = vld [vmem:[%s6637_s11 + $0x68] sm:$0xff] }
 0x2e5   : > { %3723 = vmatpush.bf16.msrb.mxu1 %v5371_v32  ;;  %3736 = vmatpush.bf16.msrb.mxu2 %v5435_v33  ;;  %v3085_v28 = vadd.f32 %v3084_v54, %v3072_v61  ;;  %v5583_v32 = vor.u32 %v6041_v3, %v5582_v31  ;;  %v5552_v61 = vld [vmem:[#allocation7 + $0x1b8] sm:$0xf0] }
 0x2e6   : > { %v3099_v60 = vpop.f32.mrf.mxu3 }
 0x2e7   : > { %3749 = vmatpush.bf16.msrb.mxu3 %v5499_v13  ;;  %v3098_v14 = vadd.f32 %v3097_v55, %v3085_v28  ;;  %3707 = vmatpush.bf16.msrb.mxu0 %v5583_v32  ;;  %v5559_v55 = vor.u32 %v6035_v47, %v5558_v48  ;;  %v5584_v13 = vld [vmem:[#allocation7 + $0x1f8] sm:$0xf0]  ;;  %v5576_v60 = vld [vmem:[#allocation7 + $0x1e8] sm:$0xf0] }
 0x2e8   : > { %v5587_v4 = vor.u32 %v6040_v12, %v5584_v13  ;;  %v5579_v18 = vor.u32 %v6038_v57, %v5576_v60  ;;  %v5536_v32 = vld [vmem:[#allocation7 + $0x198] sm:$0xf0]  ;;  %v6048_v57 = vld [vmem:[%s6637_s11 + $0x30] sm:$0xff] }
 0x2e9   : > { %3724 = vmatpush.bf16.msrb.mxu1 %v5363_v44  ;;  %3737 = vmatpush.bf16.msrb.mxu2 %v5427_v45  ;;  %v3111_v53 = vadd.f32 %v6548_v59, %v3098_v14  ;;  %v5567_v45 = vor.u32 %v6037_v42, %v5566_v41  ;;  %v5550_v59 = vld [vmem:[#allocation7 + $0x1b0] sm:$0xf]  ;;  %v6028_v14 = vld [vmem:[#allocation7 + $0x194] sm:$0xf] }
 0x2ea   : > { %v6056_v60 = vld [vmem:[%s6637_s11 + $0x70] sm:$0xff] }
 0x2eb   : > { %3750 = vmatpush.bf16.msrb.mxu3 %v5491_v23 }
 0x2ed   : > { %3725 = vmatpush.bf16.msrb.mxu1 %v5355_v2  ;;  %3738 = vmatpush.bf16.msrb.mxu2 %v5419_v0  ;;  %v5551_v2 = vor.u32 %v6033_v62, %v5550_v59  ;;  %v5542_v0 = vld [vmem:[#allocation7 + $0x1a0] sm:$0xf] }
 0x2ee   : > { %v5543_v8 = vor.u32 %v6031_v5, %v5542_v0 }
 0x2ef   : > { %3751 = vmatpush.bf16.msrb.mxu3 %v5483_v24 }
 0x2f1   : > { %3726 = vmatpush.bf16.msrb.mxu1 %v5347_v50  ;;  %3739 = vmatpush.bf16.msrb.mxu2 %v5411_v51  ;;  %v6027_v50 = vld [vmem:[#allocation7 + $0x184] sm:$0xf0] }
 0x2f2   : > { %v5527_v51 = vor.u32 %v6027_v50, %v5526_v11 }
 0x2f3   : > { %3752 = vmatpush.bf16.msrb.mxu3 %v5475_v27  ;;  %v6032_v27 = vld [vmem:[#allocation7 + $0x1b4] sm:$0xf] }
 0x2f4   : > { %v5555_v29 = vor.u32 %v6032_v27, %v5552_v61  ;;  %v6054_v27 = vld [vmem:[%s6637_s11 + $0x60] sm:$0xff]  ;;  %v6053_v61 = vld [vmem:[%s6637_s11 + $0x58] sm:$0xff] }
 0x2f5   : > { %3727 = vmatpush.bf16.msrb.mxu1 %v5339_v20  ;;  %3740 = vmatpush.bf16.msrb.mxu2 %v5403_v22  ;;  %v3123_v33 = vpop.f32.mrf.mxu1  ;;  %v5571_v22 = vor.u32 %v6036_v15, %v5568_v19  ;;  %v6046_v19 = vld [vmem:[%s6637_s11 + $0x20] sm:$0xff] }
 0x2f6   : > { %v3124_v40 = vadd.f32 %v3123_v33, %v3111_v53  ;;  %v6133_v33 = vld [vmem:[%s6634_s8] sm:$0xf] }
 0x2f7   : > { %3753 = vmatpush.bf16.msrb.mxu3 %v5467_v58  ;;  %v5544_v58 = vld [vmem:[#allocation7 + $0x1a8] sm:$0xf0] }
 0x2f8   : > { %3728 = vmatmul.bf16.vlgmr.msrb.gmra.mxu1 %v6540_v17  ;;  %3741 = vmatmul.bf16.vlgmr.msrb.gmra.mxu2 %v6542_v63  ;;  %v3162_v36 = vpop.f32.mrf.mxu0  ;;  %v5575_v17 = vor.u32 %v6039_v39, %v5574_v37  ;;  %v5547_v3 = vor.u32 %v6030_v30, %v5544_v58  ;;  %v5539_v37 = vor.u32 %v6028_v14, %v5536_v32  ;;  %v6050_v30 = vld [vmem:[%s6637_s11 + $0x40] sm:$0xff] }
 0x2fa   : > { %3708 = vmatpush.bf16.msrb.mxu0 %v5575_v17  ;;  %v6026_v17 = vld [vmem:[#allocation7 + $0x184] sm:$0xf] }
 0x2fb   : > { %v3136_v63 = vpop.f32.mrf.mxu2 }
 0x2fc   : > { %v3137_v43 = vadd.f32 %v3136_v63, %v3124_v40  ;;  %v5528_v40 = vld [vmem:[#allocation7 + $0x188] sm:$0xf0] }
 0x2fd   : > { %v3125_v46 = vpop.f32.mrf.mxu1  ;;  %v5531_v63 = vor.u32 %v6026_v17, %v5528_v40 }
 0x2fe   : > { %v3149_v44 = vpop.f32.mrf.mxu3  ;;  %3709 = vmatpush.bf16.msrb.mxu0 %v5567_v45 }
 0x2ff   : > { %v3150_v34 = vadd.f32 %v3149_v44, %v3137_v43 }
 0x300   : > { %v3164_v35 = vpop.f32.mrf.mxu0 }
 0x301   : > { %v3163_v54 = vadd.f32 %v3162_v36, %v3150_v34  ;;  %v1569_v36 = vperm.slane %v6133_v33, 3 }
 0x302   : > { %3710 = vmatpush.bf16.msrb.mxu0 %v5559_v55 }
 0x303   : > { %v3272_v52 = vmax.f32 %v3163_v54, 0.0  ;;  %v3138_v1 = vpop.f32.mrf.mxu2 }
 0x305   : > { %v3276_v6 = vpack.c.bf16 %v3272_v52, %v3272_v52 }
 0x306   : > { %v3151_v38 = vpop.f32.mrf.mxu3  ;;  %3711 = vmatpush.bf16.msrb.mxu0 %v5551_v2  ;;  %v3342_v2 = vld [vmem:[%s6636_s10] sm:$0x3] }
 0x307   : > { %3702 = vmatmul.bf16.vlgmr.msra.gmra.mxu3 %v3276_v6  ;;  %v3344_v5 = vperm.slane %v3342_v2, 0  ;;  %v3345_v11 = vperm.slane %v3342_v2, 1 }
 0x30a   : > { %3712 = vmatpush.bf16.msrb.mxu0 %v5543_v8 }
 0x30e   : > { %3713 = vmatpush.bf16.msrb.mxu0 %v5535_v10 }
 0x312   : > { %3714 = vmatpush.bf16.msrb.mxu0 %v5527_v51 }
 0x315   : > { %v3175_v16 = vpop.f32.mrf.mxu1 }
 0x316   : > { %3759 = vmatpush.bf16.msra.mxu0 %v5587_v4  ;;  %v3176_v39 = vadd.f32 %v3175_v16, %v1569_v36  ;;  %v6049_v16 = vld [vmem:[%s6637_s11 + $0x38] sm:$0xff] }
 0x317   : > { %3754 = vmatmul.bf16.vlgmr.msrb.gmra.mxu3 %v3276_v6  ;;  %3908 = vmatpush.bf16.msra.mxu1 %v6049_v16 }
 0x318   : > { %v3214_v56 = vpop.f32.mrf.mxu0 }
 0x31a   : > { %3760 = vmatpush.bf16.msra.mxu0 %v5579_v18  ;;  %v6047_v18 = vld [vmem:[%s6637_s11 + $0x28] sm:$0xff] }
 0x31b   : > { %v3188_v20 = vpop.f32.mrf.mxu2  ;;  %3909 = vmatpush.bf16.msra.mxu1 %v6048_v57 }
 0x31c   : > { %v3189_v53 = vadd.f32 %v3188_v20, %v3176_v39  ;;  %v6045_v20 = vld [vmem:[%s6637_s11 + $0x18] sm:$0xff] }
 0x31d   : > { %v3177_v7 = vpop.f32.mrf.mxu1 }
 0x31e   : > { %v3201_v23 = vpop.f32.mrf.mxu3  ;;  %3761 = vmatpush.bf16.msra.mxu0 %v5571_v22 }
 0x31f   : > { %v3202_v41 = vadd.f32 %v3201_v23, %v3189_v53  ;;  %3910 = vmatpush.bf16.msra.mxu1 %v6047_v18  ;;  %v6044_v23 = vld [vmem:[%s6637_s11 + $0x10] sm:$0xff] }
 0x320   : > { %v3216_v24 = vpop.f32.mrf.mxu0 }
 0x321   : > { %v3215_v44 = vadd.f32 %v3214_v56, %v3202_v41  ;;  %v6057_v56 = vld [vmem:[%s6637_s11 + $0x78] sm:$0xff]  ;;  %v6043_v24 = vld [vmem:[%s6637_s11 + $0x8] sm:$0xff] }
 0x322   : > { %3762 = vmatpush.bf16.msra.mxu0 %v5563_v26  ;;  %3921 = vmatpush.bf16.msra.mxu2 %v6057_v56  ;;  %v6042_v26 = vld [vmem:[%s6637_s11] sm:$0xff] }
 0x323   : > { %v3190_v28 = vpop.f32.mrf.mxu2  ;;  %3911 = vmatpush.bf16.msra.mxu1 %v6046_v19 }
 0x324   : > { %v6052_v28 = vld [vmem:[%s6637_s11 + $0x50] sm:$0xff] }
 0x326   : > { %v3203_v31 = vpop.f32.mrf.mxu3  ;;  %3763 = vmatpush.bf16.msra.mxu0 %v5555_v29  ;;  %3922 = vmatpush.bf16.msra.mxu2 %v6056_v60  ;;  %v6051_v29 = vld [vmem:[%s6637_s11 + $0x48] sm:$0xff] }
 0x327   : > { %3912 = vmatpush.bf16.msra.mxu1 %v6045_v20 }
 0x32a   : > { %3764 = vmatpush.bf16.msra.mxu0 %v5547_v3  ;;  %3923 = vmatpush.bf16.msra.mxu2 %v6055_v21 }
 0x32b   : > { %3913 = vmatpush.bf16.msra.mxu1 %v6044_v23 }
 0x32e   : > { %3765 = vmatpush.bf16.msra.mxu0 %v5539_v37  ;;  %3924 = vmatpush.bf16.msra.mxu2 %v6054_v27 }
 0x32f   : > { %3914 = vmatpush.bf16.msra.mxu1 %v6043_v24 }
 0x332   : > { %3766 = vmatpush.bf16.msra.mxu0 %v5531_v63  ;;  %3925 = vmatpush.bf16.msra.mxu2 %v6053_v61 }
 0x333   : > { %3915 = vmatpush.bf16.msra.mxu1 %v6042_v26 }
 0x335   : > { %v3227_v42 = vpop.f32.mrf.mxu1 }
 0x336   : > { %v3228_v45 = vadd.f32 %v3227_v42, %v3215_v44  ;;  %3926 = vmatpush.bf16.msra.mxu2 %v6052_v28  ;;  %v6132_v42 = vld [vmem:[%s6638_s12] ss:$0 sm:$0xff] }
 0x337   : > { %v3266_v43 = vpop.f32.mrf.mxu0 }
 0x33a   : > { %3927 = vmatpush.bf16.msra.mxu2 %v6051_v29 }
 0x33b   : > { %v3240_v46 = vpop.f32.mrf.mxu2 }
 0x33c   : > { %v3241_v34 = vadd.f32 %v3240_v46, %v3228_v45 }
 0x33d   : > { %v3253_v35 = vpop.f32.mrf.mxu3  ;;  %v3229_v48 = vpop.f32.mrf.mxu1 }
 0x33e   : > { %v3254_v47 = vadd.f32 %v3253_v35, %v3241_v34  ;;  %3928 = vmatpush.bf16.msra.mxu2 %v6050_v30 }
 0x33f   : > { %v3268_v54 = vpop.f32.mrf.mxu0 }
 0x340   : > { %v3267_v55 = vadd.f32 %v3266_v43, %v3254_v47 }
 0x342   : > { %v3273_v52 = vmax.f32 %v3267_v55, 0.0 }
 0x343   : > { %v3242_v59 = vpop.f32.mrf.mxu2 }
 0x344   : > { %v3277_v62 = vpack.c.bf16 %v3273_v52, %v3273_v52 }
 0x345   : > { %v3255_v1 = vpop.f32.mrf.mxu3 }
 0x346   : > { %3715 = vmatmul.bf16.vlgmr.msrb.gmra.mxu0 %v3277_v62 }
 0x355   : > { %v3677_v0 = vpop.f32.mrf.mxu1 }
 0x356   : > { %3767 = vmatmul.bf16.vlgmr.msra.gmra.mxu0 %v3277_v62  ;;  %v3678_v6 = vadd.f32 %v3677_v0, %v3344_v5 }
 0x35b   : > { %v3690_v38 = vpop.f32.mrf.mxu2 }
 0x35c   : > { %v3691_v8 = vadd.f32 %v3690_v38, %v3678_v6 }
 0x35d   : > { %v3679_v49 = vpop.f32.mrf.mxu1 }
 0x363   : > { %v3692_v9 = vpop.f32.mrf.mxu2 }
 0x375   : > { %v3729_v10 = vpop.f32.mrf.mxu1 }
 0x376   : > { %v3730_v50 = vadd.f32 %v3729_v10, %v3345_v11 }
 0x37b   : > { %v3742_v51 = vpop.f32.mrf.mxu2 }
 0x37c   : > { %v3743_v12 = vadd.f32 %v3742_v51, %v3730_v50 }
 0x37d   : > { %v3731_v13 = vpop.f32.mrf.mxu1 }
 0x383   : > { %v3744_v4 = vpop.f32.mrf.mxu2 }
 0x38a   : > { %v3703_v15 = vpop.f32.mrf.mxu3 }
 0x38b   : > { %v3704_v58 = vadd.f32 %v3703_v15, %v3691_v8 }
 0x392   : > { %v3705_v22 = vpop.f32.mrf.mxu3 }
 0x39a   : > { %v3755_v7 = vpop.f32.mrf.mxu3 }
 0x39b   : > { %v3756_v36 = vadd.f32 %v3755_v7, %v3743_v12 }
 0x3a2   : > { %v3757_v25 = vpop.f32.mrf.mxu3 }
 0x3c3   : > { %v3716_v31 = vpop.f32.mrf.mxu0 }
 0x3c4   : > { %v3717_v3 = vadd.f32 %v3716_v31, %v3704_v58 }
 0x3c6   : > { %v3772_v14 = vmax.f32 %v3717_v3, 0.0 }
 0x3c8   : > { %v3774_v32 = vpack.c.bf16 %v3772_v14, %v3772_v14 }
 0x3ca   : > { %3916 = vmatmul.bf16.vlgmr.msra.gmra.mxu1 %v3774_v32 }
 0x3cb   : > { %v3718_v33 = vpop.f32.mrf.mxu0 }
 0x3d3   : > { %v3768_v37 = vpop.f32.mrf.mxu0 }
 0x3d4   : > { %v3769_v39 = vadd.f32 %v3768_v37, %v3756_v36 }
 0x3d6   : > { %v3773_v53 = vmax.f32 %v3769_v39, 0.0 }
 0x3d8   : > { %v3775_v17 = vpack.c.bf16 %v3773_v53, %v3773_v53 }
 0x3da   : > { %3929 = vmatmul.bf16.vlgmr.msra.gmra.mxu2 %v3775_v17 }
 0x3db   : > { %v3770_v40 = vpop.f32.mrf.mxu0 }
 0x447   : > { %v3917_v63 = vpop.f32.mrf.mxu1 }
 0x448   : > { %v3918_v43 = vadd.f32 %v6132_v42, %v3917_v63 }
 0x44f   : > { %v3919_v41 = vpop.f32.mrf.mxu1 }
 0x45d   : > { %v3930_v44 = vpop.f32.mrf.mxu2 }
 0x45e   : > { %v3931_v45 = vadd.f32 %v3930_v44, %v3918_v43 }
 0x460   : > { %3934 = vst [vmem:[%s507_s7] sm:$0x1] %v3931_v45 }
 0x465   : > { %v3932_v46 = vpop.f32.mrf.mxu2 }
 0x466 PF: > { %s6651_s13 = sld [smem:[#allocation11_spill]]  ;;  %s6653_s26 = smov %s6655_s20 }
 0x467   : > { %s6652_s25 = sld [smem:[#allocation10_spill]] }
 0x46c   : > { %s25_s27 = sadd.s32 1, %s6651_s13  }
 0x46d   : > { %p22_p9 = scmp.ge.s32.totalorder %s25_s27, 4  }
 0x46f   :  { %24 = sbr.rel (!%p22_p9) target bundleno = 6 (0x6), region = 127 }
 0x474   :  { %3952 = vsyncpa [#allocation4], 1 }
 0x475   :  { %3954 = vsyncpa [#allocation4 + $0x1], 1 }
 0x476   :  { %3955 = vsyncpa [#allocation6], 1 }

</bundles_post_ra>
